<compile_context>
chip_gen: v6e
topology: v6e:2x2x1
jax: 0.10.0
libtpu: 0.0.40
codegen_flags: <defaults>
</compile_context>

<pallas_src>
import functools

import jax
import jax.numpy as jnp
from jax.experimental import pallas as pl
from jax.experimental.pallas import tpu as pltpu


def _backbone_kernel(x_ref,
                     w1_ref, b1_ref, gw1_ref, gb1_ref,
                     w2_ref, b2_ref, gw2_ref, gb2_ref,
                     w3_ref, b3_ref, gw3_ref, gb3_ref,
                     o_ref,
                     p1_ref, p2_ref, p3_ref,
                     *, H, W, Cin, C):
    """Fused SimpleCNN backbone for one batch element (grid=(B,)).

    x_ref : (1, H, W, Cin)       input tile (NHWC)
    wN_ref: (9*CinN, C)          im2col-reshaped 3x3 conv weights of block N
    bN_ref: (1, C)               conv bias of block N
    gwN_ref:(CinN, C), gbN:(1,C) channel-gate head of block N
    o_ref : (1, H//4 * W//4, C)  final activation, rows in row-major (h, w)
    pN_ref: VMEM scratch holding the zero-padded (halo) input of block N
    """
    H2, W2 = H // 2, W // 2
    H3, W3 = H2 // 2, W2 // 2

    def gated_conv(pad_ref, HL, WL, CIN, x_hwc, w_ref, b_ref, gw_ref, gb_ref):
        # --- in-kernel SAME padding: zero the scratch, copy the interior.
        # Interior sits at W-offset 8 so the store is sublane-aligned; the
        # halo columns used by the taps are 7 .. 8+WL (all zero).  The slab
        # is re-zeroed every grid step on purpose: with the batch axis marked
        # "parallel" (megacore sharding) a program_id==0-gated init would be
        # unsafe, and the zero stores are noise relative to step overhead.
        pad_ref[...] = jnp.zeros_like(pad_ref)
        pad_ref[1:1 + HL, 8:8 + WL, :] = x_hwc
        xp = pad_ref[...]                                    # (HL+2, WL+16, CIN)

        # --- im2col: 9 shifted views, concatenated along the lane axis.
        # Tap order is (dh, dw, cin), matching the (3,3,Cin,C)->(9*Cin,C)
        # reshape of the weights on the host side.
        taps = [xp[dh:dh + HL, 7 + dw:7 + dw + WL, :].reshape(HL * WL, CIN)
                for dh in range(3) for dw in range(3)]
        patches = jnp.concatenate(taps, axis=1)              # (HL*WL, 9*CIN)

        # --- single MXU matmul for the whole 3x3 conv, then bias + ReLU.
        y = jnp.dot(patches, w_ref[...], preferred_element_type=jnp.float32)
        y = jnp.maximum(y + b_ref[...], 0.0)                 # (HL*WL, C)

        # --- channel gate: sigmoid(GAP(x) @ gw + gb).
        # Full-height matmul on the (already resident) center tap followed by
        # a VPU/XLU row reduction -- avoids a 1-row MXU matmul bubble and
        # overlaps with the conv matmul above.
        g = jnp.dot(taps[4], gw_ref[...], preferred_element_type=jnp.float32)
        logits = jnp.sum(g, axis=0, keepdims=True) * (1.0 / (HL * WL))
        gate = jax.nn.sigmoid(logits + gb_ref[...])          # (1, C)
        return y * gate                                      # (HL*WL, C)

    def maxpool2x2(y_hwc, HL, WL):
        # 2x2/stride-2 max pool, fused in-kernel (lane dim C kept intact).
        y = y_hwc.reshape(HL, WL // 2, 2, C)
        y = jnp.maximum(y[:, :, 0, :], y[:, :, 1, :])        # (HL, WL//2, C)
        y = y.reshape(HL // 2, 2, WL // 2, C)
        y = jnp.maximum(y[:, 0, :, :], y[:, 1, :, :])        # (HL//2, WL//2, C)
        return y

    # block 1: 'down'  (H, W, Cin) -> (H2, W2, C)
    y1 = gated_conv(p1_ref, H, W, Cin, x_ref[0], w1_ref, b1_ref, gw1_ref, gb1_ref)
    y1 = maxpool2x2(y1.reshape(H, W, C), H, W)

    # block 2: 'down'  (H2, W2, C) -> (H3, W3, C)
    y2 = gated_conv(p2_ref, H2, W2, C, y1, w2_ref, b2_ref, gw2_ref, gb2_ref)
    y2 = maxpool2x2(y2.reshape(H2, W2, C), H2, W2)

    # block 3: 'same'  (H3, W3, C) -> (H3, W3, C)
    y3 = gated_conv(p3_ref, H3, W3, C, y2, w3_ref, b3_ref, gw3_ref, gb3_ref)

    o_ref[0] = y3                                            # (H3*W3, C)


def backbone_forward(x_nchw, params):
    """x_nchw: (B, in_ch, H, W) -> (B, N_tasks=1, conv_ch, H//4, W//4)."""
    B, Cin, H, W = x_nchw.shape
    assert H % 4 == 0 and W % 4 == 0, "SimpleCNN needs H, W divisible by 4"
    (w1, b1, gw1, gb1), (w2, b2, gw2, gb2), (w3, b3, gw3, gb3) = params
    C = w1.shape[-1]
    H2, W2, H3, W3 = H // 2, W // 2, H // 4, W // 4

    x = jnp.transpose(x_nchw, (0, 2, 3, 1))                  # NCHW -> NHWC

    # im2col-reshaped conv weights; tap order (dh, dw, cin) matches the kernel.
    w1r = w1.reshape(9 * Cin, C)
    w2r = w2.reshape(9 * C, C)
    w3r = w3.reshape(9 * C, C)
    b1r, b2r, b3r = b1.reshape(1, C), b2.reshape(1, C), b3.reshape(1, C)
    gb1r, gb2r, gb3r = gb1.reshape(1, C), gb2.reshape(1, C), gb3.reshape(1, C)

    kernel = functools.partial(_backbone_kernel, H=H, W=W, Cin=Cin, C=C)

    # Weights are ~90 KB total with constant index maps, so they are fetched
    # into VMEM once and reused across the B grid steps.
    const2d = lambda b: (0, 0)
    out_flat = pl.pallas_call(
        kernel,
        out_shape=jax.ShapeDtypeStruct((B, H3 * W3, C), jnp.float32),
        grid=(B,),
        in_specs=[
            pl.BlockSpec((1, H, W, Cin), lambda b: (b, 0, 0, 0)),
            pl.BlockSpec((9 * Cin, C), const2d),
            pl.BlockSpec((1, C), const2d),
            pl.BlockSpec((Cin, C), const2d),
            pl.BlockSpec((1, C), const2d),
            pl.BlockSpec((9 * C, C), const2d),
            pl.BlockSpec((1, C), const2d),
            pl.BlockSpec((C, C), const2d),
            pl.BlockSpec((1, C), const2d),
            pl.BlockSpec((9 * C, C), const2d),
            pl.BlockSpec((1, C), const2d),
            pl.BlockSpec((C, C), const2d),
            pl.BlockSpec((1, C), const2d),
        ],
        out_specs=pl.BlockSpec((1, H3 * W3, C), lambda b: (b, 0, 0)),
        scratch_shapes=[
            pltpu.VMEM((H + 2, W + 16, Cin), jnp.float32),   # block-1 halo tile
            pltpu.VMEM((H2 + 2, W2 + 16, C), jnp.float32),   # block-2 halo tile
            pltpu.VMEM((H3 + 2, W3 + 16, C), jnp.float32),   # block-3 halo tile
        ],
        compiler_params=pltpu.CompilerParams(
            dimension_semantics=("parallel",)),
    )(x, w1r, b1r, gw1, gb1r, w2r, b2r, gw2, gb2r, w3r, b3r, gw3, gb3r)

    out = out_flat.reshape(B, H3, W3, C)
    return jnp.transpose(out, (0, 3, 1, 2))[:, None]         # (B, 1, C, H', W')


# ----------------------------- parameter init --------------------------------

def init_backbone_params(key, in_ch, conv_ch):
    """SimpleCNN: down(in_ch->C), down(C->C), same(C->C)."""
    chans = [(in_ch, conv_ch), (conv_ch, conv_ch), (conv_ch, conv_ch)]
    params = []
    for li, (ci, co) in enumerate(chans):
        k = jax.random.fold_in(key, li)
        kw, kb, kg, kgb = jax.random.split(k, 4)
        fan_in = 9 * ci
        w = jax.random.normal(kw, (3, 3, ci, co), jnp.float32) / jnp.sqrt(fan_in)
        b = 0.01 * jax.random.normal(kb, (co,), jnp.float32)
        gw = jax.random.normal(kg, (ci, co), jnp.float32) / jnp.sqrt(ci)
        gb = 0.01 * jax.random.normal(kgb, (co,), jnp.float32)
        params.append((w, b, gw, gb))
    return params


# ------------------------------ pure-JAX reference ---------------------------

def _ref_block(x, w, b, gw, gb, pool):
    y = jax.lax.conv_general_dilated(
        x, w, window_strides=(1, 1), padding='SAME',
        dimension_numbers=('NHWC', 'HWIO', 'NHWC'),
        precision=jax.lax.Precision.HIGHEST)
    y = jax.nn.relu(y + b)
    gate = jax.nn.sigmoid(x.mean(axis=(1, 2)) @ gw + gb)[:, None, None, :]
    y = y * gate
    if pool:
        B, H, W, C = y.shape
        y = y.reshape(B, H // 2, 2, W // 2, 2, C).max(axis=(2, 4))
    return y


def backbone_reference(x_nchw, params):
    x = jnp.transpose(x_nchw, (0, 2, 3, 1))
    pools = [True, True, False]                               # down, down, same
    for (w, b, gw, gb), pool in zip(params, pools):
        x = _ref_block(x, w, b, gw, gb, pool)
    return jnp.transpose(x, (0, 3, 1, 2))[:, None]


if __name__ == "__main__":
    B, in_ch, conv_ch, H, W = 2, 4, 32, 16, 16
    key = jax.random.PRNGKey(0)
    kx, kp = jax.random.split(key)
    x = jax.random.normal(kx, (B, in_ch, H, W), jnp.float32)
    params = init_backbone_params(kp, in_ch, conv_ch)

    out = jax.jit(backbone_forward)(x, params)
    out = jax.block_until_ready(out)

    assert out.shape == (B, 1, conv_ch, H // 4, W // 4), out.shape

    ref = backbone_reference(x, params)
    assert jnp.allclose(out, ref, rtol=5e-3, atol=5e-3), \
        f"max abs diff {jnp.max(jnp.abs(out - ref))}"

    print("KERNEL_OK")
</pallas_src>

<mosaic_0001>
module attributes {stable_mosaic.version = 11 : i64} {
  func.func @_backbone_kernel(%arg0: i32, %arg1: memref<1x16x16x4xf32, #tpu.memory_space<vmem>>, %arg2: memref<36x32xf32, #tpu.memory_space<vmem>>, %arg3: memref<1x32xf32, #tpu.memory_space<vmem>>, %arg4: memref<4x32xf32, #tpu.memory_space<vmem>>, %arg5: memref<1x32xf32, #tpu.memory_space<vmem>>, %arg6: memref<288x32xf32, #tpu.memory_space<vmem>>, %arg7: memref<1x32xf32, #tpu.memory_space<vmem>>, %arg8: memref<32x32xf32, #tpu.memory_space<vmem>>, %arg9: memref<1x32xf32, #tpu.memory_space<vmem>>, %arg10: memref<288x32xf32, #tpu.memory_space<vmem>>, %arg11: memref<1x32xf32, #tpu.memory_space<vmem>>, %arg12: memref<32x32xf32, #tpu.memory_space<vmem>>, %arg13: memref<1x32xf32, #tpu.memory_space<vmem>>, %arg14: memref<1x16x32xf32, #tpu.memory_space<vmem>>, %arg15: memref<18x32x4xf32, #tpu.memory_space<vmem>>, %arg16: memref<10x24x32xf32, #tpu.memory_space<vmem>>, %arg17: memref<6x20x32xf32, #tpu.memory_space<vmem>>) attributes {dimension_semantics = [#tpu.dimension_semantics<parallel>], iteration_bounds = array<i64: 2>, scalar_prefetch = 0 : i64, scratch_operands = 3 : i64, tpu.core_type = #tpu.core_type<tc>, window_params = [{transform_indices = @transform_0, window_bounds = array<i64: 1, 16, 16, 4>}, {pipeline_mode = #tpu.pipeline_mode<synchronous>, transform_indices = @transform_1, window_bounds = array<i64: 36, 32>}, {pipeline_mode = #tpu.pipeline_mode<synchronous>, transform_indices = @transform_2, window_bounds = array<i64: 1, 32>}, {pipeline_mode = #tpu.pipeline_mode<synchronous>, transform_indices = @transform_3, window_bounds = array<i64: 4, 32>}, {pipeline_mode = #tpu.pipeline_mode<synchronous>, transform_indices = @transform_4, window_bounds = array<i64: 1, 32>}, {pipeline_mode = #tpu.pipeline_mode<synchronous>, transform_indices = @transform_5, window_bounds = array<i64: 288, 32>}, {pipeline_mode = #tpu.pipeline_mode<synchronous>, transform_indices = @transform_6, window_bounds = array<i64: 1, 32>}, {pipeline_mode = #tpu.pipeline_mode<synchronous>, transform_indices = @transform_7, window_bounds = array<i64: 32, 32>}, {pipeline_mode = #tpu.pipeline_mode<synchronous>, transform_indices = @transform_8, window_bounds = array<i64: 1, 32>}, {pipeline_mode = #tpu.pipeline_mode<synchronous>, transform_indices = @transform_9, window_bounds = array<i64: 288, 32>}, {pipeline_mode = #tpu.pipeline_mode<synchronous>, transform_indices = @transform_10, window_bounds = array<i64: 1, 32>}, {pipeline_mode = #tpu.pipeline_mode<synchronous>, transform_indices = @transform_11, window_bounds = array<i64: 32, 32>}, {pipeline_mode = #tpu.pipeline_mode<synchronous>, transform_indices = @transform_12, window_bounds = array<i64: 1, 32>}, {transform_indices = @transform_13, window_bounds = array<i64: 1, 16, 32>}]} {
    %c0 = arith.constant 0 : index
    %c0_0 = arith.constant 0 : index
    %c0_1 = arith.constant 0 : index
    %c0_2 = arith.constant 0 : index
    %0 = vector.load %arg1[%c0, %c0_0, %c0_1, %c0_2] : memref<1x16x16x4xf32, #tpu.memory_space<vmem>>, vector<1x16x16x4xf32>
    %1 = vector.shape_cast %0 : vector<1x16x16x4xf32> to vector<16x16x4xf32>
    %cst = arith.constant 0.000000e+00 : f32
    %2 = vector.broadcast %cst : f32 to vector<18x32x4xf32>
    %c0_3 = arith.constant 0 : index
    %c0_4 = arith.constant 0 : index
    %c0_5 = arith.constant 0 : index
    %3 = vector.load %arg15[%c0_3, %c0_4, %c0_5] : memref<18x32x4xf32, #tpu.memory_space<vmem>>, vector<18x32x4xf32>
    tpu.vector_store %arg15[%c0_3, %c0_4, %c0_5], %2 {strides = array<i32>} : memref<18x32x4xf32, #tpu.memory_space<vmem>>, vector<18x32x4xf32>,
    %c1 = arith.constant 1 : index
    %c8 = arith.constant 8 : index
    %c0_6 = arith.constant 0 : index
    %4 = vector.load %arg15[%c1, %c8, %c0_6] : memref<18x32x4xf32, #tpu.memory_space<vmem>>, vector<16x16x4xf32>
    tpu.vector_store %arg15[%c1, %c8, %c0_6], %1 {strides = array<i32>} : memref<18x32x4xf32, #tpu.memory_space<vmem>>, vector<16x16x4xf32>,
    %c0_7 = arith.constant 0 : index
    %c0_8 = arith.constant 0 : index
    %c0_9 = arith.constant 0 : index
    %5 = vector.load %arg15[%c0_7, %c0_8, %c0_9] : memref<18x32x4xf32, #tpu.memory_space<vmem>>, vector<18x32x4xf32>
    %6 = vector.extract_strided_slice %5 {offsets = [0, 7, 0], sizes = [16, 16, 4], strides = [1, 1, 1]} : vector<18x32x4xf32> to vector<16x16x4xf32>
    %7 = vector.shape_cast %6 : vector<16x16x4xf32> to vector<256x4xf32>
    %8 = vector.extract_strided_slice %5 {offsets = [0, 8, 0], sizes = [16, 16, 4], strides = [1, 1, 1]} : vector<18x32x4xf32> to vector<16x16x4xf32>
    %9 = vector.shape_cast %8 : vector<16x16x4xf32> to vector<256x4xf32>
    %10 = vector.extract_strided_slice %5 {offsets = [0, 9, 0], sizes = [16, 16, 4], strides = [1, 1, 1]} : vector<18x32x4xf32> to vector<16x16x4xf32>
    %11 = vector.shape_cast %10 : vector<16x16x4xf32> to vector<256x4xf32>
    %12 = vector.extract_strided_slice %5 {offsets = [1, 7, 0], sizes = [16, 16, 4], strides = [1, 1, 1]} : vector<18x32x4xf32> to vector<16x16x4xf32>
    %13 = vector.shape_cast %12 : vector<16x16x4xf32> to vector<256x4xf32>
    %14 = vector.extract_strided_slice %5 {offsets = [1, 8, 0], sizes = [16, 16, 4], strides = [1, 1, 1]} : vector<18x32x4xf32> to vector<16x16x4xf32>
    %15 = vector.shape_cast %14 : vector<16x16x4xf32> to vector<256x4xf32>
    %16 = vector.extract_strided_slice %5 {offsets = [1, 9, 0], sizes = [16, 16, 4], strides = [1, 1, 1]} : vector<18x32x4xf32> to vector<16x16x4xf32>
    %17 = vector.shape_cast %16 : vector<16x16x4xf32> to vector<256x4xf32>
    %18 = vector.extract_strided_slice %5 {offsets = [2, 7, 0], sizes = [16, 16, 4], strides = [1, 1, 1]} : vector<18x32x4xf32> to vector<16x16x4xf32>
    %19 = vector.shape_cast %18 : vector<16x16x4xf32> to vector<256x4xf32>
    %20 = vector.extract_strided_slice %5 {offsets = [2, 8, 0], sizes = [16, 16, 4], strides = [1, 1, 1]} : vector<18x32x4xf32> to vector<16x16x4xf32>
    %21 = vector.shape_cast %20 : vector<16x16x4xf32> to vector<256x4xf32>
    %22 = vector.extract_strided_slice %5 {offsets = [2, 9, 0], sizes = [16, 16, 4], strides = [1, 1, 1]} : vector<18x32x4xf32> to vector<16x16x4xf32>
    %23 = vector.shape_cast %22 : vector<16x16x4xf32> to vector<256x4xf32>
    %24 = tpu.concatenate %7, %9, %11, %13, %15, %17, %19, %21, %23 in 1 : vector<256x4xf32>, vector<256x4xf32>, vector<256x4xf32>, vector<256x4xf32>, vector<256x4xf32>, vector<256x4xf32>, vector<256x4xf32>, vector<256x4xf32>, vector<256x4xf32> -> vector<256x36xf32>
    %c0_10 = arith.constant 0 : index
    %c0_11 = arith.constant 0 : index
    %25 = vector.load %arg2[%c0_10, %c0_11] : memref<36x32xf32, #tpu.memory_space<vmem>>, vector<36x32xf32>
    %cst_12 = arith.constant dense<0.000000e+00> : vector<256x32xf32>
    %26 = tpu.matmul %24, %25, %cst_12 {dimension_numbers = #tpu.dot_dimension_numbers<[1], [0], [0], [1], [0, 0, 1, 1], [], []>} : vector<256x36xf32>, vector<36x32xf32>, vector<256x32xf32> -> vector<256x32xf32>
    %c0_13 = arith.constant 0 : index
    %c0_14 = arith.constant 0 : index
    %27 = vector.load %arg3[%c0_13, %c0_14] : memref<1x32xf32, #tpu.memory_space<vmem>>, vector<1x32xf32>
    %28 = vector.broadcast %27 : vector<1x32xf32> to vector<256x32xf32>
    %29 = arith.addf %26, %28 : vector<256x32xf32>
    %cst_15 = arith.constant 0.000000e+00 : f32
    %30 = vector.broadcast %cst_15 : f32 to vector<256x32xf32>
    %31 = arith.maximumf %29, %30 : vector<256x32xf32>
    %c0_16 = arith.constant 0 : index
    %c0_17 = arith.constant 0 : index
    %32 = vector.load %arg4[%c0_16, %c0_17] : memref<4x32xf32, #tpu.memory_space<vmem>>, vector<4x32xf32>
    %cst_18 = arith.constant dense<0.000000e+00> : vector<256x32xf32>
    %33 = tpu.matmul %15, %32, %cst_18 {dimension_numbers = #tpu.dot_dimension_numbers<[1], [0], [0], [1], [0, 0, 1, 1], [], []>} : vector<256x4xf32>, vector<4x32xf32>, vector<256x32xf32> -> vector<256x32xf32>
    %cst_19 = arith.constant dense<0.000000e+00> : vector<32xf32>
    %34 = vector.multi_reduction <add>, %33, %cst_19 [0] : vector<256x32xf32> to vector<32xf32>
    %35 = vector.shape_cast %34 : vector<32xf32> to vector<1x32xf32>
    %cst_20 = arith.constant 3.906250e-03 : f32
    %36 = vector.broadcast %cst_20 : f32 to vector<1x32xf32>
    %37 = arith.mulf %35, %36 : vector<1x32xf32>
    %c0_21 = arith.constant 0 : index
    %c0_22 = arith.constant 0 : index
    %38 = vector.load %arg5[%c0_21, %c0_22] : memref<1x32xf32, #tpu.memory_space<vmem>>, vector<1x32xf32>
    %39 = arith.addf %37, %38 : vector<1x32xf32>
    %40 = arith.negf %39 : vector<1x32xf32>
    %41 = math.exp %40 : vector<1x32xf32>
    %cst_23 = arith.constant 1.000000e+00 : f32
    %42 = vector.broadcast %cst_23 : f32 to vector<1x32xf32>
    %43 = arith.addf %42, %41 : vector<1x32xf32>
    %44 = arith.divf %42, %43 : vector<1x32xf32>
    %45 = vector.broadcast %44 : vector<1x32xf32> to vector<256x32xf32>
    %46 = arith.mulf %31, %45 : vector<256x32xf32>
    %47 = vector.shape_cast %46 : vector<256x32xf32> to vector<16x16x32xf32>
    %48 = vector.shape_cast %47 : vector<16x16x32xf32> to vector<16x8x2x32xf32>
    %49 = vector.extract_strided_slice %48 {offsets = [0, 0, 0, 0], sizes = [16, 8, 1, 32], strides = [1, 1, 1, 1]} : vector<16x8x2x32xf32> to vector<16x8x1x32xf32>
    %50 = vector.shape_cast %49 : vector<16x8x1x32xf32> to vector<16x8x32xf32>
    %51 = vector.extract_strided_slice %48 {offsets = [0, 0, 1, 0], sizes = [16, 8, 1, 32], strides = [1, 1, 1, 1]} : vector<16x8x2x32xf32> to vector<16x8x1x32xf32>
    %52 = vector.shape_cast %51 : vector<16x8x1x32xf32> to vector<16x8x32xf32>
    %53 = arith.maximumf %50, %52 : vector<16x8x32xf32>
    %54 = vector.shape_cast %53 : vector<16x8x32xf32> to vector<8x2x8x32xf32>
    %55 = vector.extract_strided_slice %54 {offsets = [0, 0, 0, 0], sizes = [8, 1, 8, 32], strides = [1, 1, 1, 1]} : vector<8x2x8x32xf32> to vector<8x1x8x32xf32>
    %56 = vector.shape_cast %55 : vector<8x1x8x32xf32> to vector<8x8x32xf32>
    %57 = vector.extract_strided_slice %54 {offsets = [0, 1, 0, 0], sizes = [8, 1, 8, 32], strides = [1, 1, 1, 1]} : vector<8x2x8x32xf32> to vector<8x1x8x32xf32>
    %58 = vector.shape_cast %57 : vector<8x1x8x32xf32> to vector<8x8x32xf32>
    %59 = arith.maximumf %56, %58 : vector<8x8x32xf32>
    %cst_24 = arith.constant 0.000000e+00 : f32
    %60 = vector.broadcast %cst_24 : f32 to vector<10x24x32xf32>
    %c0_25 = arith.constant 0 : index
    %c0_26 = arith.constant 0 : index
    %c0_27 = arith.constant 0 : index
    %61 = vector.load %arg16[%c0_25, %c0_26, %c0_27] : memref<10x24x32xf32, #tpu.memory_space<vmem>>, vector<10x24x32xf32>
    tpu.vector_store %arg16[%c0_25, %c0_26, %c0_27], %60 {strides = array<i32>} : memref<10x24x32xf32, #tpu.memory_space<vmem>>, vector<10x24x32xf32>,
    %c1_28 = arith.constant 1 : index
    %c8_29 = arith.constant 8 : index
    %c0_30 = arith.constant 0 : index
    %62 = vector.load %arg16[%c1_28, %c8_29, %c0_30] : memref<10x24x32xf32, #tpu.memory_space<vmem>>, vector<8x8x32xf32>
    tpu.vector_store %arg16[%c1_28, %c8_29, %c0_30], %59 {strides = array<i32>} : memref<10x24x32xf32, #tpu.memory_space<vmem>>, vector<8x8x32xf32>,
    %c0_31 = arith.constant 0 : index
    %c0_32 = arith.constant 0 : index
    %c0_33 = arith.constant 0 : index
    %63 = vector.load %arg16[%c0_31, %c0_32, %c0_33] : memref<10x24x32xf32, #tpu.memory_space<vmem>>, vector<10x24x32xf32>
    %64 = vector.extract_strided_slice %63 {offsets = [0, 7, 0], sizes = [8, 8, 32], strides = [1, 1, 1]} : vector<10x24x32xf32> to vector<8x8x32xf32>
    %65 = vector.shape_cast %64 : vector<8x8x32xf32> to vector<64x32xf32>
    %66 = vector.extract_strided_slice %63 {offsets = [0, 8, 0], sizes = [8, 8, 32], strides = [1, 1, 1]} : vector<10x24x32xf32> to vector<8x8x32xf32>
    %67 = vector.shape_cast %66 : vector<8x8x32xf32> to vector<64x32xf32>
    %68 = vector.extract_strided_slice %63 {offsets = [0, 9, 0], sizes = [8, 8, 32], strides = [1, 1, 1]} : vector<10x24x32xf32> to vector<8x8x32xf32>
    %69 = vector.shape_cast %68 : vector<8x8x32xf32> to vector<64x32xf32>
    %70 = vector.extract_strided_slice %63 {offsets = [1, 7, 0], sizes = [8, 8, 32], strides = [1, 1, 1]} : vector<10x24x32xf32> to vector<8x8x32xf32>
    %71 = vector.shape_cast %70 : vector<8x8x32xf32> to vector<64x32xf32>
    %72 = vector.extract_strided_slice %63 {offsets = [1, 8, 0], sizes = [8, 8, 32], strides = [1, 1, 1]} : vector<10x24x32xf32> to vector<8x8x32xf32>
    %73 = vector.shape_cast %72 : vector<8x8x32xf32> to vector<64x32xf32>
    %74 = vector.extract_strided_slice %63 {offsets = [1, 9, 0], sizes = [8, 8, 32], strides = [1, 1, 1]} : vector<10x24x32xf32> to vector<8x8x32xf32>
    %75 = vector.shape_cast %74 : vector<8x8x32xf32> to vector<64x32xf32>
    %76 = vector.extract_strided_slice %63 {offsets = [2, 7, 0], sizes = [8, 8, 32], strides = [1, 1, 1]} : vector<10x24x32xf32> to vector<8x8x32xf32>
    %77 = vector.shape_cast %76 : vector<8x8x32xf32> to vector<64x32xf32>
    %78 = vector.extract_strided_slice %63 {offsets = [2, 8, 0], sizes = [8, 8, 32], strides = [1, 1, 1]} : vector<10x24x32xf32> to vector<8x8x32xf32>
    %79 = vector.shape_cast %78 : vector<8x8x32xf32> to vector<64x32xf32>
    %80 = vector.extract_strided_slice %63 {offsets = [2, 9, 0], sizes = [8, 8, 32], strides = [1, 1, 1]} : vector<10x24x32xf32> to vector<8x8x32xf32>
    %81 = vector.shape_cast %80 : vector<8x8x32xf32> to vector<64x32xf32>
    %82 = tpu.concatenate %65, %67, %69, %71, %73, %75, %77, %79, %81 in 1 : vector<64x32xf32>, vector<64x32xf32>, vector<64x32xf32>, vector<64x32xf32>, vector<64x32xf32>, vector<64x32xf32>, vector<64x32xf32>, vector<64x32xf32>, vector<64x32xf32> -> vector<64x288xf32>
    %c0_34 = arith.constant 0 : index
    %c0_35 = arith.constant 0 : index
    %83 = vector.load %arg6[%c0_34, %c0_35] : memref<288x32xf32, #tpu.memory_space<vmem>>, vector<288x32xf32>
    %cst_36 = arith.constant dense<0.000000e+00> : vector<64x32xf32>
    %84 = tpu.matmul %82, %83, %cst_36 {dimension_numbers = #tpu.dot_dimension_numbers<[1], [0], [0], [1], [0, 0, 1, 1], [], []>} : vector<64x288xf32>, vector<288x32xf32>, vector<64x32xf32> -> vector<64x32xf32>
    %c0_37 = arith.constant 0 : index
    %c0_38 = arith.constant 0 : index
    %85 = vector.load %arg7[%c0_37, %c0_38] : memref<1x32xf32, #tpu.memory_space<vmem>>, vector<1x32xf32>
    %86 = vector.broadcast %85 : vector<1x32xf32> to vector<64x32xf32>
    %87 = arith.addf %84, %86 : vector<64x32xf32>
    %cst_39 = arith.constant 0.000000e+00 : f32
    %88 = vector.broadcast %cst_39 : f32 to vector<64x32xf32>
    %89 = arith.maximumf %87, %88 : vector<64x32xf32>
    %c0_40 = arith.constant 0 : index
    %c0_41 = arith.constant 0 : index
    %90 = vector.load %arg8[%c0_40, %c0_41] : memref<32x32xf32, #tpu.memory_space<vmem>>, vector<32x32xf32>
    %cst_42 = arith.constant dense<0.000000e+00> : vector<64x32xf32>
    %91 = tpu.matmul %73, %90, %cst_42 {dimension_numbers = #tpu.dot_dimension_numbers<[1], [0], [0], [1], [0, 0, 1, 1], [], []>} : vector<64x32xf32>, vector<32x32xf32>, vector<64x32xf32> -> vector<64x32xf32>
    %cst_43 = arith.constant dense<0.000000e+00> : vector<32xf32>
    %92 = vector.multi_reduction <add>, %91, %cst_43 [0] : vector<64x32xf32> to vector<32xf32>
    %93 = vector.shape_cast %92 : vector<32xf32> to vector<1x32xf32>
    %cst_44 = arith.constant 1.562500e-02 : f32
    %94 = vector.broadcast %cst_44 : f32 to vector<1x32xf32>
    %95 = arith.mulf %93, %94 : vector<1x32xf32>
    %c0_45 = arith.constant 0 : index
    %c0_46 = arith.constant 0 : index
    %96 = vector.load %arg9[%c0_45, %c0_46] : memref<1x32xf32, #tpu.memory_space<vmem>>, vector<1x32xf32>
    %97 = arith.addf %95, %96 : vector<1x32xf32>
    %98 = arith.negf %97 : vector<1x32xf32>
    %99 = math.exp %98 : vector<1x32xf32>
    %cst_47 = arith.constant 1.000000e+00 : f32
    %100 = vector.broadcast %cst_47 : f32 to vector<1x32xf32>
    %101 = arith.addf %100, %99 : vector<1x32xf32>
    %102 = arith.divf %100, %101 : vector<1x32xf32>
    %103 = vector.broadcast %102 : vector<1x32xf32> to vector<64x32xf32>
    %104 = arith.mulf %89, %103 : vector<64x32xf32>
    %105 = vector.shape_cast %104 : vector<64x32xf32> to vector<8x8x32xf32>
    %106 = vector.shape_cast %105 : vector<8x8x32xf32> to vector<8x4x2x32xf32>
    %107 = vector.extract_strided_slice %106 {offsets = [0, 0, 0, 0], sizes = [8, 4, 1, 32], strides = [1, 1, 1, 1]} : vector<8x4x2x32xf32> to vector<8x4x1x32xf32>
    %108 = vector.shape_cast %107 : vector<8x4x1x32xf32> to vector<8x4x32xf32>
    %109 = vector.extract_strided_slice %106 {offsets = [0, 0, 1, 0], sizes = [8, 4, 1, 32], strides = [1, 1, 1, 1]} : vector<8x4x2x32xf32> to vector<8x4x1x32xf32>
    %110 = vector.shape_cast %109 : vector<8x4x1x32xf32> to vector<8x4x32xf32>
    %111 = arith.maximumf %108, %110 : vector<8x4x32xf32>
    %112 = vector.shape_cast %111 : vector<8x4x32xf32> to vector<4x2x4x32xf32>
    %113 = vector.extract_strided_slice %112 {offsets = [0, 0, 0, 0], sizes = [4, 1, 4, 32], strides = [1, 1, 1, 1]} : vector<4x2x4x32xf32> to vector<4x1x4x32xf32>
    %114 = vector.shape_cast %113 : vector<4x1x4x32xf32> to vector<4x4x32xf32>
    %115 = vector.extract_strided_slice %112 {offsets = [0, 1, 0, 0], sizes = [4, 1, 4, 32], strides = [1, 1, 1, 1]} : vector<4x2x4x32xf32> to vector<4x1x4x32xf32>
    %116 = vector.shape_cast %115 : vector<4x1x4x32xf32> to vector<4x4x32xf32>
    %117 = arith.maximumf %114, %116 : vector<4x4x32xf32>
    %cst_48 = arith.constant 0.000000e+00 : f32
    %118 = vector.broadcast %cst_48 : f32 to vector<6x20x32xf32>
    %c0_49 = arith.constant 0 : index
    %c0_50 = arith.constant 0 : index
    %c0_51 = arith.constant 0 : index
    %119 = vector.load %arg17[%c0_49, %c0_50, %c0_51] : memref<6x20x32xf32, #tpu.memory_space<vmem>>, vector<6x20x32xf32>
    tpu.vector_store %arg17[%c0_49, %c0_50, %c0_51], %118 {strides = array<i32>} : memref<6x20x32xf32, #tpu.memory_space<vmem>>, vector<6x20x32xf32>,
    %c1_52 = arith.constant 1 : index
    %c8_53 = arith.constant 8 : index
    %c0_54 = arith.constant 0 : index
    %120 = vector.load %arg17[%c1_52, %c8_53, %c0_54] : memref<6x20x32xf32, #tpu.memory_space<vmem>>, vector<4x4x32xf32>
    tpu.vector_store %arg17[%c1_52, %c8_53, %c0_54], %117 {strides = array<i32>} : memref<6x20x32xf32, #tpu.memory_space<vmem>>, vector<4x4x32xf32>,
    %c0_55 = arith.constant 0 : index
    %c0_56 = arith.constant 0 : index
    %c0_57 = arith.constant 0 : index
    %121 = vector.load %arg17[%c0_55, %c0_56, %c0_57] : memref<6x20x32xf32, #tpu.memory_space<vmem>>, vector<6x20x32xf32>
    %122 = vector.extract_strided_slice %121 {offsets = [0, 7, 0], sizes = [4, 4, 32], strides = [1, 1, 1]} : vector<6x20x32xf32> to vector<4x4x32xf32>
    %123 = vector.shape_cast %122 : vector<4x4x32xf32> to vector<16x32xf32>
    %124 = vector.extract_strided_slice %121 {offsets = [0, 8, 0], sizes = [4, 4, 32], strides = [1, 1, 1]} : vector<6x20x32xf32> to vector<4x4x32xf32>
    %125 = vector.shape_cast %124 : vector<4x4x32xf32> to vector<16x32xf32>
    %126 = vector.extract_strided_slice %121 {offsets = [0, 9, 0], sizes = [4, 4, 32], strides = [1, 1, 1]} : vector<6x20x32xf32> to vector<4x4x32xf32>
    %127 = vector.shape_cast %126 : vector<4x4x32xf32> to vector<16x32xf32>
    %128 = vector.extract_strided_slice %121 {offsets = [1, 7, 0], sizes = [4, 4, 32], strides = [1, 1, 1]} : vector<6x20x32xf32> to vector<4x4x32xf32>
    %129 = vector.shape_cast %128 : vector<4x4x32xf32> to vector<16x32xf32>
    %130 = vector.extract_strided_slice %121 {offsets = [1, 8, 0], sizes = [4, 4, 32], strides = [1, 1, 1]} : vector<6x20x32xf32> to vector<4x4x32xf32>
    %131 = vector.shape_cast %130 : vector<4x4x32xf32> to vector<16x32xf32>
    %132 = vector.extract_strided_slice %121 {offsets = [1, 9, 0], sizes = [4, 4, 32], strides = [1, 1, 1]} : vector<6x20x32xf32> to vector<4x4x32xf32>
    %133 = vector.shape_cast %132 : vector<4x4x32xf32> to vector<16x32xf32>
    %134 = vector.extract_strided_slice %121 {offsets = [2, 7, 0], sizes = [4, 4, 32], strides = [1, 1, 1]} : vector<6x20x32xf32> to vector<4x4x32xf32>
    %135 = vector.shape_cast %134 : vector<4x4x32xf32> to vector<16x32xf32>
    %136 = vector.extract_strided_slice %121 {offsets = [2, 8, 0], sizes = [4, 4, 32], strides = [1, 1, 1]} : vector<6x20x32xf32> to vector<4x4x32xf32>
    %137 = vector.shape_cast %136 : vector<4x4x32xf32> to vector<16x32xf32>
    %138 = vector.extract_strided_slice %121 {offsets = [2, 9, 0], sizes = [4, 4, 32], strides = [1, 1, 1]} : vector<6x20x32xf32> to vector<4x4x32xf32>
    %139 = vector.shape_cast %138 : vector<4x4x32xf32> to vector<16x32xf32>
    %140 = tpu.concatenate %123, %125, %127, %129, %131, %133, %135, %137, %139 in 1 : vector<16x32xf32>, vector<16x32xf32>, vector<16x32xf32>, vector<16x32xf32>, vector<16x32xf32>, vector<16x32xf32>, vector<16x32xf32>, vector<16x32xf32>, vector<16x32xf32> -> vector<16x288xf32>
    %c0_58 = arith.constant 0 : index
    %c0_59 = arith.constant 0 : index
    %141 = vector.load %arg10[%c0_58, %c0_59] : memref<288x32xf32, #tpu.memory_space<vmem>>, vector<288x32xf32>
    %cst_60 = arith.constant dense<0.000000e+00> : vector<16x32xf32>
    %142 = tpu.matmul %140, %141, %cst_60 {dimension_numbers = #tpu.dot_dimension_numbers<[1], [0], [0], [1], [0, 0, 1, 1], [], []>} : vector<16x288xf32>, vector<288x32xf32>, vector<16x32xf32> -> vector<16x32xf32>
    %c0_61 = arith.constant 0 : index
    %c0_62 = arith.constant 0 : index
    %143 = vector.load %arg11[%c0_61, %c0_62] : memref<1x32xf32, #tpu.memory_space<vmem>>, vector<1x32xf32>
    %144 = vector.broadcast %143 : vector<1x32xf32> to vector<16x32xf32>
    %145 = arith.addf %142, %144 : vector<16x32xf32>
    %cst_63 = arith.constant 0.000000e+00 : f32
    %146 = vector.broadcast %cst_63 : f32 to vector<16x32xf32>
    %147 = arith.maximumf %145, %146 : vector<16x32xf32>
    %c0_64 = arith.constant 0 : index
    %c0_65 = arith.constant 0 : index
    %148 = vector.load %arg12[%c0_64, %c0_65] : memref<32x32xf32, #tpu.memory_space<vmem>>, vector<32x32xf32>
    %cst_66 = arith.constant dense<0.000000e+00> : vector<16x32xf32>
    %149 = tpu.matmul %131, %148, %cst_66 {dimension_numbers = #tpu.dot_dimension_numbers<[1], [0], [0], [1], [0, 0, 1, 1], [], []>} : vector<16x32xf32>, vector<32x32xf32>, vector<16x32xf32> -> vector<16x32xf32>
    %cst_67 = arith.constant dense<0.000000e+00> : vector<32xf32>
    %150 = vector.multi_reduction <add>, %149, %cst_67 [0] : vector<16x32xf32> to vector<32xf32>
    %151 = vector.shape_cast %150 : vector<32xf32> to vector<1x32xf32>
    %cst_68 = arith.constant 6.250000e-02 : f32
    %152 = vector.broadcast %cst_68 : f32 to vector<1x32xf32>
    %153 = arith.mulf %151, %152 : vector<1x32xf32>
    %c0_69 = arith.constant 0 : index
    %c0_70 = arith.constant 0 : index
    %154 = vector.load %arg13[%c0_69, %c0_70] : memref<1x32xf32, #tpu.memory_space<vmem>>, vector<1x32xf32>
    %155 = arith.addf %153, %154 : vector<1x32xf32>
    %156 = arith.negf %155 : vector<1x32xf32>
    %157 = math.exp %156 : vector<1x32xf32>
    %cst_71 = arith.constant 1.000000e+00 : f32
    %158 = vector.broadcast %cst_71 : f32 to vector<1x32xf32>
    %159 = arith.addf %158, %157 : vector<1x32xf32>
    %160 = arith.divf %158, %159 : vector<1x32xf32>
    %161 = vector.broadcast %160 : vector<1x32xf32> to vector<16x32xf32>
    %162 = arith.mulf %147, %161 : vector<16x32xf32>
    %c0_72 = arith.constant 0 : index
    %c0_73 = arith.constant 0 : index
    %c0_74 = arith.constant 0 : index
    %163 = vector.load %arg14[%c0_72, %c0_73, %c0_74] : memref<1x16x32xf32, #tpu.memory_space<vmem>>, vector<1x16x32xf32>
    %164 = vector.shape_cast %163 : vector<1x16x32xf32> to vector<16x32xf32>
    %165 = vector.shape_cast %162 : vector<16x32xf32> to vector<1x16x32xf32>
    tpu.vector_store %arg14[%c0_72, %c0_73, %c0_74], %165 {strides = array<i32>} : memref<1x16x32xf32, #tpu.memory_space<vmem>>, vector<1x16x32xf32>,
    return
  }
  func.func @transform_0(%arg0: i32) -> (i32, i32, i32, i32) {
    %c0_i32 = arith.constant 0 : i32
    %c0_i32_0 = arith.constant 0 : i32
    %c0_i32_1 = arith.constant 0 : i32
    %c0_i32_2 = arith.constant 0 : i32
    return %arg0, %c0_i32, %c0_i32_0, %c0_i32_1 : i32, i32, i32, i32
  }
  func.func @transform_1(%arg0: i32) -> (i32, i32) {
    %c0_i32 = arith.constant 0 : i32
    %c0_i32_0 = arith.constant 0 : i32
    %c0_i32_1 = arith.constant 0 : i32
    return %c0_i32, %c0_i32_0 : i32, i32
  }
  func.func @transform_2(%arg0: i32) -> (i32, i32) {
    %c0_i32 = arith.constant 0 : i32
    %c0_i32_0 = arith.constant 0 : i32
    %c0_i32_1 = arith.constant 0 : i32
    return %c0_i32, %c0_i32_0 : i32, i32
  }
  func.func @transform_3(%arg0: i32) -> (i32, i32) {
    %c0_i32 = arith.constant 0 : i32
    %c0_i32_0 = arith.constant 0 : i32
    %c0_i32_1 = arith.constant 0 : i32
    return %c0_i32, %c0_i32_0 : i32, i32
  }
  func.func @transform_4(%arg0: i32) -> (i32, i32) {
    %c0_i32 = arith.constant 0 : i32
    %c0_i32_0 = arith.constant 0 : i32
    %c0_i32_1 = arith.constant 0 : i32
    return %c0_i32, %c0_i32_0 : i32, i32
  }
  func.func @transform_5(%arg0: i32) -> (i32, i32) {
    %c0_i32 = arith.constant 0 : i32
    %c0_i32_0 = arith.constant 0 : i32
    %c0_i32_1 = arith.constant 0 : i32
    return %c0_i32, %c0_i32_0 : i32, i32
  }
  func.func @transform_6(%arg0: i32) -> (i32, i32) {
    %c0_i32 = arith.constant 0 : i32
    %c0_i32_0 = arith.constant 0 : i32
    %c0_i32_1 = arith.constant 0 : i32
    return %c0_i32, %c0_i32_0 : i32, i32
  }
  func.func @transform_7(%arg0: i32) -> (i32, i32) {
    %c0_i32 = arith.constant 0 : i32
    %c0_i32_0 = arith.constant 0 : i32
    %c0_i32_1 = arith.constant 0 : i32
    return %c0_i32, %c0_i32_0 : i32, i32
  }
  func.func @transform_8(%arg0: i32) -> (i32, i32) {
    %c0_i32 = arith.constant 0 : i32
    %c0_i32_0 = arith.constant 0 : i32
    %c0_i32_1 = arith.constant 0 : i32
    return %c0_i32, %c0_i32_0 : i32, i32
  }
  func.func @transform_9(%arg0: i32) -> (i32, i32) {
    %c0_i32 = arith.constant 0 : i32
    %c0_i32_0 = arith.constant 0 : i32
    %c0_i32_1 = arith.constant 0 : i32
    return %c0_i32, %c0_i32_0 : i32, i32
  }
  func.func @transform_10(%arg0: i32) -> (i32, i32) {
    %c0_i32 = arith.constant 0 : i32
    %c0_i32_0 = arith.constant 0 : i32
    %c0_i32_1 = arith.constant 0 : i32
    return %c0_i32, %c0_i32_0 : i32, i32
  }
  func.func @transform_11(%arg0: i32) -> (i32, i32) {
    %c0_i32 = arith.constant 0 : i32
    %c0_i32_0 = arith.constant 0 : i32
    %c0_i32_1 = arith.constant 0 : i32
    return %c0_i32, %c0_i32_0 : i32, i32
  }
  func.func @transform_12(%arg0: i32) -> (i32, i32) {
    %c0_i32 = arith.constant 0 : i32
    %c0_i32_0 = arith.constant 0 : i32
    %c0_i32_1 = arith.constant 0 : i32
    return %c0_i32, %c0_i32_0 : i32, i32
  }
  func.func @transform_13(%arg0: i32) -> (i32, i32, i32) {
    %c0_i32 = arith.constant 0 : i32
    %c0_i32_0 = arith.constant 0 : i32
    %c0_i32_1 = arith.constant 0 : i32
    return %arg0, %c0_i32, %c0_i32_0 : i32, i32, i32
  }
}

</mosaic_0001>

<bundles_post_ra>
// kernel: backbone_forward.1
= control target key start
LH: loop header
LB: loop body
LE: loop exit
PB: predicated region body
PF: predicated region fallthrough
CT: control target
= control target key end

     0   :  { %s10224_s0 = inlined_call_operand.vmem [shape: f32[2,16,16,4], index: 0, kind: input, shape index: {}]   ;;  %s10225_s1 = inlined_call_operand.vmem [shape: f32[36,32], index: 1, kind: input, shape index: {}]   ;;  %s10226_s2 = inlined_call_operand.vmem [shape: f32[1,32], index: 2, kind: input, shape index: {}]   ;;  %s10227_s3 = inlined_call_operand.vmem [shape: f32[4,32], index: 3, kind: input, shape index: {}]   ;;  %s10228_s4 = inlined_call_operand.vmem [shape: f32[1,32], index: 4, kind: input, shape index: {}]   ;;  %s10229_s5 = inlined_call_operand.vmem [shape: f32[288,32], index: 5, kind: input, shape index: {}]   ;;  %s10230_s6 = inlined_call_operand.vmem [shape: f32[1,32], index: 6, kind: input, shape index: {}]   ;;  %s10231_s7 = inlined_call_operand.vmem [shape: f32[32,32], index: 7, kind: input, shape index: {}]   ;;  %s10232_s8 = inlined_call_operand.vmem [shape: f32[1,32], index: 8, kind: input, shape index: {}]   ;;  %s10233_s9 = inlined_call_operand.vmem [shape: f32[288,32], index: 9, kind: input, shape index: {}]   ;;  %s10234_s10 = inlined_call_operand.vmem [shape: f32[1,32], index: 10, kind: input, shape index: {}]   ;;  %s10235_s11 = inlined_call_operand.vmem [shape: f32[32,32], index: 11, kind: input, shape index: {}]   ;;  %s10236_s12 = inlined_call_operand.vmem [shape: f32[1,32], index: 12, kind: input, shape index: {}]   ;;  %s10237_s13 = inlined_call_operand.hbm [shape: f32[2,16,32], index: 13, kind: output, shape index: {}]  }
   0x1   :  { %10291 = sst [smem:[#allocation25_spill]] %s10224_s0 }
   0x2   :  { %10292 = sst [smem:[#allocation26_spill]] %s10225_s1 }
   0x3   :  { %10293 = sst [smem:[#allocation27_spill]] %s10227_s3 }
   0x4   :  { %10294 = sst [smem:[#allocation28_spill]] %s10228_s4 }
   0x5   :  { %18 = vsyncpa [#allocation6], 0 }
   0x6   :  { %20 = vsyncpa [#allocation6 + $0x1], 0  ;;  %s7241_s25 = smov 0   ;;  %s7243_s26 = smov 0  }
   0x7   :  { %s7245_s27 = smov 0   ;;  %s7247_s28 = smov 0  }
   0x8 LB: > { %s7262_s29 = sadd.s32 4294967295, %s7155_s28   ;;  %s6198_s30 = sadd.s32 4294967294, %s7155_s28   ;;  %s7155_s28 = sphi %s7247_s28, %s10428_s28   ;;  %s7151_s27 = sphi %s7245_s27, %s10427_s27   ;;  %s7147_s26 = sphi %s7243_s26, %s10426_s26   ;;  %s7143_s25 = sphi %s7241_s25, %s10425_s25  }
   0x9   : > { %s7266_s14 = sadd.s32 1, %s7155_s28   ;;  %s311_s15 = sadd.s32 1, %s7151_s27 }
   0xa   : > { %s308_s16 = ssub.s32 %s7155_s28, %s7266_s14  ;;  %p321_p0 = scmp.ne.s32.totalorder %s7151_s27, %s7147_s26 }
   0xb   : > { %p309_p1 = scmp.eq.s32.totalorder %s308_s16, 0  ;;  %p322_p2 = scmp.eq.s32.totalorder %s7262_s29, 1 }
   0xc   : > { %p327_p3 = scmp.ne.s32.totalorder %s7147_s26, %s7143_s25  ;;  %p328_p4 = scmp.eq.s32.totalorder %s6198_s30, 1 }
   0xd   : > { %s7277_s17 = scalar_select %p309_p1, %s7151_s27, %s311_s15  }
   0xe   : > { %p7279_p5 = por %p322_p2, %p321_p0  ;;  %p7283_p6 = por %p328_p4, %p327_p3 }
   0xf   : > { %10295 = sst [smem:[#allocation8_spill]] %s7277_s17  ;;  %p6201_p7 = scmp.ge.s32.totalorder %s7155_s28, 1 }
  0x10   : > { %p390_p8 = scmp.lt.s32.totalorder %s7155_s28, 3 }
  0x12   : > { %p391_p9 = pnand %p6201_p7, %p390_p8 }
  0x14   : > { %394 = sbr.rel (%p391_p9) target bundleno = 1675 (0x68b), region = 72 }
  0x19   : > { %vm471_vm0 = vcmask 31744   ;;  %v7157_v0 = vmov 0.0   ;;  %p434_p10 = scmp.lt.s32.totalorder %s7262_s29, 1  ;;  %vm2075_vm1 = vcmask 1043456   ;;  %s10298_s3 = sld [smem:[#allocation27_spill]]  ;;  %vm10271_vm2 = vcmask 1046528  }
  0x1a   : > { %473 = vst.msk [vmem:[#allocation2 + $0x8] sm:$0xff] %vm471_vm0, %v7157_v0  ;;  %472 = vst.msk [vmem:[#allocation2] sm:$0xff] %vm471_vm0, %v7157_v0  ;;  %s10299_s0 = sld [smem:[#allocation25_spill]]  ;;  %s7158_s16 = smov 4   ;;  %vm697_vm3 = vcmask 1040384   ;;  %vm1933_vm4 = vcmask 261120  }
  0x1b   : > { %474 = vst.msk [vmem:[#allocation2 + $0x10] sm:$0xff] %vm471_vm0, %v7157_v0  ;;  %475 = vst.msk [vmem:[#allocation2 + $0x18] sm:$0xff] %vm471_vm0, %v7157_v0  ;;  %s435_s22 = scalar_select %p434_p10, %s7262_s29, 1  ;;  %vm1735_vm5 = vcmask 64512   ;;  %vm1768_vm6 = vcmask 97280   ;;  %vm1801_vm7 = vcmask 130048  }
  0x1c   : > { %476 = vst.msk [vmem:[#allocation2 + $0x20] sm:$0xff] %vm471_vm0, %v7157_v0  ;;  %477 = vst.msk [vmem:[#allocation2 + $0x28] sm:$0xff] %vm471_vm0, %v7157_v0  ;;  %s10238_s20 = smov 8   ;;  %s10246_s21 = smov 16   ;;  %vm1834_vm8 = vcmask 162816   ;;  %vm10272_vm9 = vcmask 195584  }
  0x1d   : > { %478 = vst.msk [vmem:[#allocation2 + $0x30] sm:$0xff] %vm471_vm0, %v7157_v0  ;;  %479 = vst.msk [vmem:[#allocation2 + $0x38] sm:$0xff] %vm471_vm0, %v7157_v0  ;;  %s6474_s23 = sshll.u32 %s435_s22, 8  ;;  %s10244_s22 = smov 12   ;;  %vm1900_vm10 = vcmask 228352   ;;  %vm1978_vm11 = vcmask 293888  }
  0x1e   : > { %480 = vst.msk [vmem:[#allocation2 + $0x40] sm:$0xff] %vm471_vm0, %v7157_v0  ;;  %481 = vst.msk [vmem:[#allocation2 + $0x48] sm:$0xff] %vm471_vm0, %v7157_v0  ;;  %s10242_s24 = smov 24   ;;  %s10300_s1 = sld [smem:[#allocation26_spill]]  ;;  %vm10264_vm12 = vcmask 1041409   ;;  %vm10265_vm13 = vcmask 1042434  }
  0x1f   : > { %482 = vst.msk [vmem:[#allocation2 + $0x50] sm:$0xff] %vm471_vm0, %v7157_v0  ;;  %483 = vst.msk [vmem:[#allocation2 + $0x58] sm:$0xff] %vm471_vm0, %v7157_v0  ;;  %v2336_v1 = vld [vmem:[%s10298_s3] sm:$0xf]  ;;  %s10273_s30 = smov 32   ;;  %s10309_s4 = sld [smem:[#allocation28_spill]] }
  0x20   : > { %484 = vst.msk [vmem:[#allocation2 + $0x60] sm:$0xff] %vm471_vm0, %v7157_v0  ;;  %485 = vst.msk [vmem:[#allocation2 + $0x68] sm:$0xff] %vm471_vm0, %v7157_v0  ;;  %6734 = vmatprep.subr.msk.mxu1 %vm2075_vm1, %v2336_v1  ;;  %s7443_s15 = scalar_lea.vmem %s10299_s0, %s6474_s23  ;;  %s10240_s23 = smov 20   ;;  %vm4377_vm14 = vcmask 1043459   ;;  %vm4379_vm15 = vcmask 1044484  }
  0x21   : > { %486 = vst.msk [vmem:[#allocation2 + $0x70] sm:$0xff] %vm471_vm0, %v7157_v0  ;;  %487 = vst.msk [vmem:[#allocation2 + $0x78] sm:$0xff] %vm471_vm0, %v7157_v0  ;;  %6735 = vmatpush3.msk.msra.mxu1 %vm2075_vm1, %v2336_v1  ;;  %v439_v2 = vld [vmem:[%s7443_s15] sm:$0xff]  ;;  %v440_v3 = vld [vmem:[%s7443_s15 + $0x8] sm:$0xff] }
  0x22   : > { %488 = vst.msk [vmem:[#allocation2 + $0x80] sm:$0xff] %vm471_vm0, %v7157_v0  ;;  %489 = vst.msk [vmem:[#allocation2 + $0x88] sm:$0xff] %vm471_vm0, %v7157_v0  ;;  %v441_v4 = vld [vmem:[%s7443_s15 + $0x10] sm:$0xff]  ;;  %v7448_v5 = vld [vmem:[#allocation2 + $0x8] sm:$0xff] }
  0x23   : > { %490 = vst.msk [vmem:[#allocation2 + $0x90] sm:$0xff] %vm471_vm0, %v7157_v0  ;;  %491 = vst.msk [vmem:[#allocation2 + $0x98] sm:$0xff] %vm471_vm0, %v7157_v0  ;;  %v579_v6 = vld [vmem:[#allocation2 + $0x10] sm:$0xff]  ;;  %v580_v7 = vld [vmem:[#allocation2 + $0x18] sm:$0xff]  ;;  %935 = vrot.lane.b32.xlu0 %v7448_v5, %s7158_s16  ;;  %v827_v8 = vrot.slane %v7448_v5, 1  ;;  %v699_v11 = vrot.slane %v7448_v5, 7 }
  0x24   : > { %492 = vst.msk [vmem:[#allocation2 + $0xa0] sm:$0xff] %vm471_vm0, %v7157_v0  ;;  %493 = vst.msk [vmem:[#allocation2 + $0xa8] sm:$0xff] %vm471_vm0, %v7157_v0  ;;  %v828_v9 = vrot.slane %v579_v6, 1  ;;  %v830_v10 = vrot.slane %v580_v7, 1  ;;  %v442_v12 = vld [vmem:[%s7443_s15 + $0x18] sm:$0xff]  ;;  %v701_v13 = vrot.slane %v579_v6, 7 }
  0x25   : > { %494 = vst.msk [vmem:[#allocation2 + $0xb0] sm:$0xff] %vm471_vm0, %v7157_v0  ;;  %495 = vst.msk [vmem:[#allocation2 + $0xb8] sm:$0xff] %vm471_vm0, %v7157_v0  ;;  %v443_v15 = vld [vmem:[%s7443_s15 + $0x20] sm:$0xff]  ;;  %v444_v16 = vld [vmem:[%s7443_s15 + $0x28] sm:$0xff] }
  0x26   : > { %496 = vst.msk [vmem:[#allocation2 + $0xc0] sm:$0xff] %vm471_vm0, %v7157_v0  ;;  %497 = vst.msk [vmem:[#allocation2 + $0xc8] sm:$0xff] %vm471_vm0, %v7157_v0  ;;  %v829_v14 = vsel %vm10271_vm2, %v827_v8, %v828_v9  ;;  %v445_v17 = vld [vmem:[%s7443_s15 + $0x30] sm:$0xff]  ;;  %v446_v18 = vld [vmem:[%s7443_s15 + $0x38] sm:$0xff]  ;;  %v7471_v20 = vsel %vm697_vm3, %v699_v11, %v701_v13  ;;  %v831_v21 = vsel %vm10271_vm2, %v828_v9, %v830_v10 }
  0x27   : > { %498 = vst.msk [vmem:[#allocation2 + $0xd0] sm:$0xff] %vm471_vm0, %v7157_v0  ;;  %499 = vst.msk [vmem:[#allocation2 + $0xd8] sm:$0xff] %vm471_vm0, %v7157_v0  ;;  %1031 = vrot.lane.b32.xlu1 %v829_v14, %s10238_s20  ;;  %v447_v19 = vld [vmem:[%s7443_s15 + $0x40] sm:$0xff]  ;;  %937 = vrot.lane.b32.xlu0 %v579_v6, %s7158_s16  ;;  %v448_v22 = vld [vmem:[%s7443_s15 + $0x48] sm:$0xff] }
  0x28   : > { %500 = vst.msk [vmem:[#allocation2 + $0xe0] sm:$0xff] %vm471_vm0, %v7157_v0  ;;  %501 = vst.msk [vmem:[#allocation2 + $0xe8] sm:$0xff] %vm471_vm0, %v7157_v0  ;;  %v449_v23 = vld [vmem:[%s7443_s15 + $0x50] sm:$0xff]  ;;  %v450_v24 = vld [vmem:[%s7443_s15 + $0x58] sm:$0xff] }
  0x29   : > { %502 = vst.msk [vmem:[#allocation2 + $0xf0] sm:$0xff] %vm471_vm0, %v7157_v0  ;;  %503 = vst.msk [vmem:[#allocation2 + $0xf8] sm:$0xff] %vm471_vm0, %v7157_v0  ;;  %v451_v25 = vld [vmem:[%s7443_s15 + $0x60] sm:$0xff]  ;;  %v452_v26 = vld [vmem:[%s7443_s15 + $0x68] sm:$0xff] }
  0x2a   : > { %504 = vst.msk [vmem:[#allocation2 + $0x100] sm:$0xff] %vm471_vm0, %v7157_v0  ;;  %505 = vst.msk [vmem:[#allocation2 + $0x108] sm:$0xff] %vm471_vm0, %v7157_v0  ;;  %v453_v27 = vld [vmem:[%s7443_s15 + $0x70] sm:$0xff]  ;;  %v581_v30 = vld [vmem:[#allocation2 + $0x20] sm:$0xff] }
  0x2b   : > { %506 = vst.msk [vmem:[#allocation2 + $0x110] sm:$0xff] %vm471_vm0, %v7157_v0  ;;  %507 = vst.msk [vmem:[#allocation2 + $0x118] sm:$0xff] %vm471_vm0, %v7157_v0  ;;  %1033 = vrot.lane.b32.xlu1 %v831_v21, %s10238_s20  ;;  %v454_v32 = vld [vmem:[%s7443_s15 + $0x78] sm:$0xff]  ;;  %v455_v35 = vld [vmem:[%s7443_s15 + $0x80] sm:$0xff]  ;;  %v703_v38 = vrot.slane %v581_v30, 7 }
  0x2c   : > { %508 = vst.msk [vmem:[#allocation2 + $0x120] sm:$0xff] %vm471_vm0, %v7157_v0  ;;  %509 = vst.msk [vmem:[#allocation2 + $0x128] sm:$0xff] %vm471_vm0, %v7157_v0  ;;  %v456_v36 = vld [vmem:[%s7443_s15 + $0x88] sm:$0xff]  ;;  %v457_v37 = vld [vmem:[%s7443_s15 + $0x90] sm:$0xff] }
  0x2d   : > { %510 = vst.msk [vmem:[#allocation2 + $0x130] sm:$0xff] %vm471_vm0, %v7157_v0  ;;  %511 = vst.msk [vmem:[#allocation2 + $0x138] sm:$0xff] %vm471_vm0, %v7157_v0  ;;  %v458_v39 = vld [vmem:[%s7443_s15 + $0x98] sm:$0xff]  ;;  %v459_v40 = vld [vmem:[%s7443_s15 + $0xa0] sm:$0xff] }
  0x2e   : > { %512 = vst.msk [vmem:[#allocation2 + $0x140] sm:$0xff] %vm471_vm0, %v7157_v0  ;;  %513 = vst.msk [vmem:[#allocation2 + $0x148] sm:$0xff] %vm471_vm0, %v7157_v0  ;;  %v584_v47 = vld [vmem:[#allocation2 + $0x38] sm:$0xff]  ;;  %v460_v50 = vld [vmem:[%s7443_s15 + $0xa8] sm:$0xff] }
  0x2f   : > { %514 = vst.msk [vmem:[#allocation2 + $0x150] sm:$0xff] %vm471_vm0, %v7157_v0  ;;  %515 = vst.msk [vmem:[#allocation2 + $0x158] sm:$0xff] %vm471_vm0, %v7157_v0  ;;  %v461_v51 = vld [vmem:[%s7443_s15 + $0xb0] sm:$0xff]  ;;  %v462_v52 = vld [vmem:[%s7443_s15 + $0xb8] sm:$0xff]  ;;  %v835_v57 = vrot.slane %v584_v47, 1 }
  0x30   : > { %516 = vst.msk [vmem:[#allocation2 + $0x160] sm:$0xff] %vm471_vm0, %v7157_v0  ;;  %517 = vst.msk [vmem:[#allocation2 + $0x168] sm:$0xff] %vm471_vm0, %v7157_v0  ;;  %v463_v53 = vld [vmem:[%s7443_s15 + $0xc0] sm:$0xff]  ;;  %v464_v54 = vld [vmem:[%s7443_s15 + $0xc8] sm:$0xff] }
  0x31   : > { %518 = vst.msk [vmem:[#allocation2 + $0x170] sm:$0xff] %vm471_vm0, %v7157_v0  ;;  %519 = vst.msk [vmem:[#allocation2 + $0x178] sm:$0xff] %vm471_vm0, %v7157_v0  ;;  %v585_v56 = vld [vmem:[#allocation2 + $0x40] sm:$0xff]  ;;  %v465_v59 = vld [vmem:[%s7443_s15 + $0xd0] sm:$0xff] }
  0x32   : > { %520 = vst.msk [vmem:[#allocation2 + $0x180] sm:$0xff] %vm471_vm0, %v7157_v0  ;;  %521 = vst.msk [vmem:[#allocation2 + $0x188] sm:$0xff] %vm471_vm0, %v7157_v0  ;;  %v466_v60 = vld [vmem:[%s7443_s15 + $0xd8] sm:$0xff]  ;;  %v467_v62 = vld [vmem:[%s7443_s15 + $0xe0] sm:$0xff] }
  0x33   : > { %522 = vst.msk [vmem:[#allocation2 + $0x190] sm:$0xff] %vm471_vm0, %v7157_v0  ;;  %523 = vst.msk [vmem:[#allocation2 + $0x198] sm:$0xff] %vm471_vm0, %v7157_v0  ;;  %v468_v63 = vld [vmem:[%s7443_s15 + $0xe8] sm:$0xff]  ;;  %v469_v1 = vld [vmem:[%s7443_s15 + $0xf0] sm:$0xff] }
  0x34   : > { %524 = vst.msk [vmem:[#allocation2 + $0x1a0] sm:$0xff] %vm471_vm0, %v7157_v0  ;;  %525 = vst.msk [vmem:[#allocation2 + $0x1a8] sm:$0xff] %vm471_vm0, %v7157_v0  ;;  %v1970_v14 = vld [vmem:[%s10300_s1 + $0x20] sm:$0xf] }
  0x35   : > { %526 = vst.msk [vmem:[#allocation2 + $0x1b0] sm:$0xff] %vm471_vm0, %v7157_v0  ;;  %527 = vst.msk [vmem:[#allocation2 + $0x1b8] sm:$0xff] %vm471_vm0, %v7157_v0  ;;  %6676 = vmatprep.subr.msk.mxu0 %vm2075_vm1, %v1970_v14 }
  0x36   : > { %528 = vst.msk [vmem:[#allocation2 + $0x1c0] sm:$0xff] %vm471_vm0, %v7157_v0  ;;  %529 = vst.msk [vmem:[#allocation2 + $0x1c8] sm:$0xff] %vm471_vm0, %v7157_v0  ;;  %6677 = vmatpush3.msk.msra.mxu0 %vm2075_vm1, %v1970_v14  ;;  %vm4381_vm1 = vcmask 1045509  }
  0x37   : > { %530 = vst.msk [vmem:[#allocation2 + $0x1d0] sm:$0xff] %vm471_vm0, %v7157_v0  ;;  %531 = vst.msk [vmem:[#allocation2 + $0x1d8] sm:$0xff] %vm471_vm0, %v7157_v0 }
  0x38   : > { %532 = vst.msk [vmem:[#allocation2 + $0x1e0] sm:$0xff] %vm471_vm0, %v7157_v0  ;;  %533 = vst.msk [vmem:[#allocation2 + $0x1e8] sm:$0xff] %vm471_vm0, %v7157_v0 }
  0x39   : > { %534 = vst.msk [vmem:[#allocation2 + $0x1f0] sm:$0xff] %vm471_vm0, %v7157_v0  ;;  %535 = vst.msk [vmem:[#allocation2 + $0x1f8] sm:$0xff] %vm471_vm0, %v7157_v0 }
  0x3a   : > { %536 = vst.msk [vmem:[#allocation2 + $0x200] sm:$0xff] %vm471_vm0, %v7157_v0  ;;  %537 = vst.msk [vmem:[#allocation2 + $0x208] sm:$0xff] %vm471_vm0, %v7157_v0 }
  0x3b   : > { %538 = vst.msk [vmem:[#allocation2 + $0x210] sm:$0xff] %vm471_vm0, %v7157_v0  ;;  %539 = vst.msk [vmem:[#allocation2 + $0x218] sm:$0xff] %vm471_vm0, %v7157_v0 }
  0x3c   : > { %540 = vst.msk [vmem:[#allocation2 + $0x220] sm:$0xff] %vm471_vm0, %v7157_v0  ;;  %541 = vst.msk [vmem:[#allocation2 + $0x228] sm:$0xff] %vm471_vm0, %v7157_v0 }
  0x3d   : > { %542 = vst.msk [vmem:[#allocation2 + $0x230] sm:$0xff] %vm471_vm0, %v7157_v0  ;;  %543 = vst.msk [vmem:[#allocation2 + $0x238] sm:$0xff] %vm471_vm0, %v7157_v0 }
  0x3e   : > { %545 = vst.msk [vmem:[#allocation2 + $0x28] sm:$0xff] %vm471_vm0, %v439_v2  ;;  %546 = vst.msk [vmem:[#allocation2 + $0x30] sm:$0xff] %vm471_vm0, %v440_v3  ;;  %v470_v2 = vld [vmem:[%s7443_s15 + $0xf8] sm:$0xff]  ;;  %v708_v3 = vrot.slane %v585_v56, 7  ;;  %s10301_s15 = smov 20  }
  0x3f   : > { %547 = vst.msk [vmem:[#allocation2 + $0x48] sm:$0xff] %vm471_vm0, %v441_v4  ;;  %548 = vst.msk [vmem:[#allocation2 + $0x50] sm:$0xff] %vm471_vm0, %v442_v12 }
  0x40   : > { %549 = vst.msk [vmem:[#allocation2 + $0x68] sm:$0xff] %vm471_vm0, %v443_v15  ;;  %550 = vst.msk [vmem:[#allocation2 + $0x70] sm:$0xff] %vm471_vm0, %v444_v16 }
  0x41   : > { %551 = vst.msk [vmem:[#allocation2 + $0x88] sm:$0xff] %vm471_vm0, %v445_v17  ;;  %552 = vst.msk [vmem:[#allocation2 + $0x90] sm:$0xff] %vm471_vm0, %v446_v18  ;;  %v1969_v18 = vld [vmem:[%s10300_s1 + $0x18] sm:$0xff] }
  0x42   : > { %553 = vst.msk [vmem:[#allocation2 + $0xa8] sm:$0xff] %vm471_vm0, %v447_v19  ;;  %554 = vst.msk [vmem:[#allocation2 + $0xb0] sm:$0xff] %vm471_vm0, %v448_v22  ;;  %6678 = vmatprep.subr.mxu0 %v1969_v18  ;;  %v1968_v19 = vld [vmem:[%s10300_s1 + $0x10] sm:$0xff]  ;;  %v1967_v22 = vld [vmem:[%s10300_s1 + $0x8] sm:$0xff] }
  0x43   : > { %555 = vst.msk [vmem:[#allocation2 + $0xc8] sm:$0xff] %vm471_vm0, %v449_v23  ;;  %556 = vst.msk [vmem:[#allocation2 + $0xd0] sm:$0xff] %vm471_vm0, %v450_v24  ;;  %6679 = vmatpush3.msra.mxu0 %v1969_v18  ;;  %v596_v18 = vld [vmem:[#allocation2 + $0x98] sm:$0xff] }
  0x44   : > { %557 = vst.msk [vmem:[#allocation2 + $0xe8] sm:$0xff] %vm471_vm0, %v451_v25  ;;  %558 = vst.msk [vmem:[#allocation2 + $0xf0] sm:$0xff] %vm471_vm0, %v452_v26  ;;  %6680 = vmatprep.subr.mxu0 %v1968_v19 }
  0x45   : > { %v582_v28 = vld [vmem:[#allocation2 + $0x28] sm:$0xff]  ;;  %v7487_v29 = vld [vmem:[#allocation2 + $0x30] sm:$0xff]  ;;  %559 = vst.msk [vmem:[#allocation2 + $0x108] sm:$0xff] %vm471_vm0, %v453_v27  ;;  %560 = vst.msk [vmem:[#allocation2 + $0x110] sm:$0xff] %vm471_vm0, %v454_v32  ;;  %6681 = vmatpush3.msra.mxu0 %v1968_v19  ;;  %v850_v19 = vrot.slane %v596_v18, 1 }
  0x46   : > { %v7493_v31 = vld [vmem:[#allocation2 + $0x48] sm:$0xff]  ;;  %6736 = vmatprep.mubr.msk.f32.mxu1 %vm471_vm0, %v582_v28  ;;  %1223 = vrot.lane.b32.xlu0 %v582_v28, %s10246_s21  ;;  %v704_v33 = vrot.slane %v582_v28, 7  ;;  %v706_v34 = vrot.slane %v7487_v29, 7  ;;  %561 = vst.msk [vmem:[#allocation2 + $0x128] sm:$0xff] %vm471_vm0, %v455_v35  ;;  %562 = vst.msk [vmem:[#allocation2 + $0x130] sm:$0xff] %vm471_vm0, %v456_v36  ;;  %v7514_v41 = vld [vmem:[#allocation2 + $0x50] sm:$0xff] }
  0x47   : > { %6737 = vmatmul.mubr.msk.f32.vlgmr.msra.gmra.mxu1 %vm471_vm0, %v7487_v29  ;;  %563 = vst.msk [vmem:[#allocation2 + $0x148] sm:$0xff] %vm471_vm0, %v457_v37  ;;  %564 = vst.msk [vmem:[#allocation2 + $0x150] sm:$0xff] %vm471_vm0, %v458_v39  ;;  %939 = vrot.lane.b32.xlu1 %v582_v28, %s7158_s16  ;;  %v832_v43 = vrot.slane %v582_v28, 1  ;;  %v833_v44 = vrot.slane %v7487_v29, 1  ;;  %v7525_v45 = vld [vmem:[#allocation2 + $0x68] sm:$0xff]  ;;  %v7532_v48 = vld [vmem:[#allocation2 + $0x70] sm:$0xff] }
  0x48   : > { %6739 = vmatprep.mubr.msk.f32.mxu1 %vm471_vm0, %v7493_v31  ;;  %565 = vst.msk [vmem:[#allocation2 + $0x168] sm:$0xff] %vm471_vm0, %v459_v40  ;;  %v7520_v42 = vsel %vm697_vm3, %v704_v33, %v706_v34  ;;  %v7528_v46 = vsel %vm697_vm3, %v703_v38, %v704_v33  ;;  %v7534_v49 = vld [vmem:[#allocation2 + $0x88] sm:$0xff]  ;;  %566 = vst.msk [vmem:[#allocation2 + $0x170] sm:$0xff] %vm471_vm0, %v460_v50  ;;  %v7555_v58 = vld [vmem:[#allocation2 + $0x90] sm:$0xff]  ;;  %v709_v4 = vrot.slane %v7493_v31, 7  ;;  %v711_v10 = vrot.slane %v7514_v41, 7 }
  0x49   : > { %567 = vst.msk [vmem:[#allocation2 + $0x188] sm:$0xff] %vm471_vm0, %v461_v51  ;;  %568 = vst.msk [vmem:[#allocation2 + $0x190] sm:$0xff] %vm471_vm0, %v462_v52  ;;  %v834_v55 = vsel %vm10271_vm2, %v832_v43, %v833_v44  ;;  %v7559_v61 = vld [vmem:[#allocation2 + $0xa8] sm:$0xff]  ;;  %v836_v6 = vsel %vm10271_vm2, %v833_v44, %v835_v57  ;;  %v7580_v7 = vld [vmem:[#allocation2 + $0xb0] sm:$0xff]  ;;  %v837_v23 = vrot.slane %v7493_v31, 1  ;;  %v838_v24 = vrot.slane %v7514_v41, 1  ;;  %6682 = vmatprep.subr.mxu0 %v1967_v22 }
  0x4a   : > { %1225 = vrot.lane.b32.xlu0 %v7487_v29, %s10246_s21  ;;  %569 = vst.msk [vmem:[#allocation2 + $0x1a8] sm:$0xff] %vm471_vm0, %v463_v53  ;;  %570 = vst.msk [vmem:[#allocation2 + $0x1b0] sm:$0xff] %vm471_vm0, %v464_v54  ;;  %v7582_v8 = vld [vmem:[#allocation2 + $0xc8] sm:$0xff]  ;;  %v7587_v9 = vsel %vm697_vm3, %v708_v3, %v709_v4  ;;  %v7594_v12 = vld [vmem:[#allocation2 + $0xd0] sm:$0xff]  ;;  %v7607_v15 = vsel %vm697_vm3, %v709_v4, %v711_v10  ;;  %6683 = vmatpush3.msra.mxu0 %v1967_v22  ;;  %v714_v40 = vrot.slane %v7525_v45, 7 }
  0x4b   : > { %6740 = vmatmul.mubr.msk.f32.gmra.mxu1 %vm471_vm0, %v7514_v41  ;;  %1129 = vrot.lane.b32.xlu1 %v7520_v42, %s10244_s22  ;;  %571 = vst.msk [vmem:[#allocation2 + $0x1c8] sm:$0xff] %vm471_vm0, %v465_v59  ;;  %572 = vst.msk [vmem:[#allocation2 + $0x1d0] sm:$0xff] %vm471_vm0, %v466_v60  ;;  %v7596_v13 = vld [vmem:[#allocation2 + $0xe8] sm:$0xff]  ;;  %v7611_v16 = vld [vmem:[#allocation2 + $0xf0] sm:$0xff]  ;;  %v839_v28 = vsel %vm10271_vm2, %v837_v23, %v838_v24  ;;  %v842_v56 = vrot.slane %v7525_v45, 1  ;;  %v843_v57 = vrot.slane %v7532_v48, 1 }
  0x4c   : > { %6742 = vmatprep.mubr.msk.f32.mxu1 %vm471_vm0, %v7525_v45  ;;  %573 = vst.msk [vmem:[#allocation2 + $0x1e8] sm:$0xff] %vm471_vm0, %v467_v62  ;;  %574 = vst.msk [vmem:[#allocation2 + $0x1f0] sm:$0xff] %vm471_vm0, %v468_v63  ;;  %v7614_v17 = vld [vmem:[#allocation2 + $0x108] sm:$0xff]  ;;  %v7715_v21 = vld [vmem:[#allocation2 + $0x110] sm:$0xff]  ;;  %v719_v3 = vrot.slane %v7534_v49, 7  ;;  %v721_v4 = vrot.slane %v7555_v58, 7 }
  0x4d   : > { %575 = vst.msk [vmem:[#allocation2 + $0x208] sm:$0xff] %vm471_vm0, %v469_v1  ;;  %576 = vst.msk [vmem:[#allocation2 + $0x210] sm:$0xff] %vm471_vm0, %v470_v2  ;;  %v7730_v25 = vld [vmem:[#allocation2 + $0x130] sm:$0xff]  ;;  %v1966_v27 = vld [vmem:[%s10300_s1] sm:$0xff]  ;;  %v844_v59 = vsel %vm10271_vm2, %v842_v56, %v843_v57  ;;  %v848_v10 = vrot.slane %v7555_v58, 1  ;;  %s431_s1 = sand.u32 1, %s7147_s26  }
  0x4e   : > { %1127 = vrot.lane.b32.xlu0 %v7528_v46, %s10244_s22  ;;  %4023 = vst.msk [vmem:[#allocation3] sm:$0xff] %vm1933_vm4, %v7157_v0  ;;  %4024 = vst.msk [vmem:[#allocation3 + $0x8] sm:$0xff] %vm1933_vm4, %v7157_v0  ;;  %v7732_v26 = vld [vmem:[#allocation2 + $0x148] sm:$0xff]  ;;  %6684 = vmatprep.subr.mxu0 %v1966_v27  ;;  %v7748_v30 = vld [vmem:[#allocation2 + $0x150] sm:$0xff]  ;;  %s6202_s17 = sshll.u32 %s431_s1, 4 }
  0x4f   : > { %6743 = vmatmul.mubr.msk.f32.gmra.mxu1 %vm471_vm0, %v7532_v48  ;;  %1319 = vrot.lane.b32.xlu1 %v834_v55, %s10240_s23  ;;  %4025 = vst.msk [vmem:[#allocation3 + $0x10] sm:$0xff] %vm1933_vm4, %v7157_v0  ;;  %4026 = vst.msk [vmem:[#allocation3 + $0x18] sm:$0xff] %vm1933_vm4, %v7157_v0  ;;  %v622_v32 = vld [vmem:[#allocation2 + $0x168] sm:$0xff]  ;;  %v623_v34 = vld [vmem:[#allocation2 + $0x170] sm:$0xff]  ;;  %v851_v22 = vsel %vm10271_vm2, %v848_v10, %v850_v19  ;;  %v731_v19 = vrot.slane %v7594_v12, 7 }
  0x50   : > { %6745 = vmatprep.mubr.msk.f32.mxu1 %vm471_vm0, %v7534_v49  ;;  %4027 = vst.msk [vmem:[#allocation3 + $0x20] sm:$0xff] %vm1933_vm4, %v7157_v0  ;;  %4028 = vst.msk [vmem:[#allocation3 + $0x28] sm:$0xff] %vm1933_vm4, %v7157_v0  ;;  %6685 = vmatpush3.msra.mxu0 %v1966_v27  ;;  %v626_v35 = vld [vmem:[#allocation2 + $0x188] sm:$0xff]  ;;  %v589_v37 = vld [vmem:[#allocation2 + $0x60] sm:$0xff] }
  0x51   : > { %4029 = vst.msk [vmem:[#allocation3 + $0x30] sm:$0xff] %vm1933_vm4, %v7157_v0  ;;  %4030 = vst.msk [vmem:[#allocation3 + $0x38] sm:$0xff] %vm1933_vm4, %v7157_v0  ;;  %v630_v38 = vld [vmem:[#allocation2 + $0x1a8] sm:$0xff]  ;;  %v713_v39 = vrot.slane %v589_v37, 7  ;;  %v631_v43 = vld [vmem:[#allocation2 + $0x1b0] sm:$0xff] }
  0x52   : > { %941 = vrot.lane.b32.xlu0 %v7487_v29, %s7158_s16  ;;  %4031 = vst.msk [vmem:[#allocation3 + $0x40] sm:$0xff] %vm1933_vm4, %v7157_v0  ;;  %4032 = vst.msk [vmem:[#allocation3 + $0x48] sm:$0xff] %vm1933_vm4, %v7157_v0  ;;  %v588_v29 = vld [vmem:[#allocation2 + $0x58] sm:$0xff]  ;;  %v634_v44 = vld [vmem:[#allocation2 + $0x1c8] sm:$0xff] }
  0x53   : > { %6746 = vmatmul.mubr.msk.f32.gmra.mxu1 %vm471_vm0, %v7555_v58  ;;  %1035 = vrot.lane.b32.xlu1 %v834_v55, %s10238_s20  ;;  %4033 = vst.msk [vmem:[#allocation3 + $0x50] sm:$0xff] %vm1933_vm4, %v7157_v0  ;;  %4034 = vst.msk [vmem:[#allocation3 + $0x58] sm:$0xff] %vm1933_vm4, %v7157_v0  ;;  %v840_v33 = vrot.slane %v588_v29, 1  ;;  %v7771_v47 = vsel %vm697_vm3, %v713_v39, %v714_v40  ;;  %v635_v50 = vld [vmem:[#allocation2 + $0x1d0] sm:$0xff]  ;;  %v638_v51 = vld [vmem:[#allocation2 + $0x1e8] sm:$0xff]  ;;  %v852_v39 = vrot.slane %v7559_v61, 1 }
  0x54   : > { %6748 = vmatprep.mubr.msk.f32.mxu1 %vm471_vm0, %v7559_v61  ;;  %4035 = vst.msk [vmem:[#allocation3 + $0x60] sm:$0xff] %vm1933_vm4, %v7157_v0  ;;  %4036 = vst.msk [vmem:[#allocation3 + $0x68] sm:$0xff] %vm1933_vm4, %v7157_v0  ;;  %v639_v53 = vld [vmem:[#allocation2 + $0x1f0] sm:$0xff]  ;;  %v642_v54 = vld [vmem:[#allocation2 + $0x208] sm:$0xff] }
  0x55   : > { %4037 = vst.msk [vmem:[#allocation3 + $0x70] sm:$0xff] %vm1933_vm4, %v7157_v0  ;;  %4038 = vst.msk [vmem:[#allocation3 + $0x78] sm:$0xff] %vm1933_vm4, %v7157_v0  ;;  %v841_v36 = vsel %vm10271_vm2, %v838_v24, %v840_v33  ;;  %v643_v55 = vld [vmem:[#allocation2 + $0x210] sm:$0xff]  ;;  %v592_v60 = vld [vmem:[#allocation2 + $0x78] sm:$0xff] }
  0x56   : > { %1321 = vrot.lane.b32.xlu0 %v836_v6, %s10240_s23  ;;  %4039 = vst.msk [vmem:[#allocation3 + $0x80] sm:$0xff] %vm1933_vm4, %v7157_v0  ;;  %4040 = vst.msk [vmem:[#allocation3 + $0x88] sm:$0xff] %vm1933_vm4, %v7157_v0  ;;  %s10303_s23 = smov 24   ;;  %v845_v62 = vrot.slane %v592_v60, 1  ;;  %v593_v1 = vld [vmem:[#allocation2 + $0x80] sm:$0xff] }
  0x57   : > { %6749 = vmatmul.mubr.msk.f32.gmra.mxu1 %vm471_vm0, %v7580_v7  ;;  %1415 = vrot.lane.b32.xlu1 %v7587_v9, %s10242_s24  ;;  %4041 = vst.msk [vmem:[#allocation3 + $0x90] sm:$0xff] %vm1933_vm4, %v7157_v0  ;;  %4042 = vst.msk [vmem:[#allocation3 + $0x98] sm:$0xff] %vm1933_vm4, %v7157_v0  ;;  %v718_v2 = vrot.slane %v593_v1, 7  ;;  %v597_v23 = vld [vmem:[#allocation2 + $0xa0] sm:$0xff] }
  0x58   : > { %6751 = vmatprep.mubr.msk.f32.mxu1 %vm471_vm0, %v7582_v8  ;;  %4043 = vst.msk [vmem:[#allocation3 + $0xa0] sm:$0xff] %vm1933_vm4, %v7157_v0  ;;  %4044 = vst.msk [vmem:[#allocation3 + $0xa8] sm:$0xff] %vm1933_vm4, %v7157_v0  ;;  %v846_v63 = vsel %vm10271_vm2, %v843_v57, %v845_v62  ;;  %v723_v27 = vrot.slane %v597_v23, 7 }
  0x59   : > { %4045 = vst.msk [vmem:[#allocation3 + $0xb0] sm:$0xff] %vm1933_vm4, %v7157_v0  ;;  %4046 = vst.msk [vmem:[#allocation3 + $0xb8] sm:$0xff] %vm1933_vm4, %v7157_v0 }
  0x5a   : > { %1037 = vrot.lane.b32.xlu0 %v836_v6, %s10238_s20  ;;  %4047 = vst.msk [vmem:[#allocation3 + $0xc0] sm:$0xff] %vm1933_vm4, %v7157_v0  ;;  %4048 = vst.msk [vmem:[#allocation3 + $0xc8] sm:$0xff] %vm1933_vm4, %v7157_v0  ;;  %s10302_s20 = smov 8   ;;  %v7823_v6 = vsel %vm697_vm3, %v719_v3, %v721_v4 }
  0x5b   : > { %6752 = vmatmul.mubr.msk.f32.gmra.mxu1 %vm471_vm0, %v7594_v12  ;;  %4049 = vst.msk [vmem:[#allocation3 + $0xd0] sm:$0xff] %vm1933_vm4, %v7157_v0  ;;  %4050 = vst.msk [vmem:[#allocation3 + $0xd8] sm:$0xff] %vm1933_vm4, %v7157_v0  ;;  %1131 = vrot.lane.b32.xlu1 %v7587_v9, %s10244_s22 }
  0x5c   : > { %6754 = vmatprep.mubr.msk.f32.mxu1 %vm471_vm0, %v7596_v13  ;;  %4051 = vst.msk [vmem:[#allocation3 + $0xe0] sm:$0xff] %vm1933_vm4, %v7157_v0  ;;  %4052 = vst.msk [vmem:[#allocation3 + $0xe8] sm:$0xff] %vm1933_vm4, %v7157_v0 }
  0x5d   : > { %5539 = vst.msk [vmem:[#allocation4] sm:$0xff] %vm1933_vm4, %v7157_v0  ;;  %5540 = vst.msk [vmem:[#allocation4 + $0x8] sm:$0xff] %vm1933_vm4, %v7157_v0 }
  0x5e   : > { %5543 = vst.msk [vmem:[#allocation4 + $0x18] sm:$0xff] %vm1933_vm4, %v7157_v0  ;;  %5544 = vst.msk [vmem:[#allocation4 + $0x20] sm:$0xff] %vm1933_vm4, %v7157_v0  ;;  %1417 = vrot.lane.b32.xlu0 %v7607_v15, %s10242_s24  ;;  %s10248_s24 = smov 28  }
  0x5f   : > { %5546 = vst.msk [vmem:[#allocation4 + $0x30] sm:$0xff] %vm1933_vm4, %v7157_v0  ;;  %5547 = vst.msk [vmem:[#allocation4 + $0x38] sm:$0xff] %vm1933_vm4, %v7157_v0  ;;  %6755 = vmatmul.mubr.msk.f32.gmra.mxu1 %vm471_vm0, %v7611_v16  ;;  %1511 = vrot.lane.b32.xlu1 %v7493_v31, %s10248_s24 }
  0x60   : > { %5549 = vst.msk [vmem:[#allocation4 + $0x48] sm:$0xff] %vm1933_vm4, %v7157_v0  ;;  %5550 = vst.msk [vmem:[#allocation4 + $0x50] sm:$0xff] %vm1933_vm4, %v7157_v0  ;;  %6757 = vmatprep.mubr.msk.f32.mxu1 %vm471_vm0, %v7614_v17 }
  0x61   : > { %5552 = vst.msk [vmem:[#allocation4 + $0x60] sm:$0xff] %vm1933_vm4, %v7157_v0  ;;  %5553 = vst.msk [vmem:[#allocation4 + $0x68] sm:$0xff] %vm1933_vm4, %v7157_v0 }
  0x62   : > { %5555 = vst.msk [vmem:[#allocation4 + $0x78] sm:$0xff] %vm1933_vm4, %v7157_v0  ;;  %5556 = vst.msk [vmem:[#allocation4 + $0x80] sm:$0xff] %vm1933_vm4, %v7157_v0  ;;  %v7717_v0 = vld [vmem:[#allocation2 + $0x128] sm:$0xff]  ;;  %1133 = vrot.lane.b32.xlu0 %v7607_v15, %s10244_s22 }
  0x63   : > { %6758 = vmatmul.mubr.msk.f32.gmra.mxu1 %vm471_vm0, %v7715_v21  ;;  %1227 = vrot.lane.b32.xlu1 %v7493_v31, %s10246_s21 }
  0x64   : > { %6760 = vmatprep.mubr.msk.f32.mxu1 %vm471_vm0, %v7717_v0 }
  0x66   : > { %1513 = vrot.lane.b32.xlu0 %v7514_v41, %s10248_s24 }
  0x67   : > { %6761 = vmatmul.mubr.msk.f32.gmra.mxu1 %vm471_vm0, %v7730_v25  ;;  %1607 = vrot.lane.b32.xlu1 %v839_v28, %s10273_s30 }
  0x68   : > { %6763 = vmatprep.mubr.msk.f32.mxu1 %vm471_vm0, %v7732_v26 }
  0x6a   : > { %943 = vrot.lane.b32.xlu0 %v7493_v31, %s7158_s16  ;;  %v627_v31 = vld [vmem:[#allocation2 + $0x190] sm:$0xff] }
  0x6b   : > { %6764 = vmatmul.mubr.msk.f32.gmra.mxu1 %vm471_vm0, %v7748_v30  ;;  %1229 = vrot.lane.b32.xlu1 %v7514_v41, %s10246_s21 }
  0x6c   : > { %6766 = vmatprep.mubr.msk.f32.mxu1 %vm471_vm0, %v622_v32 }
  0x6e   : > { %1323 = vrot.lane.b32.xlu0 %v839_v28, %s10301_s15 }
  0x6f   : > { %6767 = vmatmul.mubr.msk.f32.gmra.mxu1 %vm471_vm0, %v623_v34  ;;  %1609 = vrot.lane.b32.xlu1 %v841_v36, %s10273_s30  ;;  %v726_v34 = vrot.slane %v7580_v7, 7 }
  0x70   : > { %6769 = vmatprep.mubr.msk.f32.mxu1 %vm471_vm0, %v626_v35 }
  0x72   : > { %945 = vrot.lane.b32.xlu0 %v7514_v41, %s7158_s16  ;;  %v716_v41 = vrot.slane %v7532_v48, 7 }
  0x73   : > { %6770 = vmatmul.mubr.msk.f32.gmra.mxu1 %vm471_vm0, %v627_v31  ;;  %1039 = vrot.lane.b32.xlu1 %v839_v28, %s10302_s20  ;;  %v724_v28 = vrot.slane %v7559_v61, 7 }
  0x74   : > { %6772 = vmatprep.mubr.msk.f32.mxu1 %vm471_vm0, %v630_v38  ;;  %v7781_v52 = vsel %vm697_vm3, %v714_v40, %v716_v41  ;;  %v853_v40 = vrot.slane %v7580_v7, 1  ;;  %v577_v41 = vld [vmem:[#allocation2] sm:$0xff] }
  0x75   : > { %v7856_v32 = vsel %vm697_vm3, %v723_v27, %v724_v28 }
  0x76   : > { %1325 = vrot.lane.b32.xlu0 %v841_v36, %s10301_s15 }
  0x77   : > { %6773 = vmatmul.mubr.msk.f32.gmra.mxu1 %vm471_vm0, %v631_v43  ;;  %1419 = vrot.lane.b32.xlu1 %v7771_v47, %s10303_s23 }
  0x78   : > { %6775 = vmatprep.mubr.msk.f32.mxu1 %vm471_vm0, %v634_v44 }
  0x7a   : > { %1041 = vrot.lane.b32.xlu0 %v841_v36, %s10302_s20  ;;  %v7867_v36 = vsel %vm697_vm3, %v724_v28, %v726_v34 }
  0x7b   : > { %6776 = vmatmul.mubr.msk.f32.gmra.mxu1 %vm471_vm0, %v635_v50  ;;  %1135 = vrot.lane.b32.xlu1 %v7771_v47, %s10244_s22  ;;  %v854_v50 = vsel %vm10271_vm2, %v852_v39, %v853_v40 }
  0x7c   : > { %6778 = vmatprep.mubr.msk.f32.mxu1 %vm471_vm0, %v638_v51 }
  0x7e   : > { %1421 = vrot.lane.b32.xlu0 %v7781_v52, %s10303_s23 }
  0x7f   : > { %6779 = vmatmul.mubr.msk.f32.gmra.mxu1 %vm471_vm0, %v639_v53  ;;  %1515 = vrot.lane.b32.xlu1 %v7525_v45, %s10248_s24  ;;  %v600_v53 = vld [vmem:[#allocation2 + $0xb8] sm:$0xff] }
  0x80   : > { %6781 = vmatprep.mubr.msk.f32.mxu1 %vm471_vm0, %v642_v54  ;;  %v698_v54 = vrot.slane %v577_v41, 7  ;;  %v855_v56 = vrot.slane %v600_v53, 1  ;;  %v857_v41 = vrot.slane %v7582_v8, 1 }
  0x82   : > { %1137 = vrot.lane.b32.xlu0 %v7781_v52, %s10244_s22  ;;  %v856_v62 = vsel %vm10271_vm2, %v853_v40, %v855_v56 }
  0x83   : > { %6782 = vmatmul.mubr.msk.f32.gmra.mxu1 %vm471_vm0, %v643_v55  ;;  %1231 = vrot.lane.b32.xlu1 %v7525_v45, %s10246_s21 }
  0x86   : > { %1517 = vrot.lane.b32.xlu0 %v7532_v48, %s10248_s24 }
  0x87   : > { %1611 = vrot.lane.b32.xlu1 %v844_v59, %s10273_s30 }
  0x8a   : > { %947 = vrot.lane.b32.xlu0 %v7525_v45, %s7158_s16  ;;  %v7816_v45 = vsel %vm697_vm3, %v718_v2, %v719_v3  ;;  %v729_v3 = vrot.slane %v7582_v8, 7 }
  0x8b   : > { %1233 = vrot.lane.b32.xlu1 %v7532_v48, %s10246_s21 }
  0x8c   : > { %v7934_v34 = vsel %vm697_vm3, %v729_v3, %v731_v19 }
  0x8e   : > { %1327 = vrot.lane.b32.xlu0 %v844_v59, %s10301_s15 }
  0x8f   : > { %1613 = vrot.lane.b32.xlu1 %v846_v63, %s10273_s30 }
  0x92   : > { %949 = vrot.lane.b32.xlu0 %v7532_v48, %s7158_s16  ;;  %v847_v48 = vrot.slane %v7534_v49, 1 }
  0x93   : > { %1043 = vrot.lane.b32.xlu1 %v844_v59, %s10302_s20  ;;  %v700_v59 = vsel %vm697_vm3, %v698_v54, %v699_v11 }
  0x94   : > { %v849_v14 = vsel %vm10271_vm2, %v847_v48, %v848_v10 }
  0x95   : > { %v936_v24 = vpop.permute.xlu0 %935 }
  0x96   : > { %1329 = vrot.lane.b32.xlu0 %v846_v63, %s10301_s15 }
  0x97   : > { %1423 = vrot.lane.b32.xlu1 %v7816_v45, %s10303_s23 }
  0x99   : > { %v1032_v29 = vpop.permute.xlu1 %1031 }
  0x9a   : > { %1045 = vrot.lane.b32.xlu0 %v846_v63, %s10302_s20  ;;  %v1703_v63 = vsel %vm471_vm0, %v700_v59, %v936_v24  ;;  %v604_v59 = vld [vmem:[#allocation2 + $0xd8] sm:$0xff] }
  0x9b   : > { %1139 = vrot.lane.b32.xlu1 %v7816_v45, %s10244_s22  ;;  %v1736_v5 = vsel %vm1735_vm5, %v1703_v63, %v1032_v29  ;;  %v860_v63 = vrot.slane %v604_v59, 1 }
  0x9d   : > { %v7858_v33 = vpop.permute.xlu1 %1033 }
  0x9e   : > { %1425 = vrot.lane.b32.xlu0 %v7823_v6, %s10303_s23 }
  0x9f   : > { %1519 = vrot.lane.b32.xlu1 %v7534_v49, %s10248_s24 }
  0xa2   : > { %1141 = vrot.lane.b32.xlu0 %v7823_v6, %s10244_s22 }
  0xa3   : > { %1235 = vrot.lane.b32.xlu1 %v7534_v49, %s10246_s21 }
  0xa6   : > { %1521 = vrot.lane.b32.xlu0 %v7555_v58, %s10248_s24 }
  0xa7   : > { %1615 = vrot.lane.b32.xlu1 %v849_v14, %s10273_s30 }
  0xaa   : > { %951 = vrot.lane.b32.xlu0 %v7534_v49, %s7158_s16  ;;  %v7851_v49 = vpop.permute.xlu0 %937 }
  0xab   : > { %1237 = vrot.lane.b32.xlu1 %v7555_v58, %s10246_s21  ;;  %v1704_v23 = vsel %vm471_vm0, %v7471_v20, %v7851_v49 }
  0xae   : > { %1331 = vrot.lane.b32.xlu0 %v849_v14, %s10301_s15 }
  0xaf   : > { %1617 = vrot.lane.b32.xlu1 %v851_v22, %s10273_s30 }
  0xb2   : > { %953 = vrot.lane.b32.xlu0 %v7555_v58, %s7158_s16 }
  0xb3   : > { %1047 = vrot.lane.b32.xlu1 %v849_v14, %s10302_s20 }
  0xb6   : > { %1333 = vrot.lane.b32.xlu0 %v851_v22, %s10301_s15 }
  0xb7   : > { %1427 = vrot.lane.b32.xlu1 %v7856_v32, %s10303_s23 }
  0xb8   : > { %v1224_v35 = vpop.permute.xlu0 %1223 }
  0xb9   : > { %v7864_v58 = vpop.permute.xlu1 %939 }
  0xba   : > { %1049 = vrot.lane.b32.xlu0 %v851_v22, %s10302_s20 }
  0xbb   : > { %1143 = vrot.lane.b32.xlu1 %v7856_v32, %s10244_s22 }
  0xbc   : > { %v7869_v37 = vpop.permute.xlu0 %1225 }
  0xbd   : > { %v7875_v31 = vpop.permute.xlu1 %1129 }
  0xbe   : > { %1429 = vrot.lane.b32.xlu0 %v7867_v36, %s10303_s23 }
  0xbf   : > { %1523 = vrot.lane.b32.xlu1 %v7559_v61, %s10248_s24 }
  0xc0   : > { %v1128_v38 = vpop.permute.xlu0 %1127 }
  0xc1   : > { %v1320_v43 = vpop.permute.xlu1 %1319  ;;  %v1769_v4 = vsel %vm1768_vm6, %v1736_v5, %v1128_v38 }
  0xc2   : > { %1145 = vrot.lane.b32.xlu0 %v7867_v36, %s10244_s22  ;;  %v1802_v14 = vsel %vm1801_vm7, %v1769_v4, %v1224_v35  ;;  %v1737_v35 = vsel %vm1735_vm5, %v1704_v23, %v7858_v33 }
  0xc3   : > { %1239 = vrot.lane.b32.xlu1 %v7559_v61, %s10246_s21  ;;  %v1835_v24 = vsel %vm1834_vm8, %v1802_v14, %v1320_v43  ;;  %v1770_v38 = vsel %vm1768_vm6, %v1737_v35, %v7875_v31 }
  0xc4   : > { %v7883_v44 = vpop.permute.xlu0 %941  ;;  %v1803_v33 = vsel %vm1801_vm7, %v1770_v38, %v7869_v37 }
  0xc5   : > { %v7890_v51 = vpop.permute.xlu1 %1035 }
  0xc6   : > { %1525 = vrot.lane.b32.xlu0 %v7580_v7, %s10248_s24 }
  0xc7   : > { %1619 = vrot.lane.b32.xlu1 %v854_v50, %s10273_s30 }
  0xc8   : > { %v1322_v55 = vpop.permute.xlu0 %1321 }
  0xc9   : > { %v1416_v57 = vpop.permute.xlu1 %1415  ;;  %v1836_v43 = vsel %vm1834_vm8, %v1803_v33, %v1322_v55 }
  0xca   : > { %955 = vrot.lane.b32.xlu0 %v7559_v61, %s7158_s16  ;;  %v601_v61 = vld [vmem:[#allocation2 + $0xc0] sm:$0xff]  ;;  %v1868_v27 = vsel %vm10272_vm9, %v1835_v24, %v1416_v57 }
  0xcb   : > { %1241 = vrot.lane.b32.xlu1 %v7580_v7, %s10246_s21  ;;  %v728_v11 = vrot.slane %v601_v61, 7 }
  0xcc   : > { %v7898_v60 = vpop.permute.xlu0 %1037 }
  0xcd   : > { %v7905_v1 = vpop.permute.xlu1 %1131  ;;  %v7919_v18 = vsel %vm697_vm3, %v728_v11, %v729_v3  ;;  %v605_v3 = vld [vmem:[#allocation2 + $0xe0] sm:$0xff] }
  0xce   : > { %1335 = vrot.lane.b32.xlu0 %v854_v50, %s10301_s15 }
  0xcf   : > { %1621 = vrot.lane.b32.xlu1 %v856_v62, %s10273_s30 }
  0xd0   : > { %v1418_v2 = vpop.permute.xlu0 %1417 }
  0xd1   : > { %v1512_v48 = vpop.permute.xlu1 %1511  ;;  %v1869_v31 = vsel %vm10272_vm9, %v1836_v43, %v1418_v2 }
  0xd2   : > { %957 = vrot.lane.b32.xlu0 %v7580_v7, %s7158_s16  ;;  %v1901_v28 = vsel %vm1900_vm10, %v1868_v27, %v1512_v48  ;;  %v734_v48 = vrot.slane %v7596_v13, 7 }
  0xd3   : > { %1051 = vrot.lane.b32.xlu1 %v854_v50, %s10302_s20  ;;  %v858_v50 = vrot.slane %v7594_v12, 1 }
  0xd4   : > { %v7913_v10 = vpop.permute.xlu0 %1133 }
  0xd5   : > { %v7921_v7 = vpop.permute.xlu1 %1227  ;;  %v859_v55 = vsel %vm10271_vm2, %v857_v41, %v858_v50  ;;  %v861_v5 = vsel %vm10271_vm2, %v858_v50, %v860_v63  ;;  %v862_v50 = vrot.slane %v7596_v13, 1  ;;  %v608_v63 = vld [vmem:[#allocation2 + $0xf8] sm:$0xff] }
  0xd6   : > { %1337 = vrot.lane.b32.xlu0 %v856_v62, %s10301_s15 }
  0xd7   : > { %1431 = vrot.lane.b32.xlu1 %v7919_v18, %s10303_s23 }
  0xd8   : > { %v1514_v22 = vpop.permute.xlu0 %1513 }
  0xd9   : > { %v1608_v29 = vpop.permute.xlu1 %1607  ;;  %v1902_v53 = vsel %vm1900_vm10, %v1869_v31, %v1514_v22  ;;  %v1705_v22 = vsel %vm471_vm0, %v7528_v46, %v7864_v58 }
  0xda   : > { %1053 = vrot.lane.b32.xlu0 %v856_v62, %s10302_s20  ;;  %v1934_v49 = vsel %vm1933_vm4, %v1901_v28, %v1608_v29  ;;  %v1738_v23 = vsel %vm1735_vm5, %v1705_v22, %v7890_v51  ;;  %v736_v28 = vrot.slane %v7611_v16, 7 }
  0xdb   : > { %1147 = vrot.lane.b32.xlu1 %v7919_v18, %s10244_s22  ;;  %6686 = vmatprep.mubr.msk.f32.mxu0 %vm1978_vm11, %v1934_v49 }
  0xdc   : > { %v7938_v20 = vpop.permute.xlu0 %943  ;;  %v8013_v49 = vsel %vm697_vm3, %v734_v48, %v736_v28 }
  0xdd   : > { %v7948_v39 = vpop.permute.xlu1 %1229 }
  0xde   : > { %1433 = vrot.lane.b32.xlu0 %v7934_v34, %s10303_s23 }
  0xdf   : > { %1527 = vrot.lane.b32.xlu1 %v7582_v8, %s10248_s24 }
  0xe0   : > { %v1324_v40 = vpop.permute.xlu0 %1323 }
  0xe1   : > { %v1610_v54 = vpop.permute.xlu1 %1609 }
  0xe2   : > { %1149 = vrot.lane.b32.xlu0 %v7934_v34, %s10244_s22  ;;  %v1935_v37 = vsel %vm1933_vm4, %v1902_v53, %v1610_v54 }
  0xe3   : > { %1243 = vrot.lane.b32.xlu1 %v7582_v8, %s10246_s21  ;;  %6687 = vmatmul.mubr.msk.f32.vlgmr.msra.gmra.mxu0 %vm1978_vm11, %v1935_v37 }
  0xe4   : > { %v7962_v56 = vpop.permute.xlu0 %945 }
  0xe5   : > { %v7970_v57 = vpop.permute.xlu1 %1039 }
  0xe6   : > { %1529 = vrot.lane.b32.xlu0 %v7594_v12, %s10248_s24 }
  0xe7   : > { %1623 = vrot.lane.b32.xlu1 %v859_v55, %s10273_s30 }
  0xe8   : > { %v1326_v62 = vpop.permute.xlu0 %1325 }
  0xe9   : > { %v1420_v61 = vpop.permute.xlu1 %1419 }
  0xea   : > { %959 = vrot.lane.b32.xlu0 %v7582_v8, %s7158_s16  ;;  %v733_v8 = vrot.slane %v605_v3, 7 }
  0xeb   : > { %1245 = vrot.lane.b32.xlu1 %v7594_v12, %s10246_s21 }
  0xec   : > { %v7975_v2 = vpop.permute.xlu0 %1041  ;;  %v7997_v24 = vsel %vm697_vm3, %v733_v8, %v734_v48  ;;  %v865_v8 = vrot.slane %v608_v63, 1 }
  0xed   : > { %v7981_v11 = vpop.permute.xlu1 %1135 }
  0xee   : > { %1339 = vrot.lane.b32.xlu0 %v859_v55, %s10301_s15 }
  0xef   : > { %1625 = vrot.lane.b32.xlu1 %v861_v5, %s10273_s30 }
  0xf0   : > { %v1422_v4 = vpop.permute.xlu0 %1421 }
  0xf1   : > { %v1516_v14 = vpop.permute.xlu1 %1515 }
  0xf2   : > { %961 = vrot.lane.b32.xlu0 %v7594_v12, %s7158_s16  ;;  %v1771_v12 = vsel %vm1768_vm6, %v1738_v23, %v7905_v1 }
  0xf3   : > { %1055 = vrot.lane.b32.xlu1 %v859_v55, %s10302_s20  ;;  %v1804_v46 = vsel %vm1801_vm7, %v1771_v12, %v7921_v7  ;;  %v1706_v7 = vsel %vm471_vm0, %v7520_v42, %v7883_v44 }
  0xf4   : > { %v7987_v19 = vpop.permute.xlu0 %1137  ;;  %v1837_v29 = vsel %vm1834_vm8, %v1804_v46, %v1324_v40  ;;  %v1739_v40 = vsel %vm1735_vm5, %v1706_v7, %v7898_v60 }
  0xf5   : > { %v8001_v27 = vpop.permute.xlu1 %1231  ;;  %v1870_v51 = vsel %vm10272_vm9, %v1837_v29, %v1420_v61  ;;  %v1772_v43 = vsel %vm1768_vm6, %v1739_v40, %v7913_v10  ;;  %v863_v10 = vrot.slane %v7611_v16, 1 }
  0xf6   : > { %1341 = vrot.lane.b32.xlu0 %v861_v5, %s10301_s15  ;;  %v1903_v35 = vsel %vm1900_vm10, %v1870_v51, %v1516_v14  ;;  %v1805_v41 = vsel %vm1801_vm7, %v1772_v43, %v7948_v39 }
  0xf7   : > { %1435 = vrot.lane.b32.xlu1 %v7997_v24, %s10303_s23  ;;  %v1838_v44 = vsel %vm1834_vm8, %v1805_v41, %v1326_v62  ;;  %v864_v55 = vsel %vm10271_vm2, %v862_v50, %v863_v10 }
  0xf8   : > { %v1518_v58 = vpop.permute.xlu0 %1517  ;;  %v1871_v60 = vsel %vm10272_vm9, %v1838_v44, %v1422_v4  ;;  %v739_v44 = vrot.slane %v7614_v17, 7 }
  0xf9   : > { %v1612_v1 = vpop.permute.xlu1 %1611  ;;  %v1904_v53 = vsel %vm1900_vm10, %v1871_v60, %v1518_v58  ;;  %v866_v58 = vsel %vm10271_vm2, %v863_v10, %v865_v8 }
  0xfa   : > { %1057 = vrot.lane.b32.xlu0 %v861_v5, %s10302_s20  ;;  %v1936_v38 = vsel %vm1933_vm4, %v1903_v35, %v1612_v1  ;;  %v609_v35 = vld [vmem:[#allocation2 + $0x100] sm:$0xff] }
  0xfb   : > { %1151 = vrot.lane.b32.xlu1 %v7997_v24, %s10244_s22  ;;  %6689 = vmatprep.mubr.msk.f32.mxu0 %vm1978_vm11, %v1936_v38  ;;  %v738_v41 = vrot.slane %v609_v35, 7 }
  0xfc   : > { %v8016_v33 = vpop.permute.xlu0 %947 }
  0xfd   : > { %v8030_v31 = vpop.permute.xlu1 %1233 }
  0xfe   : > { %1437 = vrot.lane.b32.xlu0 %v8013_v49, %s10303_s23 }
  0xff   : > { %1531 = vrot.lane.b32.xlu1 %v7596_v13, %s10248_s24 }
 0x100   : > { %v8034_v42 = vpop.permute.xlu0 %1327 }
 0x101   : > { %v1614_v54 = vpop.permute.xlu1 %1613 }
 0x102   : > { %1153 = vrot.lane.b32.xlu0 %v8013_v49, %s10244_s22  ;;  %v1937_v39 = vsel %vm1933_vm4, %v1904_v53, %v1614_v54 }
 0x103   : > { %1247 = vrot.lane.b32.xlu1 %v7596_v13, %s10246_s21  ;;  %6690 = vmatmul.mubr.msk.f32.gmra.mxu0 %vm1978_vm11, %v1937_v39 }
 0x104   : > { %v8046_v37 = vpop.permute.xlu0 %949 }
 0x105   : > { %v8054_v62 = vpop.permute.xlu1 %1043 }
 0x106   : > { %1533 = vrot.lane.b32.xlu0 %v7611_v16, %s10248_s24 }
 0x107   : > { %v6738_v59 = vpop.f32.mrf.mxu1  ;;  %1627 = vrot.lane.b32.xlu1 %v864_v55, %s10273_s30 }
 0x108   : > { %v2630_v61 = vsel %vm1933_vm4, %v6738_v59, 0.0  ;;  %v8057_v5 = vpop.permute.xlu0 %1329  ;;  %v1707_v59 = vsel %vm471_vm0, %v7587_v9, %v7938_v20  ;;  %v741_v20 = vrot.slane %v7715_v21, 7 }
 0x109   : > { %v2470_v3 = vpop.f32.mrf.mxu1  ;;  %v1424_v22 = vpop.permute.xlu1 %1423 }
 0x10a   : > { %v2629_v4 = vsel %vm1933_vm4, %v2470_v3, 0.0  ;;  %963 = vrot.lane.b32.xlu0 %v7596_v13, %s7158_s16  ;;  %v8093_v3 = vsel %vm697_vm3, %v738_v41, %v739_v44 }
 0x10b   : > { %v2631_v48 = vadd.f32 %v2630_v61, %v2629_v4  ;;  %v6741_v14 = vpop.f32.mrf.mxu1  ;;  %1249 = vrot.lane.b32.xlu1 %v7611_v16, %s10246_s21  ;;  %v1740_v61 = vsel %vm1735_vm5, %v1707_v59, %v7970_v57 }
 0x10c   : > { %v8063_v23 = vpop.permute.xlu0 %1045  ;;  %v2634_v28 = vsel %vm1933_vm4, %v6741_v14, 0.0 }
 0x10d   : > { %v2480_v12 = vpop.f32.mrf.mxu1  ;;  %v8071_v51 = vpop.permute.xlu1 %1139 }
 0x10e   : > { %v2632_v46 = vsel %vm1933_vm4, %v2480_v12, 0.0  ;;  %1343 = vrot.lane.b32.xlu0 %v864_v55, %s10301_s15 }
 0x10f   : > { %v2633_v29 = vadd.f32 %v2632_v46, %v2631_v48  ;;  %v6744_v13 = vpop.f32.mrf.mxu1  ;;  %1629 = vrot.lane.b32.xlu1 %v866_v58, %s10273_s30  ;;  %v1773_v48 = vsel %vm1768_vm6, %v1740_v61, %v7981_v11  ;;  %v868_v61 = vrot.slane %v7715_v21, 1 }
 0x110   : > { %v8073_v1 = vpop.permute.xlu0 %1425  ;;  %v2638_v40 = vsel %vm1933_vm4, %v6744_v13, 0.0 }
 0x111   : > { %v2490_v38 = vpop.f32.mrf.mxu1  ;;  %v2635_v7 = vadd.f32 %v2634_v28, %v2633_v29  ;;  %v1520_v10 = vpop.permute.xlu1 %1519 }
 0x112   : > { %v2636_v43 = vsel %vm1933_vm4, %v2490_v38, 0.0  ;;  %965 = vrot.lane.b32.xlu0 %v7611_v16, %s7158_s16 }
 0x113   : > { %v2637_v60 = vadd.f32 %v2636_v43, %v2635_v7  ;;  %v6747_v50 = vpop.f32.mrf.mxu1  ;;  %1059 = vrot.lane.b32.xlu1 %v864_v55, %s10302_s20  ;;  %v1806_v55 = vsel %vm1801_vm7, %v1773_v48, %v8001_v27  ;;  %v8112_v7 = vsel %vm697_vm3, %v739_v44, %v741_v20 }
 0x114   : > { %v8081_v53 = vpop.permute.xlu0 %1141  ;;  %v2642_v63 = vsel %vm1933_vm4, %v6747_v50, 0.0  ;;  %v1839_v28 = vsel %vm1834_vm8, %v1806_v55, %v8034_v42 }
 0x115   : > { %v2500_v54 = vpop.f32.mrf.mxu1  ;;  %v2639_v39 = vadd.f32 %v2638_v40, %v2637_v60  ;;  %v8097_v9 = vpop.permute.xlu1 %1235  ;;  %v1872_v29 = vsel %vm10272_vm9, %v1839_v28, %v1424_v22  ;;  %v1708_v22 = vsel %vm471_vm0, %v7607_v15, %v7962_v56  ;;  %v612_v28 = vld [vmem:[#allocation2 + $0x118] sm:$0xff] }
 0x116   : > { %v2640_v16 = vsel %vm1933_vm4, %v2500_v54, 0.0  ;;  %1345 = vrot.lane.b32.xlu0 %v866_v58, %s10301_s15  ;;  %v1905_v27 = vsel %vm1900_vm10, %v1872_v29, %v1520_v10  ;;  %v1741_v60 = vsel %vm1735_vm5, %v1708_v22, %v7975_v2 }
 0x117   : > { %v2641_v4 = vadd.f32 %v2640_v16, %v2639_v39  ;;  %v6750_v8 = vpop.f32.mrf.mxu1  ;;  %1439 = vrot.lane.b32.xlu1 %v8093_v3, %s10303_s23  ;;  %v1774_v15 = vsel %vm1768_vm6, %v1741_v60, %v7987_v19 }
 0x118   : > { %v1522_v14 = vpop.permute.xlu0 %1521  ;;  %v2646_v46 = vsel %vm1933_vm4, %v6750_v8, 0.0  ;;  %v1807_v54 = vsel %vm1801_vm7, %v1774_v15, %v8030_v31  ;;  %v867_v31 = vrot.slane %v7614_v17, 1 }
 0x119   : > { %v2510_v12 = vpop.f32.mrf.mxu1  ;;  %v2643_v57 = vadd.f32 %v2642_v63, %v2641_v4  ;;  %v1616_v38 = vpop.permute.xlu1 %1615  ;;  %v1840_v2 = vsel %vm1834_vm8, %v1807_v54, %v8057_v5  ;;  %v744_v54 = vrot.slane %v7717_v0, 7 }
 0x11a   : > { %v2644_v11 = vsel %vm1933_vm4, %v2510_v12, 0.0  ;;  %1061 = vrot.lane.b32.xlu0 %v866_v58, %s10302_s20  ;;  %v1938_v42 = vsel %vm1933_vm4, %v1905_v27, %v1616_v38  ;;  %v1873_v19 = vsel %vm10272_vm9, %v1840_v2, %v8073_v1 }
 0x11b   : > { %v2645_v13 = vadd.f32 %v2644_v11, %v2643_v57  ;;  %v6753_v35 = vpop.f32.mrf.mxu1  ;;  %1155 = vrot.lane.b32.xlu1 %v8093_v3, %s10244_s22  ;;  %6692 = vmatprep.mubr.msk.f32.mxu0 %vm1978_vm11, %v1938_v42  ;;  %v1906_v8 = vsel %vm1900_vm10, %v1873_v19, %v1522_v14  ;;  %v869_v57 = vsel %vm10271_vm2, %v867_v31, %v868_v61 }
 0x11c   : > { %v8115_v40 = vpop.permute.xlu0 %951  ;;  %v2650_v58 = vsel %vm1933_vm4, %v6753_v35, 0.0  ;;  %v870_v35 = vrot.slane %v612_v28, 1  ;;  %v1709_v19 = vsel %vm471_vm0, %v7771_v47, %v8016_v33 }
 0x11d   : > { %v2520_v43 = vpop.f32.mrf.mxu1  ;;  %v2647_v41 = vadd.f32 %v2646_v46, %v2645_v13  ;;  %v8131_v56 = vpop.permute.xlu1 %1237 }
 0x11e   : > { %v2648_v44 = vsel %vm1933_vm4, %v2520_v43, 0.0  ;;  %1441 = vrot.lane.b32.xlu0 %v8112_v7, %s10303_s23  ;;  %v871_v22 = vsel %vm10271_vm2, %v868_v61, %v870_v35  ;;  %v1742_v61 = vsel %vm1735_vm5, %v1709_v19, %v8054_v62  ;;  %v616_v19 = vld [vmem:[#allocation2 + $0x138] sm:$0xff] }
 0x11f   : > { %v2649_v50 = vadd.f32 %v2648_v44, %v2647_v41  ;;  %v6756_v10 = vpop.f32.mrf.mxu1  ;;  %1535 = vrot.lane.b32.xlu1 %v7614_v17, %s10248_s24  ;;  %v613_v44 = vld [vmem:[#allocation2 + $0x120] sm:$0xff] }
 0x120   : > { %v8135_v39 = vpop.permute.xlu0 %1331  ;;  %v2654_v12 = vsel %vm1933_vm4, %v6756_v10, 0.0  ;;  %v743_v15 = vrot.slane %v613_v44, 7 }
 0x121   : > { %v2530_v59 = vpop.f32.mrf.mxu1  ;;  %v2651_v63 = vadd.f32 %v2650_v58, %v2649_v50  ;;  %v1618_v48 = vpop.permute.xlu1 %1617 }
 0x122   : > { %v2652_v16 = vsel %vm1933_vm4, %v2530_v59, 0.0  ;;  %1157 = vrot.lane.b32.xlu0 %v8112_v7, %s10244_s22  ;;  %v1939_v20 = vsel %vm1933_vm4, %v1906_v8, %v1618_v48  ;;  %v746_v48 = vrot.slane %v7730_v25, 7 }
 0x123   : > { %v6759_v4 = vpop.f32.mrf.mxu1  ;;  %v2653_v5 = vadd.f32 %v2652_v16, %v2651_v63  ;;  %1251 = vrot.lane.b32.xlu1 %v7614_v17, %s10246_s21  ;;  %6693 = vmatmul.mubr.msk.f32.gmra.mxu0 %vm1978_vm11, %v1939_v20 }
 0x124   : > { %v8150_v55 = vpop.permute.xlu0 %953  ;;  %v2658_v43 = vsel %vm1933_vm4, %v6759_v4, 0.0  ;;  %v1775_v4 = vsel %vm1768_vm6, %v1742_v61, %v8071_v51  ;;  %v8210_v28 = vsel %vm697_vm3, %v744_v54, %v746_v48 }
 0x125   : > { %v2540_v1 = vpop.f32.mrf.mxu1  ;;  %v8159_v14 = vpop.permute.xlu1 %1047  ;;  %v2655_v46 = vadd.f32 %v2654_v12, %v2653_v5  ;;  %v1808_v47 = vsel %vm1801_vm7, %v1775_v4, %v8097_v9  ;;  %10304 = vst [vmem:[#allocation9_spill] sm:$0xff] %v8210_v28 }
 0x126   : > { %1537 = vrot.lane.b32.xlu0 %v7715_v21, %s10248_s24  ;;  %v2656_v29 = vsel %vm1933_vm4, %v2540_v1, 0.0  ;;  %v1841_v62 = vsel %vm1834_vm8, %v1808_v47, %v8135_v39 }
 0x127   : > { %1631 = vrot.lane.b32.xlu1 %v869_v57, %s10273_s30  ;;  %v6762_v13 = vpop.f32.mrf.mxu1  ;;  %v2657_v38 = vadd.f32 %v2656_v29, %v2655_v46 }
 0x128   : > { %v8161_v11 = vpop.permute.xlu0 %1333  ;;  %v2662_v16 = vsel %vm1933_vm4, %v6762_v13, 0.0  ;;  %v1710_v13 = vsel %vm471_vm0, %v7781_v52, %v8046_v37 }
 0x129   : > { %v1428_v27 = vpop.permute.xlu1 %1427  ;;  %v2550_v41 = vpop.f32.mrf.mxu1  ;;  %v2659_v60 = vadd.f32 %v2658_v43, %v2657_v38 }
 0x12a   : > { %967 = vrot.lane.b32.xlu0 %v7614_v17, %s7158_s16  ;;  %v2660_v50 = vsel %vm1933_vm4, %v2550_v41, 0.0  ;;  %v1874_v51 = vsel %vm10272_vm9, %v1841_v62, %v1428_v27  ;;  %v1743_v27 = vsel %vm1735_vm5, %v1710_v13, %v8063_v23 }
 0x12b   : > { %1253 = vrot.lane.b32.xlu1 %v7715_v21, %s10246_s21  ;;  %v6765_v10 = vpop.f32.mrf.mxu1  ;;  %v2661_v63 = vadd.f32 %v2660_v50, %v2659_v60  ;;  %v1776_v38 = vsel %vm1768_vm6, %v1743_v27, %v8081_v53  ;;  %v872_v53 = vrot.slane %v7717_v0, 1 }
 0x12c   : > { %v8167_v42 = vpop.permute.xlu0 %1049  ;;  %v2666_v39 = vsel %vm1933_vm4, %v6765_v10, 0.0  ;;  %v1809_v52 = vsel %vm1801_vm7, %v1776_v38, %v8131_v56  ;;  %v873_v56 = vrot.slane %v7730_v25, 1 }
 0x12d   : > { %v8174_v58 = vpop.permute.xlu1 %1143  ;;  %v2560_v31 = vpop.f32.mrf.mxu1  ;;  %v2663_v5 = vadd.f32 %v2662_v16, %v2661_v63  ;;  %v1842_v44 = vsel %vm1834_vm8, %v1809_v52, %v8161_v11 }
 0x12e   : > { %1347 = vrot.lane.b32.xlu0 %v869_v57, %s10301_s15  ;;  %v2664_v20 = vsel %vm1933_vm4, %v2560_v31, 0.0  ;;  %v874_v63 = vsel %vm10271_vm2, %v872_v53, %v873_v56  ;;  %v751_v53 = vrot.slane %v7748_v30, 7 }
 0x12f   : > { %1633 = vrot.lane.b32.xlu1 %v871_v22, %s10273_s30  ;;  %v6768_v12 = vpop.f32.mrf.mxu1  ;;  %v2665_v9 = vadd.f32 %v2664_v20, %v2663_v5  ;;  %v875_v5 = vrot.slane %v616_v19, 1 }
 0x130   : > { %v1430_v17 = vpop.permute.xlu0 %1429 }
 0x131   : > { %v1524_v59 = vpop.permute.xlu1 %1523  ;;  %v2570_v35 = vpop.f32.mrf.mxu1  ;;  %v2667_v41 = vadd.f32 %v2666_v39, %v2665_v9  ;;  %v1875_v60 = vsel %vm10272_vm9, %v1842_v44, %v1430_v17 }
 0x132   : > { %969 = vrot.lane.b32.xlu0 %v7715_v21, %s7158_s16  ;;  %v8192_v21 = vsel %vm697_vm3, %v743_v15, %v744_v54  ;;  %v1907_v1 = vsel %vm1900_vm10, %v1874_v51, %v1524_v59  ;;  %v2670_v59 = vsel %vm1933_vm4, %v6768_v12, 0.0  ;;  %v876_v51 = vsel %vm10271_vm2, %v873_v56, %v875_v5 }
 0x133   : > { %1063 = vrot.lane.b32.xlu1 %v869_v57, %s10302_s20  ;;  %v6771_v23 = vpop.f32.mrf.mxu1 }
 0x134   : > { %v8181_v2 = vpop.permute.xlu0 %1145  ;;  %v2674_v62 = vsel %vm1933_vm4, %v6771_v23, 0.0 }
 0x135   : > { %v8196_v8 = vpop.permute.xlu1 %1239  ;;  %v2580_v17 = vpop.f32.mrf.mxu1 }
 0x136   : > { %1349 = vrot.lane.b32.xlu0 %v871_v22, %s10301_s15  ;;  %v2672_v4 = vsel %vm1933_vm4, %v2580_v17, 0.0 }
 0x137   : > { %1443 = vrot.lane.b32.xlu1 %v8192_v21, %s10303_s23  ;;  %v6774_v48 = vpop.f32.mrf.mxu1 }
 0x138   : > { %v1526_v33 = vpop.permute.xlu0 %1525  ;;  %v2678_v52 = vsel %vm1933_vm4, %v6774_v48, 0.0 }
 0x139   : > { %v1620_v57 = vpop.permute.xlu1 %1619  ;;  %v1908_v50 = vsel %vm1900_vm10, %v1875_v60, %v1526_v33  ;;  %v2590_v12 = vpop.f32.mrf.mxu1 }
 0x13a   : > { %1065 = vrot.lane.b32.xlu0 %v871_v22, %s10302_s20  ;;  %v1940_v46 = vsel %vm1933_vm4, %v1907_v1, %v1620_v57  ;;  %v2668_v22 = vsel %vm1933_vm4, %v2570_v35, 0.0  ;;  %v617_v57 = vld [vmem:[#allocation2 + $0x140] sm:$0xff]  ;;  %v749_v35 = vrot.slane %v7732_v26, 7 }
 0x13b   : > { %1159 = vrot.lane.b32.xlu1 %v8192_v21, %s10244_s22  ;;  %6695 = vmatprep.mubr.msk.f32.mxu0 %vm1978_vm11, %v1940_v46  ;;  %v2669_v15 = vadd.f32 %v2668_v22, %v2667_v41  ;;  %v2676_v46 = vsel %vm1933_vm4, %v2590_v12, 0.0  ;;  %v6777_v39 = vpop.f32.mrf.mxu1  ;;  %v748_v13 = vrot.slane %v617_v57, 7  ;;  %v1711_v22 = vsel %vm471_vm0, %v7816_v45, %v8115_v40 }
 0x13c   : > { %v8213_v29 = vpop.permute.xlu0 %955  ;;  %v1744_v23 = vsel %vm1735_vm5, %v1711_v22, %v8159_v14 }
 0x13d   : > { %v8228_v43 = vpop.permute.xlu1 %1241  ;;  %v2671_v31 = vadd.f32 %v2670_v59, %v2669_v15  ;;  %v2600_v44 = vpop.f32.mrf.mxu1  ;;  %v1777_v26 = vsel %vm1768_vm6, %v1744_v23, %v8174_v58 }
 0x13e   : > { %1445 = vrot.lane.b32.xlu0 %v8210_v28, %s10303_s23  ;;  %v1810_v45 = vsel %vm1801_vm7, %v1777_v26, %v8196_v8 }
 0x13f   : > { %1539 = vrot.lane.b32.xlu1 %v7717_v0, %s10248_s24  ;;  %v2673_v33 = vadd.f32 %v2672_v4, %v2671_v31 }
 0x140   : > { %v8232_v37 = vpop.permute.xlu0 %1335 }
 0x141   : > { %v1622_v10 = vpop.permute.xlu1 %1621  ;;  %v2675_v9 = vadd.f32 %v2674_v62, %v2673_v33  ;;  %v1843_v14 = vsel %vm1834_vm8, %v1810_v45, %v8232_v37  ;;  %v2682_v37 = vsel %vm1933_vm4, %v6777_v39, 0.0  ;;  %v7075_v62 = vld [vmem:[#allocation2 + $0x148] sm:$0xff] }
 0x142   : > { %1161 = vrot.lane.b32.xlu0 %v8210_v28, %s10244_s22  ;;  %v1941_v54 = vsel %vm1933_vm4, %v1908_v50, %v1622_v10  ;;  %v2680_v50 = vsel %vm1933_vm4, %v2600_v44, 0.0  ;;  %v6780_v10 = vpop.f32.mrf.mxu1 }
 0x143   : > { %1255 = vrot.lane.b32.xlu1 %v7717_v0, %s10246_s21  ;;  %6696 = vmatmul.mubr.msk.f32.gmra.mxu0 %vm1978_vm11, %v1941_v54  ;;  %v2677_v38 = vadd.f32 %v2676_v46, %v2675_v9  ;;  %v8306_v54 = vsel %vm697_vm3, %v749_v35, %v751_v53 }
 0x144   : > { %v8246_v11 = vpop.permute.xlu0 %957  ;;  %10306 = vst [vmem:[#allocation11_spill] sm:$0xff] %v8306_v54  ;;  %v2610_v19 = vpop.f32.mrf.mxu1 }
 0x145   : > { %v8255_v16 = vpop.permute.xlu1 %1051  ;;  %v2679_v56 = vadd.f32 %v2678_v52, %v2677_v38  ;;  %v620_v38 = vld [vmem:[#allocation2 + $0x158] sm:$0xff] }
 0x146   : > { %1541 = vrot.lane.b32.xlu0 %v7730_v25, %s10248_s24  ;;  %v880_v23 = vrot.slane %v620_v38, 1 }
 0x147   : > { %1635 = vrot.lane.b32.xlu1 %v874_v63, %s10273_s30  ;;  %v2681_v8 = vadd.f32 %v2680_v50, %v2679_v56 }
 0x148   : > { %v8257_v61 = vpop.permute.xlu0 %1337 }
 0x149   : > { %v1432_v47 = vpop.permute.xlu1 %1431  ;;  %v2683_v5 = vadd.f32 %v2682_v37, %v2681_v8 }
 0x14a   : > { %971 = vrot.lane.b32.xlu0 %v7717_v0, %s7158_s16  ;;  %v1876_v58 = vsel %vm10272_vm9, %v1843_v14, %v1432_v47  ;;  %v2684_v47 = vsel %vm1933_vm4, %v2610_v19, 0.0  ;;  %v1713_v19 = vsel %vm471_vm0, %v7856_v32, %v8213_v29 }
 0x14b   : > { %1257 = vrot.lane.b32.xlu1 %v7730_v25, %s10246_s21  ;;  %v2685_v46 = vadd.f32 %v2684_v47, %v2683_v5 }
 0x14c   : > { %v8263_v20 = vpop.permute.xlu0 %1053 }
 0x14d   : > { %v8270_v1 = vpop.permute.xlu1 %1147 }
 0x14e   : > { %1351 = vrot.lane.b32.xlu0 %v874_v63, %s10301_s15 }
 0x14f   : > { %1637 = vrot.lane.b32.xlu1 %v876_v51, %s10273_s30 }
 0x150   : > { %v1434_v0 = vpop.permute.xlu0 %1433 }
 0x151   : > { %v1528_v27 = vpop.permute.xlu1 %1527 }
 0x152   : > { %973 = vrot.lane.b32.xlu0 %v7730_v25, %s7158_s16  ;;  %v8288_v25 = vsel %vm697_vm3, %v748_v13, %v749_v35  ;;  %v1909_v30 = vsel %vm1900_vm10, %v1876_v58, %v1528_v27 }
 0x153   : > { %1067 = vrot.lane.b32.xlu1 %v874_v63, %s10302_s20  ;;  %10305 = vst [vmem:[#allocation10_spill] sm:$0xff] %v8288_v25  ;;  %v1712_v63 = vsel %vm471_vm0, %v7823_v6, %v8150_v55 }
 0x154   : > { %v8277_v41 = vpop.permute.xlu0 %1149  ;;  %v1745_v31 = vsel %vm1735_vm5, %v1712_v63, %v8167_v42  ;;  %v6783_v42 = vpop.f32.mrf.mxu1 }
 0x155   : > { %v8292_v60 = vpop.permute.xlu1 %1243  ;;  %v1778_v4 = vsel %vm1768_vm6, %v1745_v31, %v8181_v2  ;;  %v877_v2 = vrot.slane %v7075_v62, 1  ;;  %v2690_v45 = vsel %vm1933_vm4, %v6783_v42, 0.0  ;;  %v1746_v31 = vsel %vm1735_vm5, %v1713_v19, %v8255_v16  ;;  %v625_v19 = vld [vmem:[#allocation2 + $0x180] sm:$0xff] }
 0x156   : > { %1353 = vrot.lane.b32.xlu0 %v876_v51, %s10301_s15  ;;  %v1811_v6 = vsel %vm1801_vm7, %v1778_v4, %v8228_v43  ;;  %v1779_v5 = vsel %vm1768_vm6, %v1746_v31, %v8270_v1  ;;  %v758_v31 = vrot.slane %v625_v19, 7 }
 0x157   : > { %1447 = vrot.lane.b32.xlu1 %v8288_v25, %s10303_s23  ;;  %v1844_v33 = vsel %vm1834_vm8, %v1811_v6, %v8257_v61  ;;  %v2686_v61 = vsel %vm1933_vm4, %v6780_v10, 0.0  ;;  %v621_v10 = vld [vmem:[#allocation2 + $0x160] sm:$0xff]  ;;  %v1812_v32 = vsel %vm1801_vm7, %v1779_v5, %v8292_v60  ;;  %v7079_v5 = vld [vmem:[#allocation2 + $0x188] sm:$0xff] }
 0x158   : > { %v1530_v40 = vpop.permute.xlu0 %1529  ;;  %v1877_v12 = vsel %vm10272_vm9, %v1844_v33, %v1434_v0  ;;  %v2620_v0 = vpop.f32.mrf.mxu1  ;;  %v2687_v52 = vadd.f32 %v2686_v61, %v2685_v46  ;;  %v7078_v33 = vld [vmem:[#allocation2 + $0x170] sm:$0xff] }
 0x159   : > { %v1624_v15 = vpop.permute.xlu1 %1623  ;;  %v1910_v43 = vsel %vm1900_vm10, %v1877_v12, %v1530_v40  ;;  %v2688_v44 = vsel %vm1933_vm4, %v2620_v0, 0.0 }
 0x15a   : > { %1069 = vrot.lane.b32.xlu0 %v876_v51, %s10302_s20  ;;  %v1942_v59 = vsel %vm1933_vm4, %v1909_v30, %v1624_v15  ;;  %v7076_v51 = vld [vmem:[#allocation2 + $0x150] sm:$0xff]  ;;  %v2689_v53 = vadd.f32 %v2688_v44, %v2687_v52  ;;  %v753_v30 = vrot.slane %v621_v10, 7  ;;  %v7077_v15 = vld [vmem:[#allocation2 + $0x168] sm:$0xff] }
 0x15b   : > { %1163 = vrot.lane.b32.xlu1 %v8288_v25, %s10244_s22  ;;  %6698 = vmatprep.mubr.msk.f32.mxu0 %vm1978_vm11, %v1942_v59  ;;  %v878_v57 = vrot.slane %v7076_v51, 1  ;;  %v754_v8 = vrot.slane %v7077_v15, 7 }
 0x15c   : > { %v8309_v17 = vpop.permute.xlu0 %959  ;;  %v2691_v14 = vadd.f32 %v2690_v45, %v2689_v53  ;;  %v624_v53 = vld [vmem:[#allocation2 + $0x178] sm:$0xff] }
 0x15d   : > { %v8324_v48 = vpop.permute.xlu1 %1245  ;;  %v879_v35 = vsel %vm10271_vm2, %v877_v2, %v878_v57  ;;  %v881_v40 = vsel %vm10271_vm2, %v878_v57, %v880_v23  ;;  %v8369_v4 = vsel %vm697_vm3, %v753_v30, %v754_v8 }
 0x15e   : > { %1449 = vrot.lane.b32.xlu0 %v8306_v54, %s10303_s23  ;;  %v2692_v59 = vrot.slane %v2691_v14, 4  ;;  %10307 = vst [vmem:[#allocation12_spill] sm:$0xff] %v8369_v4 }
 0x15f   : > { %1543 = vrot.lane.b32.xlu1 %v7075_v62, %s10248_s24 }
 0x160   : > { %v1340_v55 = vpop.permute.xlu0 %1339  ;;  %v2693_v6 = vadd.f32 %v2692_v59, %v2691_v14 }
 0x161   : > { %v1626_v9 = vpop.permute.xlu1 %1625  ;;  %v1845_v42 = vsel %vm1834_vm8, %v1812_v32, %v1340_v55  ;;  %v1714_v55 = vsel %vm471_vm0, %v7867_v36, %v8246_v11 }
 0x162   : > { %1165 = vrot.lane.b32.xlu0 %v8306_v54, %s10244_s22  ;;  %v1943_v39 = vsel %vm1933_vm4, %v1910_v43, %v1626_v9  ;;  %v2694_v12 = vrot.slane %v2693_v6, 2  ;;  %v1747_v43 = vsel %vm1735_vm5, %v1714_v55, %v8263_v20  ;;  %v882_v20 = vrot.slane %v7077_v15, 1 }
 0x163   : > { %1259 = vrot.lane.b32.xlu1 %v7075_v62, %s10246_s21  ;;  %6699 = vmatmul.mubr.msk.f32.gmra.mxu0 %vm1978_vm11, %v1943_v39  ;;  %v1780_v9 = vsel %vm1768_vm6, %v1747_v43, %v8277_v41 }
 0x164   : > { %v8337_v13 = vpop.permute.xlu0 %961  ;;  %v2695_v46 = vadd.f32 %v2694_v12, %v2693_v6  ;;  %v1813_v36 = vsel %vm1801_vm7, %v1780_v9, %v8324_v48  ;;  %v759_v6 = vrot.slane %v7079_v5, 7 }
 0x165   : > { %v8344_v27 = vpop.permute.xlu1 %1055 }
 0x166   : > { %1545 = vrot.lane.b32.xlu0 %v7076_v51, %s10248_s24  ;;  %v2696_v38 = vrot.slane %v2695_v46, 1 }
 0x167   : > { %1639 = vrot.lane.b32.xlu1 %v879_v35, %s10273_s30 }
 0x168   : > { %v1342_v22 = vpop.permute.xlu0 %1341 }
 0x169   : > { %v1436_v26 = vpop.permute.xlu1 %1435  ;;  %v1846_v61 = vsel %vm1834_vm8, %v1813_v36, %v1342_v22  ;;  %v2697_v22 = vadd.f32 %v2696_v38, %v2695_v46 }
 0x16a   : > { %975 = vrot.lane.b32.xlu0 %v7075_v62, %s7158_s16  ;;  %v756_v62 = vrot.slane %v7078_v33, 7  ;;  %v1878_v16 = vsel %vm10272_vm9, %v1845_v42, %v1436_v26  ;;  %v1715_v42 = vsel %vm471_vm0, %v7919_v18, %v8309_v17 }
 0x16b   : > { %1261 = vrot.lane.b32.xlu1 %v7076_v51, %s10246_s21  ;;  %v2698_v14 = vmul.f32 0.00390625, %v2697_v22 }
 0x16c   : > { %v8349_v56 = vpop.permute.xlu0 %1057 }
 0x16d   : > { %v8355_v50 = vpop.permute.xlu1 %1151 }
 0x16e   : > { %1355 = vrot.lane.b32.xlu0 %v879_v35, %s10301_s15 }
 0x16f   : > { %1641 = vrot.lane.b32.xlu1 %v881_v40, %s10273_s30 }
 0x170   : > { %v1438_v58 = vpop.permute.xlu0 %1437 }
 0x171   : > { %v1532_v37 = vpop.permute.xlu1 %1531  ;;  %v1879_v0 = vsel %vm10272_vm9, %v1846_v61, %v1438_v58  ;;  %v2699_v58 = vld [vmem:[%s10309_s4] sm:$0x1] }
 0x172   : > { %977 = vrot.lane.b32.xlu0 %v7076_v51, %s7158_s16  ;;  %v1911_v1 = vsel %vm1900_vm10, %v1878_v16, %v1532_v37  ;;  %v8384_v51 = vsel %vm697_vm3, %v754_v8, %v756_v62  ;;  %v2700_v59 = vadd.f32 %v2699_v58, %v2698_v14  ;;  %v1748_v16 = vsel %vm1735_vm5, %v1715_v42, %v8344_v27 }
 0x173   : > { %1071 = vrot.lane.b32.xlu1 %v879_v35, %s10302_s20  ;;  %10308 = vst [vmem:[#allocation13_spill] sm:$0xff] %v8384_v51  ;;  %v883_v35 = vrot.slane %v7078_v33, 1  ;;  %v1781_v12 = vsel %vm1768_vm6, %v1748_v16, %v8355_v50 }
 0x174   : > { %v8359_v63 = vpop.permute.xlu0 %1153  ;;  %v6272_v62 = vmul.f32 -1.442695, %v2700_v59  ;;  %v2707_v59 = vlaneseq }
 0x175   : > { %v8373_v47 = vpop.permute.xlu1 %1247  ;;  %v884_v48 = vsel %vm10271_vm2, %v882_v20, %v883_v35 }
 0x176   : > { %1357 = vrot.lane.b32.xlu0 %v881_v40, %s10301_s15  ;;  %7063 = vpow2.f32 %v6272_v62  ;;  %v1814_v18 = vsel %vm1801_vm7, %v1781_v12, %v8373_v47  ;;  %v1716_v47 = vsel %vm471_vm0, %v7934_v34, %v8337_v13  ;;  %v8514_v12 = vld [vmem:[%s10226_s2] ss:$0 sm:$0xff] }
 0x177   : > { %1451 = vrot.lane.b32.xlu1 %v8369_v4, %s10303_s23 }
 0x178   : > { %v1534_v29 = vpop.permute.xlu0 %1533 }
 0x179   : > { %v1628_v2 = vpop.permute.xlu1 %1627  ;;  %v1912_v41 = vsel %vm1900_vm10, %v1879_v0, %v1534_v29 }
 0x17a   : > { %1073 = vrot.lane.b32.xlu0 %v881_v40, %s10302_s20  ;;  %v1944_v57 = vsel %vm1933_vm4, %v1911_v1, %v1628_v2  ;;  %v885_v40 = vrot.slane %v624_v53, 1  ;;  %v7080_v2 = vld [vmem:[#allocation2 + $0x190] sm:$0xff] }
 0x17b   : > { %1167 = vrot.lane.b32.xlu1 %v8369_v4, %s10244_s22  ;;  %6701 = vmatprep.mubr.msk.f32.mxu0 %vm1978_vm11, %v1944_v57  ;;  %v761_v57 = vrot.slane %v7080_v2, 7  ;;  %v888_v38 = vrot.slane %v7080_v2, 1 }
 0x17c   : > { %v8387_v60 = vpop.permute.xlu0 %963  ;;  %v886_v8 = vsel %vm10271_vm2, %v883_v35, %v885_v40 }
 0x17d   : > { %v8401_v39 = vpop.permute.xlu1 %1249  ;;  %v8459_v9 = vsel %vm697_vm3, %v759_v6, %v761_v57 }
 0x17e   : > { %1453 = vrot.lane.b32.xlu0 %v8384_v51, %s10303_s23  ;;  %10312 = vst [vmem:[#allocation15_spill] sm:$0xff] %v8459_v9 }
 0x17f   : > { %1547 = vrot.lane.b32.xlu1 %v7077_v15, %s10248_s24 }
 0x180   : > { %v1344_v11 = vpop.permute.xlu0 %1343 }
 0x181   : > { %v1630_v52 = vpop.permute.xlu1 %1629  ;;  %v1847_v55 = vsel %vm1834_vm8, %v1814_v18, %v1344_v11  ;;  %v1749_v11 = vsel %vm1735_vm5, %v1716_v47, %v8349_v56  ;;  %v887_v56 = vrot.slane %v7079_v5, 1  ;;  %v1717_v18 = vsel %vm471_vm0, %v7997_v24, %v8387_v60  ;;  %v8535_v24 = vld [vmem:[#allocation2 + $0x1b0] sm:$0xff] }
 0x182   : > { %1169 = vrot.lane.b32.xlu0 %v8384_v51, %s10244_s22  ;;  %v1945_v44 = vsel %vm1933_vm4, %v1912_v41, %v1630_v52  ;;  %v1782_v61 = vsel %vm1768_vm6, %v1749_v11, %v8359_v63  ;;  %s10314_s22 = smov 28   ;;  %v766_v60 = vrot.slane %v8535_v24, 7 }
 0x183   : > { %1263 = vrot.lane.b32.xlu1 %v7077_v15, %s10246_s21  ;;  %6702 = vmatmul.mubr.msk.f32.gmra.mxu0 %vm1978_vm11, %v1945_v44  ;;  %s10313_s21 = smov 12   ;;  %v1815_v20 = vsel %vm1801_vm7, %v1782_v61, %v8401_v39  ;;  %v7064_v52 = vpop.eup %7063  ;;  %v889_v39 = vsel %vm10271_vm2, %v887_v56, %v888_v38 }
 0x184   : > { %v8412_v23 = vpop.permute.xlu0 %965  ;;  %v2704_v22 = vadd.f32 1.0, %v7064_v52 }
 0x185   : > { %v8418_v26 = vpop.permute.xlu1 %1059 }
 0x186   : > { %1549 = vrot.lane.b32.xlu0 %v7078_v33, %s10248_s24  ;;  %s10310_s24 = smov 16   ;;  %7065 = vrcp.f32 %v2704_v22 }
 0x187   : > { %1643 = vrot.lane.b32.xlu1 %v884_v48, %s10273_s30 }
 0x188   : > { %v1346_v45 = vpop.permute.xlu0 %1345 }
 0x189   : > { %v1440_v10 = vpop.permute.xlu1 %1439  ;;  %v1848_v13 = vsel %vm1834_vm8, %v1815_v20, %v1346_v45  ;;  %v628_v45 = vld [vmem:[#allocation2 + $0x198] sm:$0xff]  ;;  %v7166_v20 = vmov 1983009808  }
 0x18a   : > { %979 = vrot.lane.b32.xlu0 %v7077_v15, %s7158_s16  ;;  %v1880_v27 = vsel %vm10272_vm9, %v1847_v55, %v1440_v10  ;;  %v890_v14 = vrot.slane %v628_v45, 1 }
 0x18b   : > { %1265 = vrot.lane.b32.xlu1 %v7078_v33, %s10310_s24 }
 0x18c   : > { %v8425_v30 = vpop.permute.xlu0 %1061 }
 0x18d   : > { %v8430_v37 = vpop.permute.xlu1 %1155 }
 0x18e   : > { %1359 = vrot.lane.b32.xlu0 %v884_v48, %s10301_s15 }
 0x18f   : > { %1645 = vrot.lane.b32.xlu1 %v886_v8, %s10273_s30 }
 0x190   : > { %v1442_v15 = vpop.permute.xlu0 %1441 }
 0x191   : > { %v1536_v32 = vpop.permute.xlu1 %1535  ;;  %v1881_v35 = vsel %vm10272_vm9, %v1848_v13, %v1442_v15  ;;  %v629_v15 = vld [vmem:[#allocation2 + $0x1a0] sm:$0xff]  ;;  %v2777_v13 = vunpack.c.l.s4 %v7166_v20 }
 0x192   : > { %981 = vrot.lane.b32.xlu0 %v7078_v33, %s7158_s16  ;;  %v8444_v33 = vsel %vm697_vm3, %v758_v31, %v759_v6  ;;  %v1913_v50 = vsel %vm1900_vm10, %v1880_v27, %v1536_v32  ;;  %v8508_v6 = vld [vmem:[#allocation2 + $0x1a8] sm:$0xff]  ;;  %v2708_v32 = vshrl.u32 %v2707_v59, 7 }
 0x193   : > { %1075 = vrot.lane.b32.xlu1 %v884_v48, %s10302_s20  ;;  %10311 = vst [vmem:[#allocation14_spill] sm:$0xff] %v8444_v33  ;;  %v764_v62 = vrot.slane %v8508_v6, 7 }
 0x194   : > { %v8434_v29 = vpop.permute.xlu0 %1157  ;;  %v8528_v55 = vsub.s32 0, %v2708_v32 }
 0x195   : > { %v8448_v1 = vpop.permute.xlu1 %1251 }
 0x196   : > { %1361 = vrot.lane.b32.xlu0 %v886_v8, %s10301_s15 }
 0x197   : > { %1455 = vrot.lane.b32.xlu1 %v8444_v33, %s10303_s23 }
 0x198   : > { %v1538_v17 = vpop.permute.xlu0 %1537 }
 0x199   : > { %v1632_v43 = vpop.permute.xlu1 %1631  ;;  %v1914_v41 = vsel %vm1900_vm10, %v1881_v35, %v1538_v17 }
 0x19a   : > { %1077 = vrot.lane.b32.xlu0 %v886_v8, %s10302_s20  ;;  %v1946_v46 = vsel %vm1933_vm4, %v1913_v50, %v1632_v43  ;;  %v891_v8 = vsel %vm10271_vm2, %v888_v38, %v890_v14 }
 0x19b   : > { %1171 = vrot.lane.b32.xlu1 %v8444_v33, %s10313_s21  ;;  %6704 = vmatprep.mubr.msk.f32.mxu0 %vm1978_vm11, %v1946_v46 }
 0x19c   : > { %v8462_v36 = vpop.permute.xlu0 %967 }
 0x19d   : > { %v8476_v0 = vpop.permute.xlu1 %1253 }
 0x19e   : > { %1457 = vrot.lane.b32.xlu0 %v8459_v9, %s10303_s23 }
 0x19f   : > { %1551 = vrot.lane.b32.xlu1 %v7079_v5, %s10314_s22 }
 0x1a0   : > { %v1348_v34 = vpop.permute.xlu0 %1347 }
 0x1a1   : > { %v1634_v63 = vpop.permute.xlu1 %1633 }
 0x1a2   : > { %1173 = vrot.lane.b32.xlu0 %v8459_v9, %s10313_s21  ;;  %v1947_v44 = vsel %vm1933_vm4, %v1914_v41, %v1634_v63 }
 0x1a3   : > { %1267 = vrot.lane.b32.xlu1 %v7079_v5, %s10310_s24  ;;  %6705 = vmatmul.mubr.msk.f32.gmra.mxu0 %vm1978_vm11, %v1947_v44  ;;  %v6688_v42 = vpop.f32.mrf.mxu0  ;;  %v1718_v44 = vsel %vm471_vm0, %v8013_v49, %v8412_v23 }
 0x1a4   : > { %v8487_v48 = vpop.permute.xlu0 %969  ;;  %v2151_v50 = vadd.f32 %v6688_v42, %v8514_v12  ;;  %v1751_v22 = vsel %vm1735_vm5, %v1718_v44, %v8425_v30 }
 0x1a5   : > { %v8493_v53 = vpop.permute.xlu1 %1063  ;;  %v2145_v43 = vpop.f32.mrf.mxu0  ;;  %v1784_v14 = vsel %vm1768_vm6, %v1751_v22, %v8434_v29  ;;  %v893_v29 = vrot.slane %v8535_v24, 1 }
 0x1a6   : > { %1553 = vrot.lane.b32.xlu0 %v7080_v2, %s10314_s22  ;;  %v2305_v38 = vmax.f32 %v2151_v50, 0.0  ;;  %v1817_v49 = vsel %vm1801_vm7, %v1784_v14, %v8476_v0  ;;  %v632_v0 = vld [vmem:[#allocation2 + $0x1b8] sm:$0xff] }
 0x1a7   : > { %1647 = vrot.lane.b32.xlu1 %v889_v39, %s10273_s30 }
 0x1a8   : > { %v8495_v40 = vpop.permute.xlu0 %1349 }
 0x1a9   : > { %v1444_v10 = vpop.permute.xlu1 %1443  ;;  %v1850_v30 = vsel %vm1834_vm8, %v1817_v49, %v8495_v40  ;;  %v633_v40 = vld [vmem:[#allocation2 + $0x1c0] sm:$0xff]  ;;  %v1719_v49 = vsel %vm471_vm0, %v8093_v3, %v8462_v36 }
 0x1aa   : > { %983 = vrot.lane.b32.xlu0 %v7079_v5, %s7158_s16  ;;  %v763_v5 = vrot.slane %v629_v15, 7  ;;  %v892_v15 = vrot.slane %v8508_v6, 1 }
 0x1ab   : > { %1269 = vrot.lane.b32.xlu1 %v7080_v2, %s10310_s24 }
 0x1ac   : > { %v8499_v58 = vpop.permute.xlu0 %1065  ;;  %v8526_v17 = vsel %vm697_vm3, %v763_v5, %v764_v62 }
 0x1ad   : > { %v8504_v19 = vpop.permute.xlu1 %1159  ;;  %10315 = vst [vmem:[#allocation16_spill] sm:$0xff] %v8526_v17 }
 0x1ae   : > { %1363 = vrot.lane.b32.xlu0 %v889_v39, %s10301_s15 }
 0x1af   : > { %1649 = vrot.lane.b32.xlu1 %v891_v8, %s10273_s30 }
 0x1b0   : > { %v1446_v31 = vpop.permute.xlu0 %1445 }
 0x1b1   : > { %v1540_v16 = vpop.permute.xlu1 %1539 }
 0x1b2   : > { %985 = vrot.lane.b32.xlu0 %v7080_v2, %s7158_s16  ;;  %v1750_v2 = vsel %vm1735_vm5, %v1717_v18, %v8418_v26  ;;  %v7066_v26 = vpop.eup %7065 }
 0x1b3   : > { %1079 = vrot.lane.b32.xlu1 %v889_v39, %s10302_s20  ;;  %v1783_v27 = vsel %vm1768_vm6, %v1750_v2, %v8430_v37  ;;  %v2146_v37 = vadd.f32 %v8514_v12, %v2145_v43  ;;  %v8547_v56 = vrot.slane %v7066_v26, %v8528_v55  ;;  %v2778_v39 = vunpack.c.0.s8 %v2777_v13 }
 0x1b4   : > { %v8516_v57 = vpop.permute.xlu0 %1161  ;;  %v1816_v47 = vsel %vm1801_vm7, %v1783_v27, %v8448_v1  ;;  %v895_v43 = vrot.slane %v632_v0, 1 }
 0x1b5   : > { %v8533_v46 = vpop.permute.xlu1 %1255  ;;  %v1849_v61 = vsel %vm1834_vm8, %v1816_v47, %v1348_v34  ;;  %10316 = vst [vmem:[#allocation17_spill] sm:$0xff] %v8547_v56  ;;  %v8551_v34 = vsel %vm697_vm3, %v764_v62, %v766_v60  ;;  %v2304_v45 = vmax.f32 %v2146_v37, 0.0  ;;  %v8575_v59 = vsub.s32 %v2778_v39, %v2708_v32 }
 0x1b6   : > { %1365 = vrot.lane.b32.xlu0 %v891_v8, %s10301_s15  ;;  %v1882_v35 = vsel %vm10272_vm9, %v1849_v61, %v1444_v10  ;;  %10317 = vst [vmem:[#allocation18_spill] sm:$0xff] %v8551_v34  ;;  %v2712_v10 = vmul.f32 %v8547_v56, %v2305_v38  ;;  %v1883_v62 = vsel %vm10272_vm9, %v1850_v30, %v1446_v31  ;;  %v768_v47 = vrot.slane %v633_v40, 7 }
 0x1b7   : > { %1459 = vrot.lane.b32.xlu1 %v8526_v17, %s10303_s23  ;;  %v1915_v1 = vsel %vm1900_vm10, %v1882_v35, %v1540_v16  ;;  %10318 = vst [vmem:[#allocation19_spill] sm:$0xff] %v8575_v59  ;;  %v2711_v5 = vmul.f32 %v8547_v56, %v2304_v45  ;;  %v8596_v31 = vsel %vm10271_vm2, %v892_v15, %v893_v29 }
 0x1b8   : > { %v1542_v11 = vpop.permute.xlu0 %1541  ;;  %v2792_v32 = vcombine.high %v2712_v10, %v2712_v10  ;;  %v2799_v27 = vrot.slane %v2712_v10, %v8575_v59  ;;  %v8616_v39 = vsel %vm10271_vm2, %v893_v29, %v895_v43 }
 0x1b9   : > { %v1636_v41 = vpop.permute.xlu1 %1635  ;;  %v1916_v42 = vsel %vm1900_vm10, %v1883_v62, %v1542_v11  ;;  %v2775_v60 = vcombine.high %v2711_v5, %v2711_v5  ;;  %v8601_v11 = vld [vmem:[#allocation2 + $0x1c8] sm:$0xff]  ;;  %v2782_v13 = vrot.slane %v2711_v5, %v8575_v59  ;;  %v8636_v5 = vld [vmem:[#allocation2 + $0x1d0] sm:$0xff]  ;;  %v1752_v62 = vsel %vm1735_vm5, %v1719_v49, %v8493_v53 }
 0x1ba   : > { %1081 = vrot.lane.b32.xlu0 %v891_v8, %s10302_s20  ;;  %v1948_v63 = vsel %vm1933_vm4, %v1915_v1, %v1636_v41  ;;  %v10250_v61 = vrot.slane %v8601_v11, 7  ;;  %v8605_v20 = vrot.slane %v2792_v32, %v8575_v59  ;;  %v6277_v44 = vrot.slane %v2799_v27, 9 }
 0x1bb   : > { %1175 = vrot.lane.b32.xlu1 %v8526_v17, %s10313_s21  ;;  %6707 = vmatprep.mubr.msk.f32.mxu0 %vm1978_vm11, %v1948_v63  ;;  %v2807_v63 = vcombine.high %v2799_v27, %v2799_v27  ;;  %v2789_v22 = vrot.slane %v2775_v60, %v8575_v59  ;;  %v2790_v15 = vcombine.high %v2782_v13, %v2782_v13 }
 0x1bc   : > { %v8554_v52 = vpop.permute.xlu0 %971  ;;  %v8625_v10 = vsel %vm697_vm3, %v768_v47, %v10250_v61  ;;  %v8632_v30 = vcombine.high %v8605_v20, %v8605_v20  ;;  %v8646_v40 = vmax.f32 %v2799_v27, %v6277_v44 }
 0x1bd   : > { %v8569_v8 = vpop.permute.xlu1 %1257  ;;  %10319 = vst [vmem:[#allocation20_spill] sm:$0xff] %v8625_v10  ;;  %v6278_v36 = vrot.slane %v2807_v63, 9  ;;  %v6274_v47 = vrot.slane %v2790_v15, 9 }
 0x1be   : > { %1461 = vrot.lane.b32.xlu0 %v8551_v34, %s10303_s23 }
 0x1bf   : > { %1555 = vrot.lane.b32.xlu1 %v8508_v6, %s10314_s22 }
 0x1c0   : > { %v8573_v23 = vpop.permute.xlu0 %1351 }
 0x1c1   : > { %v1638_v16 = vpop.permute.xlu1 %1637 }
 0x1c2   : > { %1177 = vrot.lane.b32.xlu0 %v8551_v34, %s10313_s21  ;;  %v1949_v18 = vsel %vm1933_vm4, %v1916_v42, %v1638_v16  ;;  %v6279_v16 = vrot.slane %v8605_v20, 9 }
 0x1c3   : > { %1271 = vrot.lane.b32.xlu1 %v8508_v6, %s10310_s24  ;;  %v6691_v50 = vpop.f32.mrf.mxu0  ;;  %6708 = vmatmul.mubr.msk.f32.gmra.mxu0 %vm1978_vm11, %v1949_v18  ;;  %v6273_v18 = vrot.slane %v2782_v13, 9 }
 0x1c4   : > { %v8589_v2 = vpop.permute.xlu0 %973  ;;  %v2161_v26 = vadd.f32 %v6691_v50, %v8514_v12  ;;  %v2791_v50 = vcombine.high %v2789_v22, %v2789_v22 }
 0x1c5   : > { %v8608_v37 = vpop.permute.xlu1 %1067  ;;  %v2155_v35 = vpop.f32.mrf.mxu0 }
 0x1c6   : > { %1557 = vrot.lane.b32.xlu0 %v8535_v24, %s10314_s22  ;;  %v2307_v38 = vmax.f32 %v2161_v26, 0.0  ;;  %v2156_v1 = vadd.f32 %v8514_v12, %v2155_v35  ;;  %v6280_v26 = vrot.slane %v8632_v30, 9  ;;  %v1785_v35 = vsel %vm1768_vm6, %v1752_v62, %v8504_v19 }
 0x1c7   : > { %1651 = vrot.lane.b32.xlu1 %v8596_v31, %s10273_s30  ;;  %v6276_v19 = vrot.slane %v2791_v50, 9  ;;  %v3831_v62 = vmax.f32 %v2782_v13, %v6273_v18 }
 0x1c8   : > { %v8611_v41 = vpop.permute.xlu0 %1353  ;;  %v2714_v45 = vmul.f32 %v8547_v56, %v2307_v38  ;;  %v2306_v14 = vmax.f32 %v2156_v1, 0.0  ;;  %v6275_v1 = vrot.slane %v2789_v22, 9 }
 0x1c9   : > { %v8634_v29 = vpop.permute.xlu1 %1447  ;;  %v3834_v28 = vmax.f32 %v2791_v50, %v6276_v19 }
 0x1ca   : > { %987 = vrot.lane.b32.xlu0 %v8508_v6, %s7158_s16  ;;  %v2826_v0 = vcombine.high %v2714_v45, %v2714_v45  ;;  %v2833_v32 = vrot.slane %v2714_v45, %v8575_v59  ;;  %v2713_v42 = vmul.f32 %v8547_v56, %v2306_v14  ;;  %v3833_v4 = vmax.f32 %v2789_v22, %v6275_v1 }
 0x1cb   : > { %1273 = vrot.lane.b32.xlu1 %v8535_v24, %s10310_s24 }
 0x1cc   : > { %v8643_v3 = vpop.permute.xlu0 %1069  ;;  %v2840_v43 = vrot.slane %v2826_v0, %v8575_v59  ;;  %v2841_v53 = vcombine.high %v2833_v32, %v2833_v32  ;;  %v2809_v60 = vcombine.high %v2713_v42, %v2713_v42  ;;  %v2816_v27 = vrot.slane %v2713_v42, %v8575_v59 }
 0x1cd   : > { %10320 = vst [vmem:[#allocation21_spill] sm:$0xff] %v8643_v3  ;;  %v8657_v38 = vpop.permute.xlu1 %1163  ;;  %v6285_v45 = vrot.slane %v2833_v32, 9  ;;  %v8661_v0 = vmax.f32 %v2807_v63, %v6278_v36 }
 0x1ce   : > { %1367 = vrot.lane.b32.xlu0 %v8596_v31, %s10301_s15  ;;  %v2842_v44 = vcombine.high %v2840_v43, %v2840_v43  ;;  %v6286_v14 = vrot.slane %v2841_v53, 9  ;;  %v2823_v61 = vrot.slane %v2809_v60, %v8575_v59  ;;  %v2824_v6 = vcombine.high %v2816_v27, %v2816_v27 }
 0x1cf   : > { %v6281_v34 = vrot.slane %v2816_v27, 9  ;;  %1653 = vrot.lane.b32.xlu1 %v8616_v39, %s10273_s30  ;;  %v6287_v42 = vrot.slane %v2840_v43, 9  ;;  %v3832_v60 = vmax.f32 %v2790_v15, %v6274_v47  ;;  %v3843_v54 = vmax.f32 %v2833_v32, %v6285_v45 }
 0x1d0   : > { %v8659_v49 = vpop.permute.xlu0 %1449  ;;  %v6288_v17 = vrot.slane %v2842_v44, 9  ;;  %v2825_v9 = vcombine.high %v2823_v61, %v2823_v61  ;;  %v6282_v33 = vrot.slane %v2824_v6, 9  ;;  %v6283_v63 = vrot.slane %v2823_v61, 9 }
 0x1d1   : > { %v3839_v36 = vmax.f32 %v2816_v27, %v6281_v34  ;;  %v1544_v51 = vpop.permute.xlu1 %1543  ;;  %v3844_v25 = vmax.f32 %v2841_v53, %v6286_v14  ;;  %v1818_v34 = vsel %vm1801_vm7, %v1785_v35, %v8533_v46  ;;  %v3845_v27 = vmax.f32 %v2840_v43, %v6287_v42 }
 0x1d2   : > { %989 = vrot.lane.b32.xlu0 %v8535_v24, %s7158_s16  ;;  %v6284_v56 = vrot.slane %v2825_v9, 9  ;;  %v3840_v3 = vmax.f32 %v2824_v6, %v6282_v33  ;;  %v3841_v13 = vmax.f32 %v2823_v61, %v6283_v63  ;;  %v3837_v24 = vmax.f32 %v8605_v20, %v6279_v16 }
 0x1d3   : > { %v3959_v18 = vmax.f32 %v3831_v62, %v3839_v36  ;;  %1083 = vrot.lane.b32.xlu1 %v8596_v31, %s10302_s20  ;;  %v3846_v22 = vmax.f32 %v2842_v44, %v6288_v17  ;;  %v3838_v61 = vmax.f32 %v8632_v30, %v6280_v26  ;;  %v1851_v31 = vsel %vm1834_vm8, %v1818_v34, %v8573_v23 }
 0x1d4   : > { %v8668_v59 = vpop.permute.xlu0 %1165  ;;  %v3842_v15 = vmax.f32 %v2825_v9, %v6284_v56  ;;  %v3960_v32 = vmax.f32 %v3832_v60, %v3840_v3  ;;  %v3961_v53 = vmax.f32 %v3833_v4, %v3841_v13  ;;  %v3963_v20 = vmax.f32 %v8646_v40, %v3843_v54 }
 0x1d5   : > { %v8677_v33 = vpop.permute.xlu1 %1259  ;;  %v3964_v6 = vmax.f32 %v8661_v0, %v3844_v25  ;;  %v4120_v50 = vrot.slane %v3959_v18, %v8528_v55  ;;  %v3965_v4 = vmax.f32 %v3837_v24, %v3845_v27  ;;  %v1884_v56 = vsel %vm10272_vm9, %v1851_v31, %v8634_v29  ;;  %v636_v27 = vld [vmem:[#allocation2 + $0x1d8] sm:$0xff] }
 0x1d6   : > { %1369 = vrot.lane.b32.xlu0 %v8616_v39, %s10301_s15  ;;  %v3962_v16 = vmax.f32 %v3834_v28, %v3842_v15  ;;  %v4124_v17 = vrot.slane %v3960_v32, %v8528_v55  ;;  %v4128_v9 = vrot.slane %v3961_v53, %v8528_v55  ;;  %v10321_v25 = vrot.slane %v8636_v5, 7 }
 0x1d7   : > { %1463 = vrot.lane.b32.xlu1 %v8625_v10, %s10303_s23  ;;  %v10322_v28 = vrot.slane %v8601_v11, 7  ;;  %v3966_v23 = vmax.f32 %v3838_v61, %v3846_v22  ;;  %v1917_v40 = vsel %vm1900_vm10, %v1884_v56, %v1544_v51  ;;  %v4136_v29 = vrot.slane %v3963_v20, %v8528_v55  ;;  %v637_v20 = vld [vmem:[#allocation2 + $0x1e0] sm:$0xff] }
 0x1d8   : > { %v1546_v46 = vpop.permute.xlu0 %1545  ;;  %v4132_v30 = vrot.slane %v3962_v16, %v8528_v55  ;;  %v4374_v3 = vsel %vm10264_vm12, %v4124_v17, %v4120_v50  ;;  %v1720_v35 = vsel %vm471_vm0, %v8112_v7, %v8487_v48  ;;  %v4140_v1 = vrot.slane %v3964_v6, %v8528_v55 }
 0x1d9   : > { %v8698_v54 = vsel %vm697_vm3, %v10322_v28, %v10321_v25  ;;  %v1640_v43 = vpop.permute.xlu1 %1639  ;;  %v4376_v26 = vsel %vm10265_vm13, %v4128_v9, %v4374_v3  ;;  %vm10276_vm12 = vcmask 1046534   ;;  %v1753_v51 = vsel %vm1735_vm5, %v1720_v35, %v8499_v58  ;;  %v8789_v3 = vld [vmem:[#allocation2 + $0x1f0] sm:$0xff] }
 0x1da   : > { %1085 = vrot.lane.b32.xlu0 %v8616_v39, %s10302_s20  ;;  %10323 = vst [vmem:[#allocation22_spill] sm:$0xff] %v8698_v54  ;;  %v1950_v39 = vsel %vm1933_vm4, %v1917_v40, %v1640_v43  ;;  %v4378_v44 = vsel %vm4377_vm14, %v4132_v30, %v4376_v26  ;;  %v4144_v45 = vrot.slane %v3965_v4, %v8528_v55  ;;  %vm10275_vm13 = vcmask 1047559  }
 0x1db   : > { %1179 = vrot.lane.b32.xlu1 %v8625_v10, %s10313_s21  ;;  %6710 = vmatprep.mubr.msk.f32.mxu0 %vm1978_vm11, %v1950_v39  ;;  %v4380_v14 = vsel %vm4379_vm15, %v4136_v29, %v4378_v44  ;;  %v1786_v7 = vsel %vm1768_vm6, %v1753_v51, %v8516_v57  ;;  %v4148_v48 = vrot.slane %v3966_v23, %v8528_v55  ;;  %v898_v60 = vrot.slane %v8636_v5, 1  ;;  %v10326_v44 = vld [vmem:[#allocation9_spill] sm:$0xff] }
 0x1dc   : > { %v8706_v47 = vpop.permute.xlu0 %975  ;;  %v4382_v0 = vsel %vm4381_vm1, %v4140_v1, %v4380_v14  ;;  %v1819_v58 = vsel %vm1801_vm7, %v1786_v7, %v8569_v8  ;;  %v897_v8 = vrot.slane %v8601_v11, 1  ;;  %v900_v15 = vrot.slane %v636_v27, 1 }
 0x1dd   : > { %v8726_v19 = vpop.permute.xlu1 %1261  ;;  %v4384_v62 = vsel %vm10276_vm12, %v4144_v45, %v4382_v0  ;;  %v1852_v36 = vsel %vm1834_vm8, %v1819_v58, %v8611_v41  ;;  %v1721_v4 = vsel %vm471_vm0, %v8192_v21, %v8554_v52  ;;  %v776_v21 = vrot.slane %v8789_v3, 7  ;;  %v10327_v45 = vld [vmem:[#allocation21_spill] sm:$0xff] }
 0x1de   : > { %1465 = vrot.lane.b32.xlu0 %v8698_v54, %s10303_s23  ;;  %v4386_v63 = vsel %vm10275_vm13, %v4148_v48, %v4384_v62  ;;  %v1885_v57 = vsel %vm10272_vm9, %v1852_v36, %v8659_v49  ;;  %v899_v49 = vsel %vm10271_vm2, %v897_v8, %v898_v60  ;;  %v901_v61 = vsel %vm10271_vm2, %v898_v60, %v900_v15  ;;  %v10328_v0 = vld [vmem:[#allocation17_spill] sm:$0xff]  ;;  %v640_v60 = vld [vmem:[#allocation2 + $0x1f8] sm:$0xff] }
 0x1df   : > { %1559 = vrot.lane.b32.xlu1 %v8601_v11, %s10314_s22  ;;  %4445 = vst.msk [vmem:[#allocation3 + $0x20] sm:$0xff] %vm1933_vm4, %v4386_v63  ;;  %v1918_v13 = vsel %vm1900_vm10, %v1885_v57, %v1546_v46  ;;  %v8769_v46 = vld [vmem:[#allocation2 + $0x1e8] sm:$0xff]  ;;  %v1754_v56 = vsel %vm1735_vm5, %v1721_v4, %v8608_v37  ;;  %v1722_v51 = vsel %vm471_vm0, %v10326_v44, %v8589_v2  ;;  %v903_v57 = vrot.slane %v8789_v3, 1 }
 0x1e0   : > { %v1356_v42 = vpop.permute.xlu0 %1355  ;;  %v774_v16 = vrot.slane %v8769_v46, 7  ;;  %v1787_v25 = vsel %vm1768_vm6, %v1754_v56, %v8657_v38  ;;  %v1755_v14 = vsel %vm1735_vm5, %v1722_v51, %v10327_v45  ;;  %v902_v36 = vrot.slane %v8769_v46, 1 }
 0x1e1   : > { %v1642_v18 = vpop.permute.xlu1 %1641  ;;  %v1820_v52 = vsel %vm1801_vm7, %v1787_v25, %v8677_v33  ;;  %v1788_v48 = vsel %vm1768_vm6, %v1755_v14, %v8668_v59  ;;  %v8884_v14 = vld [vmem:[#allocation2 + $0x210] sm:$0xff] }
 0x1e2   : > { %1181 = vrot.lane.b32.xlu0 %v8698_v54, %s10313_s21  ;;  %v1951_v41 = vsel %vm1933_vm4, %v1918_v13, %v1642_v18  ;;  %v1853_v40 = vsel %vm1834_vm8, %v1820_v52, %v1356_v42  ;;  %v8802_v35 = vsel %vm697_vm3, %v774_v16, %v776_v21  ;;  %v1821_v2 = vsel %vm1801_vm7, %v1788_v48, %v8726_v19 }
 0x1e3   : > { %1275 = vrot.lane.b32.xlu1 %v8601_v11, %s10310_s24  ;;  %6711 = vmatmul.mubr.msk.f32.gmra.mxu0 %vm1978_vm11, %v1951_v41  ;;  %v6694_v50 = vpop.f32.mrf.mxu0  ;;  %10325 = vst [vmem:[#allocation24_spill] sm:$0xff] %v8802_v35  ;;  %v641_v41 = vld [vmem:[#allocation2 + $0x200] sm:$0xff] }
 0x1e4   : > { %v8745_v24 = vpop.permute.xlu0 %977  ;;  %v2171_v28 = vadd.f32 %v6694_v50, %v8514_v12  ;;  %v8849_v50 = vld [vmem:[#allocation2 + $0x208] sm:$0xff] }
 0x1e5   : > { %v8753_v34 = vpop.permute.xlu1 %1071  ;;  %v2165_v23 = vpop.f32.mrf.mxu0 }
 0x1e6   : > { %1561 = vrot.lane.b32.xlu0 %v8636_v5, %s10314_s22  ;;  %v2166_v38 = vadd.f32 %v8514_v12, %v2165_v23  ;;  %v2309_v29 = vmax.f32 %v2171_v28, 0.0 }
 0x1e7   : > { %1655 = vrot.lane.b32.xlu1 %v899_v49, %s10273_s30 }
 0x1e8   : > { %v1358_v22 = vpop.permute.xlu0 %1357  ;;  %v2308_v7 = vmax.f32 %v2166_v38, 0.0  ;;  %v2716_v58 = vmul.f32 %v10328_v0, %v2309_v29 }
 0x1e9   : > { %v1452_v32 = vpop.permute.xlu1 %1451  ;;  %v1854_v63 = vsel %vm1834_vm8, %v1821_v2, %v1358_v22  ;;  %v10329_v22 = vld [vmem:[#allocation19_spill] sm:$0xff] }
 0x1ea   : > { %991 = vrot.lane.b32.xlu0 %v8601_v11, %s7158_s16  ;;  %v773_v11 = vrot.slane %v637_v20, 7  ;;  %v1886_v43 = vsel %vm10272_vm9, %v1853_v40, %v1452_v32  ;;  %v2715_v59 = vmul.f32 %v10328_v0, %v2308_v7  ;;  %v2860_v19 = vcombine.high %v2716_v58, %v2716_v58 }
 0x1eb   : > { %1277 = vrot.lane.b32.xlu1 %v8636_v5, %s10310_s24  ;;  %v2867_v15 = vrot.slane %v2716_v58, %v10329_v22  ;;  %v905_v20 = vrot.slane %v640_v60, 1 }
 0x1ec   : > { %v8758_v53 = vpop.permute.xlu0 %1073  ;;  %v8853_v4 = vrot.slane %v2860_v19, %v10329_v22  ;;  %v2850_v56 = vrot.slane %v2715_v59, %v10329_v22 }
 0x1ed   : > { %v8764_v31 = vpop.permute.xlu1 %1167  ;;  %v6293_v40 = vrot.slane %v2867_v15, 9  ;;  %v8864_v38 = vsel %vm10271_vm2, %v903_v57, %v905_v20 }
 0x1ee   : > { %1371 = vrot.lane.b32.xlu0 %v899_v49, %s10301_s15  ;;  %v8880_v44 = vcombine.high %v8853_v4, %v8853_v4  ;;  %v2858_v51 = vcombine.high %v2850_v56, %v2850_v56 }
 0x1ef   : > { %1657 = vrot.lane.b32.xlu1 %v901_v61, %s10273_s30 }
 0x1f0   : > { %v1454_v6 = vpop.permute.xlu0 %1453 }
 0x1f1   : > { %v1548_v17 = vpop.permute.xlu1 %1547  ;;  %v1887_v8 = vsel %vm10272_vm9, %v1854_v63, %v1454_v6  ;;  %v2843_v6 = vcombine.high %v2715_v59, %v2715_v59  ;;  %v6289_v59 = vrot.slane %v2850_v56, 9 }
 0x1f2   : > { %993 = vrot.lane.b32.xlu0 %v8636_v5, %s7158_s16  ;;  %v8782_v5 = vsel %vm697_vm3, %v773_v11, %v774_v16  ;;  %v1919_v26 = vsel %vm1900_vm10, %v1886_v43, %v1548_v17  ;;  %v910_v16 = vrot.slane %v641_v41, 7  ;;  %v10266_v17 = vrot.slane %v8849_v50, 7 }
 0x1f3   : > { %1087 = vrot.lane.b32.xlu1 %v899_v49, %s10302_s20  ;;  %10324 = vst [vmem:[#allocation23_spill] sm:$0xff] %v8782_v5  ;;  %v2857_v43 = vrot.slane %v2843_v6, %v10329_v22 }
 0x1f4   : > { %v8772_v9 = vpop.permute.xlu0 %1169 }
 0x1f5   : > { %v8787_v30 = vpop.permute.xlu1 %1263 }
 0x1f6   : > { %1373 = vrot.lane.b32.xlu0 %v901_v61, %s10301_s15 }
 0x1f7   : > { %1467 = vrot.lane.b32.xlu1 %v8782_v5, %s10303_s23 }
 0x1f8   : > { %v1550_v37 = vpop.permute.xlu0 %1549 }
 0x1f9   : > { %v1644_v39 = vpop.permute.xlu1 %1643  ;;  %v1920_v13 = vsel %vm1900_vm10, %v1887_v8, %v1550_v37  ;;  %v2875_v37 = vcombine.high %v2867_v15, %v2867_v15  ;;  %v2859_v8 = vcombine.high %v2857_v43, %v2857_v43 }
 0x1fa   : > { %1089 = vrot.lane.b32.xlu0 %v901_v61, %s10302_s20  ;;  %v1952_v33 = vsel %vm1933_vm4, %v1919_v26, %v1644_v39  ;;  %v8844_v61 = vsel %vm10271_vm2, %v902_v36, %v903_v57  ;;  %v10330_v39 = vld [vmem:[#allocation10_spill] sm:$0xff]  ;;  %v6295_v36 = vrot.slane %v8853_v4, 9  ;;  %v8894_v57 = vmax.f32 %v2867_v15, %v6293_v40 }
 0x1fb   : > { %1183 = vrot.lane.b32.xlu1 %v8782_v5, %s10313_s21  ;;  %6713 = vmatprep.mubr.msk.f32.mxu0 %vm1978_vm11, %v1952_v33  ;;  %v1723_v33 = vsel %vm471_vm0, %v10330_v39, %v8706_v47  ;;  %v6294_v63 = vrot.slane %v2875_v37, 9  ;;  %vm10333_vm2 = vcmask 1041409  }
 0x1fc   : > { %v8805_v1 = vpop.permute.xlu0 %979  ;;  %v1756_v7 = vsel %vm1735_vm5, %v1723_v33, %v8753_v34 }
 0x1fd   : > { %v8820_v62 = vpop.permute.xlu1 %1265  ;;  %v1789_v41 = vsel %vm1768_vm6, %v1756_v7, %v8764_v31  ;;  %v3847_v31 = vmax.f32 %v2850_v56, %v6289_v59 }
 0x1fe   : > { %1469 = vrot.lane.b32.xlu0 %v8802_v35, %s10303_s23 }
 0x1ff   : > { %1563 = vrot.lane.b32.xlu1 %v8769_v46, %s10314_s22 }
 0x200   : > { %v8824_v42 = vpop.permute.xlu0 %1359 }
 0x201   : > { %v1646_v18 = vpop.permute.xlu1 %1645 }
 0x202   : > { %1185 = vrot.lane.b32.xlu0 %v8802_v35, %s10313_s21  ;;  %v1953_v49 = vsel %vm1933_vm4, %v1920_v13, %v1646_v18  ;;  %v6296_v13 = vrot.slane %v8880_v44, 9  ;;  %v6290_v18 = vrot.slane %v2858_v51, 9 }
 0x203   : > { %1279 = vrot.lane.b32.xlu1 %v8769_v46, %s10310_s24  ;;  %v6697_v32 = vpop.f32.mrf.mxu0  ;;  %6714 = vmatmul.mubr.msk.f32.gmra.mxu0 %vm1978_vm11, %v1953_v49 }
 0x204   : > { %v8837_v27 = vpop.permute.xlu0 %981  ;;  %v2181_v11 = vadd.f32 %v6697_v32, %v8514_v12  ;;  %v6291_v32 = vrot.slane %v2857_v43, 9 }
 0x205   : > { %v8856_v25 = vpop.permute.xlu1 %1075  ;;  %v2175_v28 = vpop.f32.mrf.mxu0 }
 0x206   : > { %1565 = vrot.lane.b32.xlu0 %v8789_v3, %s10314_s22  ;;  %v2311_v23 = vmax.f32 %v2181_v11, 0.0  ;;  %v2176_v21 = vadd.f32 %v8514_v12, %v2175_v28  ;;  %v8873_v12 = vsel %vm697_vm3, %v910_v16, %v10266_v17  ;;  %v3852_v28 = vmax.f32 %v2875_v37, %v6294_v63 }
 0x207   : > { %1659 = vrot.lane.b32.xlu1 %v8844_v61, %s10273_s30  ;;  %v3848_v37 = vmax.f32 %v2858_v51, %v6290_v18  ;;  %v3849_v63 = vmax.f32 %v2857_v43, %v6291_v32  ;;  %v3854_v32 = vmax.f32 %v8880_v44, %v6296_v13  ;;  %v10332_v44 = vrot.slane %v8849_v50, 7 }
 0x208   : > { %v8859_v52 = vpop.permute.xlu0 %1361  ;;  %v2718_v29 = vmul.f32 %v10328_v0, %v2311_v23  ;;  %v2310_v26 = vmax.f32 %v2176_v21, 0.0 }
 0x209   : > { %v8882_v45 = vpop.permute.xlu1 %1455 }
 0x20a   : > { %995 = vrot.lane.b32.xlu0 %v8769_v46, %s7158_s16  ;;  %v2894_v48 = vcombine.high %v2718_v29, %v2718_v29  ;;  %v2901_v58 = vrot.slane %v2718_v29, %v10329_v22  ;;  %v2717_v2 = vmul.f32 %v10328_v0, %v2310_v26  ;;  %v6292_v29 = vrot.slane %v2859_v8, 9 }
 0x20b   : > { %1281 = vrot.lane.b32.xlu1 %v8789_v3, %s10310_s24 }
 0x20c   : > { %v8891_v47 = vpop.permute.xlu0 %1077  ;;  %v2908_v60 = vrot.slane %v2894_v48, %v10329_v22  ;;  %v2909_v34 = vcombine.high %v2901_v58, %v2901_v58  ;;  %v2877_v19 = vcombine.high %v2717_v2, %v2717_v2  ;;  %v2884_v49 = vrot.slane %v2717_v2, %v10329_v22 }
 0x20d   : > { %v8905_v15 = vpop.permute.xlu1 %1171  ;;  %v6301_v6 = vrot.slane %v2901_v58, 9  ;;  %v3850_v59 = vmax.f32 %v2859_v8, %v6292_v29 }
 0x20e   : > { %1375 = vrot.lane.b32.xlu0 %v8844_v61, %s10301_s15  ;;  %v2910_v20 = vcombine.high %v2908_v60, %v2908_v60  ;;  %v6302_v11 = vrot.slane %v2909_v34, 9  ;;  %v2891_v23 = vrot.slane %v2877_v19, %v10329_v22  ;;  %v2892_v21 = vcombine.high %v2884_v49, %v2884_v49 }
 0x20f   : > { %v6297_v40 = vrot.slane %v2884_v49, 9  ;;  %1661 = vrot.lane.b32.xlu1 %v8864_v38, %s10273_s30  ;;  %v6303_v26 = vrot.slane %v2908_v60, 9  ;;  %v3859_v19 = vmax.f32 %v2901_v58, %v6301_v6  ;;  %s10338_s30 = smov 32  }
 0x210   : > { %v8907_v16 = vpop.permute.xlu0 %1457  ;;  %v6304_v39 = vrot.slane %v2910_v20, 9  ;;  %v2893_v33 = vcombine.high %v2891_v23, %v2891_v23  ;;  %v6298_v7 = vrot.slane %v2892_v21, 9  ;;  %v6299_v48 = vrot.slane %v2891_v23, 9 }
 0x211   : > { %v3855_v2 = vmax.f32 %v2884_v49, %v6297_v40  ;;  %v1552_v17 = vpop.permute.xlu1 %1551  ;;  %v3860_v46 = vmax.f32 %v2909_v34, %v6302_v11  ;;  %v1822_v49 = vsel %vm1801_vm7, %v1789_v41, %v8787_v30  ;;  %v3861_v40 = vmax.f32 %v2908_v60, %v6303_v26 }
 0x212   : > { %997 = vrot.lane.b32.xlu0 %v8789_v3, %s7158_s16  ;;  %v6300_v5 = vrot.slane %v2893_v33, 9  ;;  %v3856_v54 = vmax.f32 %v2892_v21, %v6298_v7  ;;  %v3857_v10 = vmax.f32 %v2891_v23, %v6299_v48  ;;  %v3853_v3 = vmax.f32 %v8853_v4, %v6295_v36  ;;  %v10335_v21 = vld [vmem:[#allocation11_spill] sm:$0xff]  ;;  %s7169_s16 = smov [#allocation5]  }
 0x213   : > { %v3967_v56 = vmax.f32 %v3847_v31, %v3855_v2  ;;  %1091 = vrot.lane.b32.xlu1 %v8844_v61, %s10302_s20  ;;  %v3862_v43 = vmax.f32 %v2910_v20, %v6304_v39  ;;  %v1855_v61 = vsel %vm1834_vm8, %v1822_v49, %v8824_v42  ;;  %v3971_v4 = vmax.f32 %v8894_v57, %v3859_v19  ;;  %s7099_s0 = sshll.u32 %s7169_s16, 4  ;;  %s7100_s0 = int_to_ptr.vmem [resolvable:$false] %s7099_s0 }
 0x214   : > { %v8914_v35 = vpop.permute.xlu0 %1173  ;;  %v3858_v51 = vmax.f32 %v2893_v33, %v6300_v5  ;;  %v3968_v58 = vmax.f32 %v3848_v37, %v3856_v54  ;;  %v3969_v34 = vmax.f32 %v3849_v63, %v3857_v10  ;;  %v3972_v36 = vmax.f32 %v3852_v28, %v3860_v46 }
 0x215   : > { %v8923_v18 = vpop.permute.xlu1 %1267  ;;  %v4152_v60 = vrot.slane %v3967_v56, %v8528_v55  ;;  %v3973_v10 = vmax.f32 %v3853_v3, %v3861_v40  ;;  %v1888_v54 = vsel %vm10272_vm9, %v1855_v61, %v8882_v45  ;;  %v10331_v42 = vrot.slane %v8884_v14, 7 }
 0x216   : > { %1377 = vrot.lane.b32.xlu0 %v8864_v38, %s10301_s15  ;;  %v3970_v30 = vmax.f32 %v3850_v59, %v3858_v51  ;;  %v4156_v41 = vrot.slane %v3968_v58, %v8528_v55  ;;  %v4160_v5 = vrot.slane %v3969_v34, %v8528_v55  ;;  %v3974_v57 = vmax.f32 %v3854_v32, %v3862_v43  ;;  %v4803_v51 = vld [vmem:[%s10229_s5 + $0xe0] sm:$0xff] }
 0x217   : > { %1471 = vrot.lane.b32.xlu1 %v8873_v12, %s10303_s23  ;;  %v914_v46 = vsel %vm697_vm3, %v10332_v44, %v10331_v42  ;;  %v1921_v6 = vsel %vm1900_vm10, %v1888_v54, %v1552_v17  ;;  %v4168_v28 = vrot.slane %v3971_v4, %v8528_v55  ;;  %vm10334_vm9 = vcmask 1042434   ;;  %v4806_v17 = vld [vmem:[%s10229_s5 + $0xf8] sm:$0xff]  ;;  %v645_v54 = vld [vmem:[#allocation2 + $0x220] sm:$0xff]  ;;  %v9036_v42 = vld [vmem:[#allocation2 + $0x228] sm:$0xff] }
 0x218   : > { %v1554_v8 = vpop.permute.xlu0 %1553  ;;  %v4164_v13 = vrot.slane %v3970_v30, %v8528_v55  ;;  %v4387_v20 = vsel %vm10333_vm2, %v4156_v41, %v4152_v60  ;;  %v1724_v29 = vsel %vm471_vm0, %v10335_v21, %v8745_v24  ;;  %v4172_v31 = vrot.slane %v3972_v36, %v8528_v55  ;;  %6546 = vmatprep.subr.mxu1 %v4806_v17  ;;  %v644_v4 = vld [vmem:[#allocation2 + $0x218] sm:$0xff]  ;;  %v4801_v60 = vld [vmem:[%s10229_s5 + $0xd0] sm:$0xff]  ;;  %v4800_v44 = vld [vmem:[%s10229_s5 + $0xc8] sm:$0xff] }
 0x219   : > { %v1648_v11 = vpop.permute.xlu1 %1647  ;;  %v4388_v45 = vsel %vm10334_vm9, %v4160_v5, %v4387_v20  ;;  %v1757_v39 = vsel %vm1735_vm5, %v1724_v29, %v8758_v53  ;;  %v4176_v33 = vrot.slane %v3973_v10, %v8528_v55  ;;  %v4180_v48 = vrot.slane %v3974_v57, %v8528_v55  ;;  %v4805_v53 = vld [vmem:[%s10229_s5 + $0xf0] sm:$0xff]  ;;  %v4802_v36 = vld [vmem:[%s10229_s5 + $0xd8] sm:$0xff] }
 0x21a   : > { %1093 = vrot.lane.b32.xlu0 %v8864_v38, %s10302_s20  ;;  %v1954_v38 = vsel %vm1933_vm4, %v1921_v6, %v1648_v11  ;;  %v4389_v26 = vsel %vm4377_vm14, %v4164_v13, %v4388_v45  ;;  %v1790_v7 = vsel %vm1768_vm6, %v1757_v39, %v8772_v9  ;;  %v4789_v9 = vld [vmem:[%s10229_s5 + $0x70] sm:$0xff]  ;;  %vm10336_vm2 = vcmask 195584   ;;  %v4783_v45 = vld [vmem:[%s10229_s5 + $0x40] sm:$0xff]  ;;  %v4782_v29 = vld [vmem:[%s10229_s5 + $0x38] sm:$0xff] }
 0x21b   : > { %1187 = vrot.lane.b32.xlu1 %v8873_v12, %s10313_s21  ;;  %6716 = vmatprep.mubr.msk.f32.mxu0 %vm1978_vm11, %v1954_v38  ;;  %v4390_v24 = vsel %vm4379_vm15, %v4168_v28, %v4389_v26  ;;  %v4790_v12 = vld [vmem:[%s10229_s5 + $0x78] sm:$0xff]  ;;  %v1823_v63 = vsel %vm1801_vm7, %v1790_v7, %v8820_v62  ;;  %v4804_v62 = vld [vmem:[%s10229_s5 + $0xe8] sm:$0xff]  ;;  %v916_v40 = vrot.slane %v8849_v50, 1  ;;  %v917_v43 = vrot.slane %v8884_v14, 1  ;;  %v9051_v11 = vld [vmem:[#allocation2 + $0x230] sm:$0xff] }
 0x21c   : > { %v8949_v23 = vpop.permute.xlu0 %983  ;;  %v4391_v2 = vsel %vm4381_vm1, %v4172_v31, %v4390_v24  ;;  %6547 = vmatpush3.msra.mxu1 %v4790_v12  ;;  %v1856_v59 = vsel %vm1834_vm8, %v1823_v63, %v8859_v52  ;;  %v4788_v52 = vld [vmem:[%s10229_s5 + $0x68] sm:$0xff]  ;;  %vm10337_vm9 = vcmask 1046528   ;;  %v919_v5 = vrot.slane %v644_v4, 1  ;;  %v4799_v28 = vld [vmem:[%s10229_s5 + $0xc0] sm:$0xff]  ;;  %v4798_v38 = vld [vmem:[%s10229_s5 + $0xb8] sm:$0xff] }
 0x21d   : > { %v8974_v37 = vpop.permute.xlu1 %1269  ;;  %v4392_v19 = vsel %vm10276_vm12, %v4176_v33, %v4391_v2  ;;  %6548 = vmatprep.subr.mxu1 %v4805_v53  ;;  %v1889_v49 = vsel %vm10336_vm2, %v1856_v59, %v8907_v16  ;;  %v4787_v16 = vld [vmem:[%s10229_s5 + $0x60] sm:$0xff]  ;;  %v918_v30 = vsel %vm10337_vm9, %v916_v40, %v917_v43  ;;  %vm10339_vm2 = vmmov %vm10337_vm9  ;;  %v924_v20 = vrot.slane %v645_v54, 7  ;;  %v4797_v17 = vld [vmem:[%s10229_s5 + $0xb0] sm:$0xff] }
 0x21e   : > { %1473 = vrot.lane.b32.xlu0 %v914_v46, %s10303_s23  ;;  %v4393_v3 = vsel %vm10275_vm13, %v4180_v48, %v4392_v19  ;;  %6549 = vmatpush3.msra.mxu1 %v4789_v9  ;;  %v1922_v58 = vsel %vm1900_vm10, %v1889_v49, %v1554_v8  ;;  %v4786_v8 = vld [vmem:[%s10229_s5 + $0x58] sm:$0xff]  ;;  %v920_v13 = vsel %vm10339_vm2, %v917_v43, %v919_v5  ;;  %v925_v6 = vrot.slane %v9036_v42, 7  ;;  %v4781_v33 = vld [vmem:[%s10229_s5 + $0x30] sm:$0xff]  ;;  %v4458_v24 = vld [vmem:[#allocation3 + $0x28] sm:$0xff] }
 0x21f   : > { %1567 = vrot.lane.b32.xlu1 %v8849_v50, %s10314_s22  ;;  %4446 = vst.msk [vmem:[#allocation3 + $0x38] sm:$0xff] %vm1933_vm4, %v4393_v3  ;;  %6550 = vmatprep.subr.mxu1 %v4804_v62  ;;  %v927_v21 = vrot.slane %v9051_v11, 7  ;;  %v4796_v12 = vld [vmem:[%s10229_s5 + $0xa8] sm:$0xff]  ;;  %v4810_v7 = vld [vmem:[%s10229_s5 + $0x118] sm:$0xff]  ;;  %v9090_v2 = vld [vmem:[#allocation3 + $0x20] sm:$0xff]  ;;  %v930_v3 = vrot.slane %v9036_v42, 1 }
 0x220   : > { %v8982_v56 = vpop.permute.xlu0 %1363  ;;  %6551 = vmatpush3.msra.mxu1 %v4788_v52  ;;  %v926_v26 = vsel %vm697_vm3, %v924_v20, %v925_v6  ;;  %10340 = vst [vmem:[#allocation9_spill] sm:$0xff] %v9090_v2  ;;  %v4455_v53 = vld [vmem:[#allocation3 + $0x10] sm:$0xff]  ;;  %v4780_v63 = vld [vmem:[%s10229_s5 + $0x28] sm:$0xff]  ;;  %v931_v59 = vrot.slane %v9051_v11, 1  ;;  %v648_v62 = vld [vmem:[#allocation2 + $0x238] sm:$0xff]  ;;  %6784 = vmatprep.subr.mxu0 %v4810_v7  ;;  %vm10346_vm13 = vcmask 195584  }
 0x221   : > { %v1650_v34 = vpop.permute.xlu1 %1649  ;;  %6552 = vmatprep.subr.mxu1 %v4803_v51  ;;  %v928_v48 = vsel %vm697_vm3, %v925_v6, %v927_v21  ;;  %v4795_v49 = vld [vmem:[%s10229_s5 + $0xa0] sm:$0xff]  ;;  %v4809_v40 = vld [vmem:[%s10229_s5 + $0x110] sm:$0xff]  ;;  %v9105_v52 = vld [vmem:[#allocation3 + $0x8] sm:$0xff]  ;;  %v4543_v51 = vrot.slane %v4458_v24, 1  ;;  %6785 = vmatpush3.msra.mxu0 %v4810_v7 }
 0x222   : > { %1189 = vrot.lane.b32.xlu0 %v914_v46, %s10313_s21  ;;  %v1955_v32 = vsel %vm1933_vm4, %v1922_v58, %v1650_v34  ;;  %6553 = vmatpush3.msra.mxu1 %v4787_v16  ;;  %v4784_v46 = vld [vmem:[%s10229_s5 + $0x48] sm:$0xff]  ;;  %10341 = vst [vmem:[#allocation21_spill] sm:$0xff] %v9105_v52  ;;  %v4459_v58 = vld [vmem:[#allocation3 + $0x30] sm:$0xff]  ;;  %v4779_v34 = vld [vmem:[%s10229_s5 + $0x20] sm:$0xff]  ;;  %v4539_v4 = vrot.slane %v9105_v52, 1  ;;  %s7167_s21 = smov 64  }
 0x223   : > { %1283 = vrot.lane.b32.xlu1 %v8849_v50, %s10310_s24  ;;  %6717 = vmatmul.mubr.msk.f32.gmra.mxu0 %vm1978_vm11, %v1955_v32  ;;  %v4785_v50 = vld [vmem:[%s10229_s5 + $0x50] sm:$0xff]  ;;  %v6700_v19 = vpop.f32.mrf.mxu0  ;;  %v10342_v16 = vld [vmem:[#allocation12_spill] sm:$0xff]  ;;  %v4808_v5 = vld [vmem:[%s10229_s5 + $0x108] sm:$0xff] }
 0x224   : > { %v9012_v61 = vpop.permute.xlu0 %985  ;;  %6554 = vmatprep.subr.mxu1 %v4802_v36  ;;  %v1725_v32 = vsel %vm471_vm0, %v10342_v16, %v8805_v1  ;;  %v4542_v36 = vrot.slane %v9090_v2, 1  ;;  %6786 = vmatprep.subr.mxu0 %v4809_v40  ;;  %v4778_v54 = vld [vmem:[%s10229_s5 + $0x18] sm:$0xff]  ;;  %vm10344_vm9 = vmmov %vm10339_vm2  ;;  %v4461_v21 = vld [vmem:[#allocation3 + $0x40] sm:$0xff] }
 0x225   : > { %v9029_v41 = vpop.permute.xlu1 %1079  ;;  %6555 = vmatpush3.msra.mxu1 %v4786_v8  ;;  %v1758_v1 = vsel %vm1735_vm5, %v1725_v32, %v8856_v25  ;;  %v2185_v25 = vpop.f32.mrf.mxu0  ;;  %v4456_v6 = vld [vmem:[#allocation3 + $0x18] sm:$0xff]  ;;  %6787 = vmatpush3.msra.mxu0 %v4809_v40  ;;  %v4777_v24 = vld [vmem:[%s10229_s5 + $0x10] sm:$0xff]  ;;  %vm10347_vm12 = vmmov %vm10339_vm2 }
 0x226   : > { %1569 = vrot.lane.b32.xlu0 %v8884_v14, %s10314_s22  ;;  %6556 = vmatprep.subr.mxu1 %v4801_v60  ;;  %v9116_v8 = vld [vmem:[#allocation3 + $0x38] sm:$0xff]  ;;  %v4791_v16 = vld [vmem:[%s10229_s5 + $0x80] sm:$0xff] }
 0x227   : > { %1663 = vrot.lane.b32.xlu1 %v918_v30, %s10338_s30  ;;  %6557 = vmatpush3.msra.mxu1 %v4785_v50  ;;  %v4794_v60 = vld [vmem:[%s10229_s5 + $0x98] sm:$0xff]  ;;  %v933_v50 = vrot.slane %v648_v62, 1  ;;  %v4792_v62 = vld [vmem:[%s10229_s5 + $0x88] sm:$0xff] }
 0x228   : > { %v9034_v10 = vpop.permute.xlu0 %1365  ;;  %6558 = vmatprep.subr.mxu1 %v4800_v44  ;;  %v1791_v44 = vsel %vm1768_vm6, %v1758_v1, %v8905_v15  ;;  %v4505_v15 = vrot.slane %v4459_v58, 7  ;;  %6788 = vmatprep.subr.mxu0 %v4808_v5  ;;  %v10349_v58 = vld [vmem:[#allocation13_spill] sm:$0xff] }
 0x229   : > { %v9047_v57 = vpop.permute.xlu1 %1459  ;;  %6559 = vmatpush3.msra.mxu1 %v4784_v46  ;;  %v9136_v46 = vld [vmem:[%s10226_s2] ss:$0 sm:$0xff]  ;;  %6789 = vmatpush3.msra.mxu0 %v4808_v5 }
 0x22a   : > { %1285 = vrot.lane.b32.xlu0 %v8884_v14, %s10310_s24  ;;  %6560 = vmatprep.subr.mxu1 %v4799_v28  ;;  %10343 = vst [vmem:[#allocation10_spill] sm:$0xff] %v9136_v46  ;;  %v1824_v28 = vsel %vm1801_vm7, %v1791_v44, %v8923_v18  ;;  %v9158_v18 = vsel %vm10339_vm2, %v4542_v36, %v4543_v51  ;;  %v4776_v51 = vld [vmem:[%s10229_s5 + $0x8] sm:$0xff]  ;;  %v4775_v36 = vld [vmem:[%s10229_s5] sm:$0xff] }
 0x22b   : > { %1379 = vrot.lane.b32.xlu1 %v918_v30, %s10301_s15  ;;  %6561 = vmatpush3.msra.mxu1 %v4783_v45  ;;  %v4540_v30 = vrot.slane %v4455_v53, 1 }
 0x22c   : > { %v9056_v14 = vpop.permute.xlu0 %1081  ;;  %6562 = vmatprep.subr.mxu1 %v4798_v38  ;;  %v4506_v38 = vrot.slane %v9116_v8, 7 }
 0x22d   : > { %v9070_v31 = vpop.permute.xlu1 %1175  ;;  %6563 = vmatpush3.msra.mxu1 %v4782_v29  ;;  %v4793_v29 = vld [vmem:[%s10229_s5 + $0x90] sm:$0xff] }
 0x22e   : > { %1665 = vrot.lane.b32.xlu0 %v920_v13, %s10338_s30  ;;  %6564 = vmatprep.subr.mxu1 %v4797_v17  ;;  %v1857_v17 = vsel %vm1834_vm8, %v1824_v28, %v8982_v56  ;;  %v934_v56 = vsel %vm10347_vm12, %v931_v59, %v933_v50  ;;  %v9180_v40 = vsel %vm697_vm3, %v4505_v15, %v4506_v38  ;;  %vm10351_vm12 = vmmov %vm10339_vm2 }
 0x22f   : > { %1381 = vrot.lane.b32.xlu1 %v920_v13, %s10301_s15  ;;  %6565 = vmatpush3.msra.mxu1 %v4781_v33  ;;  %v2191_v13 = vadd.f32 %v9136_v46, %v6700_v19  ;;  %v1890_v7 = vsel %vm10346_vm13, %v1857_v17, %v9047_v57  ;;  %v4503_v19 = vrot.slane %v9090_v2, 7  ;;  %10348 = vst [vmem:[#allocation11_spill] sm:$0xff] %v9180_v40  ;;  %s10289_s15 = smov 96  }
 0x230   : > { %v9076_v39 = vpop.permute.xlu0 %1461  ;;  %6566 = vmatprep.subr.mxu1 %v4796_v12  ;;  %v2186_v12 = vadd.f32 %v9136_v46, %v2185_v25 }
 0x231   : > { %v1556_v9 = vpop.permute.xlu1 %1555  ;;  %6567 = vmatpush3.msra.mxu1 %v4780_v63 }
 0x232   : > { %1475 = vrot.lane.b32.xlu0 %v926_v26, %s10303_s23  ;;  %6568 = vmatprep.subr.mxu1 %v4795_v49  ;;  %v4807_v26 = vld [vmem:[%s10229_s5 + $0x100] sm:$0xff]  ;;  %v1923_v53 = vsel %vm1900_vm10, %v1890_v7, %v1556_v9  ;;  %v4545_v9 = vrot.slane %v9116_v8, 1 }
 0x233   : > { %1477 = vrot.lane.b32.xlu1 %v928_v48, %s10303_s23  ;;  %6569 = vmatpush3.msra.mxu1 %v4779_v34  ;;  %v2313_v48 = vmax.f32 %v2191_v13, 0.0  ;;  %v1726_v34 = vsel %vm471_vm0, %v10349_v58, %v8837_v27 }
 0x234   : > { %v9103_v43 = vpop.permute.xlu0 %1177  ;;  %6570 = vmatprep.subr.mxu1 %v4794_v60  ;;  %6790 = vmatprep.subr.mxu0 %v4807_v26  ;;  %v1759_v32 = vsel %vm1735_vm5, %v1726_v34, %v8891_v47 }
 0x235   : > { %v9139_v20 = vpop.permute.xlu1 %1271  ;;  %6571 = vmatpush3.msra.mxu1 %v4778_v54  ;;  %6791 = vmatpush3.msra.mxu0 %v4807_v26  ;;  %v1792_v27 = vsel %vm1768_vm6, %v1759_v32, %v8914_v35 }
 0x236   : > { %1571 = vrot.lane.b32.xlu0 %v9036_v42, %s10314_s22  ;;  %v932_v42 = vsel %vm10344_vm9, %v930_v3, %v931_v59  ;;  %vm10345_vm9 = vmmov %vm10339_vm2  ;;  %v4546_v3 = vrot.slane %v4461_v21, 1  ;;  %6572 = vmatprep.subr.mxu1 %v4793_v29  ;;  %v6898_v59 = vpack.i.bf16 %v9105_v52, %v9158_v18  ;;  %v1825_v47 = vsel %vm1801_vm7, %v1792_v27, %v8974_v37 }
 0x237   : > { %1573 = vrot.lane.b32.xlu1 %v9051_v11, %s10314_s22  ;;  %v4541_v33 = vsel %vm10345_vm9, %v4539_v4, %v4540_v30  ;;  %v4502_v11 = vrot.slane %v4456_v6, 7  ;;  %6573 = vmatpush3.msra.mxu1 %v4777_v24  ;;  %v2312_v4 = vmax.f32 %v2186_v12, 0.0  ;;  %v2720_v30 = vmul.f32 %v10328_v0, %v2313_v48  ;;  %vm10355_vm2 = vmmov %vm10346_vm13 }
 0x238   : > { %v9144_v45 = vpop.permute.xlu0 %1557  ;;  %6574 = vmatprep.subr.mxu1 %v4792_v62  ;;  %v6903_v5 = vpack.i.bf16 %v4541_v33, %v9180_v40  ;;  %v9216_v35 = vsel %vm10351_vm12, %v4545_v9, %v4546_v3  ;;  %v1858_v44 = vsel %vm1834_vm8, %v1825_v47, %v9034_v10  ;;  %vm10356_vm9 = vcmask 1041409  }
 0x239   : > { %v1652_v63 = vpop.permute.xlu1 %1651  ;;  %v9207_v1 = vsel %vm697_vm3, %v4502_v11, %v4503_v19  ;;  %6575 = vmatpush3.msra.mxu1 %v4776_v51  ;;  %10352 = vst [vmem:[#allocation13_spill] sm:$0xff] %v9216_v35  ;;  %v2719_v13 = vmul.f32 %v10328_v0, %v2312_v4  ;;  %v1891_v37 = vsel %vm10346_vm13, %v1858_v44, %v9076_v39  ;;  %v10353_v19 = vld [vmem:[#allocation14_spill] sm:$0xff]  ;;  %vm10357_vm12 = vcmask 1042434  }
 0x23a   : > { %1667 = vrot.lane.b32.xlu0 %v932_v42, %s10338_s30  ;;  %v1956_v57 = vsel %vm1933_vm4, %v1923_v53, %v1652_v63  ;;  %10350 = vst [vmem:[#allocation12_spill] sm:$0xff] %v9207_v1  ;;  %v6908_v54 = vpack.i.bf16 %v9207_v1, %v9116_v8  ;;  %6576 = vmatprep.subr.mxu1 %v4791_v16  ;;  %vm10359_vm13 = vcmask 1046534  }
 0x23b   : > { %1669 = vrot.lane.b32.xlu1 %v934_v56, %s10338_s30  ;;  %6719 = vmatprep.mubr.msk.f32.mxu0 %vm1978_vm11, %v1956_v57  ;;  %v2928_v25 = vcombine.high %v2720_v30, %v2720_v30  ;;  %v1924_v42 = vsel %vm1900_vm10, %v1891_v37, %v9144_v45  ;;  %v6913_v10 = vpack.i.bf16 %v9090_v2, %v9216_v35 }
 0x23c   : > { %v9175_v49 = vpop.permute.xlu0 %987  ;;  %6577 = vmatpush3.msra.mxu1 %v4775_v36  ;;  %v2935_v38 = vrot.slane %v2720_v30, %v10329_v22  ;;  %v2911_v39 = vcombine.high %v2719_v13, %v2719_v13  ;;  %v2918_v26 = vrot.slane %v2719_v13, %v10329_v22  ;;  %v1727_v3 = vsel %vm471_vm0, %v10353_v19, %v8949_v23 }
 0x23d   : > { %v9203_v60 = vpop.permute.xlu1 %1273  ;;  %v2942_v45 = vrot.slane %v2928_v25, %v10329_v22  ;;  %v1760_v9 = vsel %vm1735_vm5, %v1727_v3, %v9029_v41 }
 0x23e   : > { %6899 = vrot.lane.b32.xlu0 %v6898_v59, %s10338_s30  ;;  %v2943_v56 = vcombine.high %v2935_v38, %v2935_v38  ;;  %v6309_v11 = vrot.slane %v2935_v38, 9  ;;  %v2925_v48 = vrot.slane %v2911_v39, %v10329_v22  ;;  %v2926_v57 = vcombine.high %v2918_v26, %v2918_v26 }
 0x23f   : > { %6904 = vrot.lane.b32.xlu1 %v6903_v5, %s7167_s21  ;;  %v2944_v62 = vcombine.high %v2942_v45, %v2942_v45  ;;  %v6311_v4 = vrot.slane %v2942_v45, 9  ;;  %v6305_v27 = vrot.slane %v2918_v26, 9  ;;  %v1793_v41 = vsel %vm1768_vm6, %v1760_v9, %v9070_v31 }
 0x240   : > { %v9211_v50 = vpop.permute.xlu0 %1367  ;;  %v6310_v32 = vrot.slane %v2943_v56, 9  ;;  %v9256_v36 = vmax.f32 %v2935_v38, %v6309_v11  ;;  %v2927_v23 = vcombine.high %v2925_v48, %v2925_v48  ;;  %v6306_v44 = vrot.slane %v2926_v57, 9 }
 0x241   : > { %v1654_v6 = vpop.permute.xlu1 %1653  ;;  %v6307_v25 = vrot.slane %v2925_v48, 9  ;;  %v3869_v52 = vmax.f32 %v2942_v45, %v6311_v4 }
 0x242   : > { %6909 = vrot.lane.b32.xlu0 %v6908_v54, %s10289_s15  ;;  %v1957_v28 = vsel %vm1933_vm4, %v1924_v42, %v1654_v6  ;;  %v6312_v54 = vrot.slane %v2944_v62, 9  ;;  %v3868_v38 = vmax.f32 %v2943_v56, %v6310_v32  ;;  %v3864_v9 = vmax.f32 %v2926_v57, %v6306_v44 }
 0x243   : > { %v6703_v21 = vpop.f32.mrf.mxu0  ;;  %6720 = vmatmul.mubr.msk.f32.gmra.mxu0 %vm1978_vm11, %v1957_v28  ;;  %6914 = vrot.lane.b32.xlu1 %v6913_v10, %s10338_s30 }
 0x244   : > { %v9230_v15 = vpop.permute.xlu0 %989  ;;  %v2201_v29 = vadd.f32 %v9136_v46, %v6703_v21 }
 0x245   : > { %v9238_v17 = vpop.permute.xlu1 %1083  ;;  %v2195_v33 = vpop.f32.mrf.mxu0 }
 0x246   : > { %v2315_v24 = vmax.f32 %v2201_v29, 0.0  ;;  %v2196_v12 = vadd.f32 %v9136_v46, %v2195_v33  ;;  %v6308_v33 = vrot.slane %v2927_v23, 9 }
 0x248   : > { %v9241_v7 = vpop.permute.xlu0 %1369  ;;  %v2722_v53 = vmul.f32 %v10328_v0, %v2315_v24  ;;  %v2314_v63 = vmax.f32 %v2196_v12, 0.0  ;;  %v3863_v24 = vmax.f32 %v2918_v26, %v6305_v27  ;;  %v1826_v26 = vsel %vm1801_vm7, %v1793_v41, %v9139_v20 }
 0x249   : > { %v9248_v59 = vpop.permute.xlu1 %1463 }
 0x24a   : > { %v2962_v51 = vcombine.high %v2722_v53, %v2722_v53  ;;  %v2969_v58 = vrot.slane %v2722_v53, %v10329_v22  ;;  %v2721_v34 = vmul.f32 %v10328_v0, %v2314_v63 }
 0x24c   : > { %v9254_v16 = vpop.permute.xlu0 %1085  ;;  %v2976_v30 = vrot.slane %v2962_v51, %v10329_v22  ;;  %v2977_v5 = vcombine.high %v2969_v58, %v2969_v58  ;;  %v2945_v47 = vcombine.high %v2721_v34, %v2721_v34  ;;  %v2952_v13 = vrot.slane %v2721_v34, %v10329_v22 }
 0x24d   : > { %10354 = vst [vmem:[#allocation14_spill] sm:$0xff] %v9254_v16  ;;  %v9262_v37 = vpop.permute.xlu1 %1179  ;;  %v6317_v6 = vrot.slane %v2969_v58, 9  ;;  %v3865_v51 = vmax.f32 %v2925_v48, %v6307_v25  ;;  %v3870_v48 = vmax.f32 %v2944_v62, %v6312_v54 }
 0x24e   : > { %v2978_v42 = vcombine.high %v2976_v30, %v2976_v30  ;;  %v6318_v10 = vrot.slane %v2977_v5, 9  ;;  %v2959_v21 = vrot.slane %v2945_v47, %v10329_v22  ;;  %v2960_v39 = vcombine.high %v2952_v13, %v2952_v13 }
 0x24f   : > { %v6313_v29 = vrot.slane %v2952_v13, 9  ;;  %v6319_v12 = vrot.slane %v2976_v30, 9  ;;  %v3875_v34 = vmax.f32 %v2969_v58, %v6317_v6  ;;  %v3866_v22 = vmax.f32 %v2927_v23, %v6308_v33 }
 0x250   : > { %v9264_v28 = vpop.permute.xlu0 %1465  ;;  %v6320_v11 = vrot.slane %v2978_v42, 9  ;;  %v2961_v31 = vcombine.high %v2959_v21, %v2959_v21  ;;  %v6314_v53 = vrot.slane %v2960_v39, 9  ;;  %v6315_v63 = vrot.slane %v2959_v21, 9 }
 0x251   : > { %v3871_v19 = vmax.f32 %v2952_v13, %v6313_v29  ;;  %v1560_v3 = vpop.permute.xlu1 %1559  ;;  %v3876_v1 = vmax.f32 %v2977_v5, %v6318_v10  ;;  %v3877_v27 = vmax.f32 %v2976_v30, %v6319_v12  ;;  %v1859_v58 = vsel %vm1834_vm8, %v1826_v26, %v9211_v50 }
 0x252   : > { %v6316_v56 = vrot.slane %v2961_v31, 9  ;;  %v3872_v32 = vmax.f32 %v2960_v39, %v6314_v53  ;;  %v3873_v47 = vmax.f32 %v2959_v21, %v6315_v63  ;;  %v3878_v0 = vmax.f32 %v2978_v42, %v6320_v11 }
 0x253   : > { %v3975_v35 = vmax.f32 %v3863_v24, %v3871_v19  ;;  %v3979_v5 = vmax.f32 %v9256_v36, %v3875_v34  ;;  %v3980_v44 = vmax.f32 %v3868_v38, %v3876_v1  ;;  %v3981_v30 = vmax.f32 %v3869_v52, %v3877_v27  ;;  %v10358_v52 = vld [vmem:[#allocation15_spill] sm:$0xff] }
 0x254   : > { %v9267_v2 = vpop.permute.xlu0 %1181  ;;  %v3874_v16 = vmax.f32 %v2961_v31, %v6316_v56  ;;  %v3976_v13 = vmax.f32 %v3864_v9, %v3872_v32  ;;  %v3977_v29 = vmax.f32 %v3865_v51, %v3873_v47  ;;  %v1892_v41 = vsel %vm10355_vm2, %v1859_v58, %v9248_v59  ;;  %v4464_v32 = vld [vmem:[#allocation3 + $0x58] sm:$0xff] }
 0x255   : > { %v9271_v57 = vpop.permute.xlu1 %1275  ;;  %v4184_v4 = vrot.slane %v3975_v35, %v8528_v55  ;;  %v3982_v42 = vmax.f32 %v3870_v48, %v3878_v0  ;;  %v1925_v36 = vsel %vm1900_vm10, %v1892_v41, %v1560_v3  ;;  %v1728_v59 = vsel %vm471_vm0, %v10358_v52, %v9012_v61 }
 0x256   : > { %v3978_v45 = vmax.f32 %v3866_v22, %v3874_v16  ;;  %v4188_v20 = vrot.slane %v3976_v13, %v8528_v55  ;;  %v4192_v23 = vrot.slane %v3977_v29, %v8528_v55  ;;  %v4200_v22 = vrot.slane %v3979_v5, %v8528_v55 }
 0x257   : > { %v4204_v0 = vrot.slane %v3980_v44, %v8528_v55  ;;  %v1761_v10 = vsel %vm1735_vm5, %v1728_v59, %v9056_v14  ;;  %v4208_v38 = vrot.slane %v3981_v30, %v8528_v55  ;;  %v4212_v33 = vrot.slane %v3982_v42, %v8528_v55  ;;  %v10363_v30 = vld [vmem:[#allocation16_spill] sm:$0xff] }
 0x258   : > { %v1562_v25 = vpop.permute.xlu0 %1561  ;;  %v4196_v62 = vrot.slane %v3978_v45, %v8528_v55  ;;  %v4394_v50 = vsel %vm10356_vm9, %v4188_v20, %v4184_v4  ;;  %v1794_v39 = vsel %vm1768_vm6, %v1761_v10, %v9103_v43  ;;  %vm10360_vm2 = vcmask 1047559  }
 0x259   : > { %v1656_v1 = vpop.permute.xlu1 %1655  ;;  %v4395_v35 = vsel %vm10357_vm12, %v4192_v23, %v4394_v50  ;;  %v1827_v12 = vsel %vm1801_vm7, %v1794_v39, %v9203_v60  ;;  %vm10361_vm9 = vcmask 195584   ;;  %v4462_v60 = vld [vmem:[#allocation3 + $0x48] sm:$0xff]  ;;  %v4549_v29 = vrot.slane %v4464_v32, 1  ;;  %v10367_v39 = vld [vmem:[#allocation17_spill] sm:$0xff] }
 0x25a   : > { %v1958_v16 = vsel %vm1933_vm4, %v1925_v36, %v1656_v1  ;;  %v4396_v6 = vsel %vm4377_vm14, %v4196_v62, %v4395_v35  ;;  %v1860_v53 = vsel %vm1834_vm8, %v1827_v12, %v9241_v7  ;;  %v4508_v7 = vrot.slane %v4462_v60, 7 }
 0x25b   : > { %6722 = vmatprep.mubr.msk.f32.mxu0 %vm1978_vm11, %v1958_v16  ;;  %v4397_v21 = vsel %vm4379_vm15, %v4200_v22, %v4396_v6  ;;  %v1893_v43 = vsel %vm10361_vm9, %v1860_v53, %v9264_v28  ;;  %vm10362_vm12 = vcmask 1046528   ;;  %v1729_v41 = vsel %vm471_vm0, %v10363_v30, %v9175_v49 }
 0x25c   : > { %v9287_v54 = vpop.permute.xlu0 %991  ;;  %v4398_v61 = vsel %vm4381_vm1, %v4204_v0, %v4397_v21  ;;  %v1926_v63 = vsel %vm1900_vm10, %v1893_v43, %v1562_v25  ;;  %v10365_v0 = vld [vmem:[#allocation18_spill] sm:$0xff] }
 0x25d   : > { %v1278_v24 = vpop.permute.xlu1 %1277  ;;  %v4399_v11 = vsel %vm10359_vm13, %v4208_v38, %v4398_v61  ;;  %vm10364_vm13 = vmmov %vm10361_vm9  ;;  %v1730_v6 = vsel %vm471_vm0, %v10365_v0, %v9230_v15 }
 0x25e   : > { %v4400_v14 = vsel %vm10360_vm2, %v4212_v33, %v4399_v11  ;;  %vm10368_vm2 = vmmov %vm10361_vm9 }
 0x25f   : > { %4447 = vst.msk [vmem:[#allocation3 + $0x50] sm:$0xff] %vm1933_vm4, %v4400_v14  ;;  %vm10372_vm9 = vmmov %vm10368_vm2 }
 0x260   : > { %v1372_v31 = vpop.permute.xlu0 %1371 }
 0x261   : > { %v1658_v19 = vpop.permute.xlu1 %1657 }
 0x262   : > { %v1959_v3 = vsel %vm1933_vm4, %v1926_v63, %v1658_v19 }
 0x263   : > { %6723 = vmatmul.mubr.msk.f32.gmra.mxu0 %vm1978_vm11, %v1959_v3  ;;  %v6706_v45 = vpop.f32.mrf.mxu0  ;;  %v10369_v3 = vld [vmem:[#allocation19_spill] sm:$0xff] }
 0x264   : > { %v9314_v9 = vpop.permute.xlu0 %993  ;;  %v2211_v62 = vadd.f32 %v9136_v46, %v6706_v45 }
 0x265   : > { %v9317_v51 = vpop.permute.xlu1 %1087  ;;  %v2205_v50 = vpop.f32.mrf.mxu0 }
 0x266   : > { %v9319_v56 = vld [vmem:[#allocation3 + $0x50] sm:$0xff]  ;;  %v2206_v49 = vadd.f32 %v9136_v46, %v2205_v50  ;;  %v2317_v16 = vmax.f32 %v2211_v62, 0.0 }
 0x267   : > { %v6923_v28 = vpack.i.bf16 %v9180_v40, %v9319_v56  ;;  %v4509_v47 = vrot.slane %v9319_v56, 7  ;;  %v4548_v13 = vrot.slane %v9319_v56, 1 }
 0x268   : > { %v1374_v34 = vpop.permute.xlu0 %1373  ;;  %v2316_v38 = vmax.f32 %v2206_v49, 0.0  ;;  %v2724_v33 = vmul.f32 %v10367_v39, %v2317_v16 }
 0x269   : > { %v1468_v26 = vpop.permute.xlu1 %1467  ;;  %6924 = vrot.lane.b32.xlu1 %v6923_v28, %s10289_s15  ;;  %v9329_v48 = vsel %vm697_vm3, %v4508_v7, %v4509_v47  ;;  %v9336_v25 = vsel %vm10362_vm12, %v4548_v13, %v4549_v29  ;;  %vm10373_vm12 = vcmask 1041409  }
 0x26a   : > { %v6918_v58 = vpack.i.bf16 %v9158_v18, %v9329_v48  ;;  %v6928_v4 = vpack.i.bf16 %v9116_v8, %v9336_v25  ;;  %v1762_v18 = vsel %vm1735_vm5, %v1729_v41, %v9238_v17  ;;  %v2723_v15 = vmul.f32 %v10367_v39, %v2316_v38  ;;  %v10370_v41 = vld [vmem:[#allocation20_spill] sm:$0xff] }
 0x26b   : > { %v1795_v42 = vsel %vm1768_vm6, %v1762_v18, %v9262_v37  ;;  %v2996_v53 = vcombine.high %v2724_v33, %v2724_v33  ;;  %v3003_v60 = vrot.slane %v2724_v33, %v10369_v3  ;;  %v1731_v18 = vsel %vm471_vm0, %v10370_v41, %v9287_v54 }
 0x26c   : > { %v9325_v27 = vpop.permute.xlu0 %1089  ;;  %6919 = vrot.lane.b32.xlu0 %v6918_v58, %s7167_s21  ;;  %v1828_v8 = vsel %vm1801_vm7, %v1795_v42, %v9271_v57  ;;  %v10366_v57 = vld [vmem:[#allocation14_spill] sm:$0xff]  ;;  %v2986_v28 = vrot.slane %v2723_v15, %v10369_v3 }
 0x26d   : > { %v9333_v5 = vpop.permute.xlu1 %1183  ;;  %v1861_v22 = vsel %vm1834_vm8, %v1828_v8, %v1372_v31  ;;  %v1763_v10 = vsel %vm1735_vm5, %v1730_v6, %v10366_v57  ;;  %v3010_v32 = vrot.slane %v2996_v53, %v10369_v3  ;;  %v6325_v45 = vrot.slane %v3003_v60, 9  ;;  %v10371_v42 = vld [vmem:[#allocation22_spill] sm:$0xff] }
 0x26e   : > { %v1894_v35 = vsel %vm10364_vm13, %v1861_v22, %v1468_v26  ;;  %v1796_v21 = vsel %vm1768_vm6, %v1763_v10, %v9267_v2  ;;  %v9402_v62 = vsel %vm471_vm0, %v10371_v42, %v9314_v9  ;;  %v2994_v8 = vcombine.high %v2986_v28, %v2986_v28 }
 0x26f   : > { %v1829_v12 = vsel %vm1801_vm7, %v1796_v21, %v1278_v24  ;;  %v2979_v24 = vcombine.high %v2723_v15, %v2723_v15  ;;  %v3012_v50 = vcombine.high %v3010_v32, %v3010_v32  ;;  %v1764_v22 = vsel %vm1735_vm5, %v1731_v18, %v9317_v51 }
 0x270   : > { %v1470_v44 = vpop.permute.xlu0 %1469  ;;  %6929 = vrot.lane.b32.xlu0 %v6928_v4, %s10338_s30  ;;  %v1862_v31 = vsel %vm1834_vm8, %v1829_v12, %v1374_v34  ;;  %v6321_v9 = vrot.slane %v2986_v28, 9  ;;  %v6322_v21 = vrot.slane %v2994_v8, 9  ;;  %v1797_v51 = vsel %vm1768_vm6, %v1764_v22, %v9333_v5 }
 0x271   : > { %v1564_v20 = vpop.permute.xlu1 %1563  ;;  %v1895_v14 = vsel %vm10368_vm2, %v1862_v31, %v1470_v44  ;;  %v3011_v44 = vcombine.high %v3003_v60, %v3003_v60  ;;  %v2993_v4 = vrot.slane %v2979_v24, %v10369_v3  ;;  %v6328_v38 = vrot.slane %v3012_v50, 9 }
 0x272   : > { %v1927_v17 = vsel %vm1900_vm10, %v1894_v35, %v1564_v20  ;;  %v3880_v41 = vmax.f32 %v2994_v8, %v6322_v21  ;;  %vm10374_vm13 = vcmask 1042434  }
 0x273   : > { %v6326_v54 = vrot.slane %v3011_v44, 9  ;;  %v2995_v0 = vcombine.high %v2993_v4, %v2993_v4  ;;  %v6323_v31 = vrot.slane %v2993_v4, 9 }
 0x274   : > { %v9341_v23 = vpop.permute.xlu0 %1185 }
 0x275   : > { %v9352_v36 = vpop.permute.xlu1 %1279  ;;  %v6324_v24 = vrot.slane %v2995_v0, 9  ;;  %v3881_v18 = vmax.f32 %v2993_v4, %v6323_v31  ;;  %v3886_v4 = vmax.f32 %v3012_v50, %v6328_v38 }
 0x278   : > { %v1566_v1 = vpop.permute.xlu0 %1565 }
 0x279   : > { %v1660_v52 = vpop.permute.xlu1 %1659  ;;  %v1928_v43 = vsel %vm1900_vm10, %v1895_v14, %v1566_v1 }
 0x27a   : > { %v1960_v37 = vsel %vm1933_vm4, %v1927_v17, %v1660_v52  ;;  %v6327_v52 = vrot.slane %v3010_v32, 9 }
 0x27b   : > { %6725 = vmatprep.mubr.msk.f32.mxu0 %vm1978_vm11, %v1960_v37  ;;  %v9412_v37 = vmax.f32 %v3003_v60, %v6325_v45 }
 0x27c   : > { %v9361_v59 = vpop.permute.xlu0 %995  ;;  %v3885_v40 = vmax.f32 %v3010_v32, %v6327_v52 }
 0x27d   : > { %v9372_v61 = vpop.permute.xlu1 %1281 }
 0x280   : > { %v9375_v11 = vpop.permute.xlu0 %1375 }
 0x281   : > { %v1662_v63 = vpop.permute.xlu1 %1661 }
 0x282   : > { %v1961_v2 = vsel %vm1933_vm4, %v1928_v43, %v1662_v63  ;;  %v3884_v63 = vmax.f32 %v3011_v44, %v6326_v54 }
 0x283   : > { %v6709_v7 = vpop.f32.mrf.mxu0  ;;  %6726 = vmatmul.mubr.msk.f32.gmra.mxu0 %vm1978_vm11, %v1961_v2 }
 0x284   : > { %v9382_v19 = vpop.permute.xlu0 %997  ;;  %v2221_v34 = vadd.f32 %v9136_v46, %v6709_v7 }
 0x285   : > { %v9389_v47 = vpop.permute.xlu1 %1091  ;;  %v2215_v26 = vpop.f32.mrf.mxu0 }
 0x286   : > { %v2319_v13 = vmax.f32 %v2221_v34, 0.0  ;;  %v2216_v29 = vadd.f32 %v9136_v46, %v2215_v26  ;;  %v3879_v34 = vmax.f32 %v2986_v28, %v6321_v9  ;;  %v1830_v28 = vsel %vm1801_vm7, %v1797_v51, %v9352_v36 }
 0x288   : > { %v9392_v58 = vpop.permute.xlu0 %1377  ;;  %v2726_v20 = vmul.f32 %v10367_v39, %v2319_v13  ;;  %v2318_v30 = vmax.f32 %v2216_v29, 0.0 }
 0x289   : > { %v9404_v1 = vpop.permute.xlu1 %1471 }
 0x28a   : > { %v3030_v49 = vcombine.high %v2726_v20, %v2726_v20  ;;  %v3037_v35 = vrot.slane %v2726_v20, %v10369_v3  ;;  %v2725_v16 = vmul.f32 %v10367_v39, %v2318_v30 }
 0x28c   : > { %v9410_v17 = vpop.permute.xlu0 %1093  ;;  %v3044_v6 = vrot.slane %v3030_v49, %v10369_v3  ;;  %v3045_v57 = vcombine.high %v3037_v35, %v3037_v35  ;;  %v3013_v10 = vcombine.high %v2725_v16, %v2725_v16  ;;  %v3020_v33 = vrot.slane %v2725_v16, %v10369_v3 }
 0x28d   : > { %v9418_v12 = vpop.permute.xlu1 %1187  ;;  %v6333_v14 = vrot.slane %v3037_v35, 9 }
 0x28e   : > { %v3046_v15 = vcombine.high %v3044_v6, %v3044_v6  ;;  %v6334_v53 = vrot.slane %v3045_v57, 9  ;;  %v3027_v2 = vrot.slane %v3013_v10, %v10369_v3  ;;  %v3028_v60 = vcombine.high %v3020_v33, %v3020_v33 }
 0x28f   : > { %v6329_v7 = vrot.slane %v3020_v33, 9  ;;  %v6335_v26 = vrot.slane %v3044_v6, 9  ;;  %v3891_v42 = vmax.f32 %v3037_v35, %v6333_v14  ;;  %v3882_v3 = vmax.f32 %v2995_v0, %v6324_v24 }
 0x290   : > { %v9420_v43 = vpop.permute.xlu0 %1473  ;;  %v6336_v13 = vrot.slane %v3046_v15, 9  ;;  %v3029_v5 = vcombine.high %v3027_v2, %v3027_v2  ;;  %v6330_v29 = vrot.slane %v3028_v60, 9  ;;  %v6331_v45 = vrot.slane %v3027_v2, 9 }
 0x291   : > { %v3887_v20 = vmax.f32 %v3020_v33, %v6329_v7  ;;  %v1568_v30 = vpop.permute.xlu1 %1567  ;;  %v3892_v22 = vmax.f32 %v3045_v57, %v6334_v53  ;;  %v3893_v9 = vmax.f32 %v3044_v6, %v6335_v26  ;;  %v1863_v35 = vsel %vm1834_vm8, %v1830_v28, %v9375_v11  ;;  %v4467_v28 = vld [vmem:[#allocation3 + $0x70] sm:$0xff] }
 0x292   : > { %v6332_v44 = vrot.slane %v3029_v5, 9  ;;  %v3888_v16 = vmax.f32 %v3028_v60, %v6330_v29  ;;  %v3889_v54 = vmax.f32 %v3027_v2, %v6331_v45  ;;  %v3894_v39 = vmax.f32 %v3046_v15, %v6336_v13 }
 0x293   : > { %v3983_v10 = vmax.f32 %v3879_v34, %v3887_v20  ;;  %v3987_v57 = vmax.f32 %v9412_v37, %v3891_v42  ;;  %v3988_v21 = vmax.f32 %v3884_v63, %v3892_v22  ;;  %v1765_v0 = vsel %vm1735_vm5, %v9402_v62, %v9325_v27 }
 0x294   : > { %v9423_v49 = vpop.permute.xlu0 %1189  ;;  %v3890_v46 = vmax.f32 %v3029_v5, %v6332_v44  ;;  %v3984_v33 = vmax.f32 %v3880_v41, %v3888_v16  ;;  %v3985_v7 = vmax.f32 %v3881_v18, %v3889_v54  ;;  %v3989_v6 = vmax.f32 %v3885_v40, %v3893_v9  ;;  %v4465_v41 = vld [vmem:[#allocation3 + $0x60] sm:$0xff]  ;;  %v10378_v9 = vld [vmem:[#allocation24_spill] sm:$0xff] }
 0x295   : > { %v1284_v8 = vpop.permute.xlu1 %1283  ;;  %v4216_v32 = vrot.slane %v3983_v10, %v8528_v55  ;;  %v1896_v50 = vsel %vm10372_vm9, %v1863_v35, %v9404_v1  ;;  %v3990_v11 = vmax.f32 %v3886_v4, %v3894_v39  ;;  %v1798_v51 = vsel %vm1768_vm6, %v1765_v0, %v9341_v23  ;;  %v4453_v35 = vld [vmem:[#allocation3] sm:$0xff] }
 0x296   : > { %v3986_v14 = vmax.f32 %v3882_v3, %v3890_v46  ;;  %v4220_v52 = vrot.slane %v3984_v33, %v8528_v55  ;;  %v4224_v36 = vrot.slane %v3985_v7, %v8528_v55  ;;  %v1929_v46 = vsel %vm1900_vm10, %v1896_v50, %v1568_v30  ;;  %v10377_v30 = vld [vmem:[#allocation23_spill] sm:$0xff] }
 0x297   : > { %v4232_v15 = vrot.slane %v3987_v57, %v8528_v55  ;;  %v1831_v39 = vsel %vm1801_vm7, %v1798_v51, %v9372_v61  ;;  %v4236_v62 = vrot.slane %v3988_v21, %v8528_v55  ;;  %v4240_v63 = vrot.slane %v3989_v6, %v8528_v55 }
 0x298   : > { %v1570_v31 = vpop.permute.xlu0 %1569  ;;  %v4228_v37 = vrot.slane %v3986_v14, %v8528_v55  ;;  %v4401_v38 = vsel %vm10373_vm12, %v4220_v52, %v4216_v32  ;;  %v1864_v2 = vsel %vm1834_vm8, %v1831_v39, %v9392_v58  ;;  %v4244_v60 = vrot.slane %v3990_v11, %v8528_v55  ;;  %v10382_v11 = vld [vmem:[#allocation13_spill] sm:$0xff] }
 0x299   : > { %v1664_v3 = vpop.permute.xlu1 %1663  ;;  %v4402_v53 = vsel %vm10374_vm13, %v4224_v36, %v4401_v38  ;;  %v1897_v61 = vsel %vm10368_vm2, %v1864_v2, %v9420_v43  ;;  %vm10375_vm9 = vcmask 1046534   ;;  %vm10376_vm12 = vcmask 1047559   ;;  %vm10379_vm13 = vmmov %vm10368_vm2  ;;  %v10380_v36 = vld [vmem:[#allocation21_spill] sm:$0xff] }
 0x29a   : > { %v1962_v40 = vsel %vm1933_vm4, %v1929_v46, %v1664_v3  ;;  %v4403_v1 = vsel %vm4377_vm14, %v4228_v37, %v4402_v53  ;;  %v1930_v13 = vsel %vm1900_vm10, %v1897_v61, %v1570_v31  ;;  %v1733_v43 = vsel %vm471_vm0, %v10377_v30, %v9361_v59 }
 0x29b   : > { %6728 = vmatprep.mubr.msk.f32.mxu0 %vm1978_vm11, %v1962_v40  ;;  %v4404_v23 = vsel %vm4379_vm15, %v4232_v15, %v4403_v1  ;;  %v1766_v18 = vsel %vm1735_vm5, %v1733_v43, %v9389_v47  ;;  %v4511_v10 = vrot.slane %v4465_v41, 7  ;;  %v1734_v33 = vsel %vm471_vm0, %v10378_v9, %v9382_v19  ;;  %vm10381_vm0 = vmmov %vm10368_vm2 }
 0x29c   : > { %v1286_v27 = vpop.permute.xlu0 %1285  ;;  %v4405_v24 = vsel %vm4381_vm1, %v4236_v62, %v4404_v23  ;;  %v1799_v22 = vsel %vm1768_vm6, %v1766_v18, %v9418_v12  ;;  %v1767_v12 = vsel %vm1735_vm5, %v1734_v33, %v9410_v17  ;;  %v4552_v14 = vrot.slane %v4467_v28, 1  ;;  %v10387_v33 = vld [vmem:[#allocation19_spill] sm:$0xff]  ;;  %vm10391_vm2 = vmmov %vm10376_vm12 }
 0x29d   : > { %v1380_v34 = vpop.permute.xlu1 %1379  ;;  %v4406_v26 = vsel %vm10375_vm9, %v4240_v63, %v4405_v24  ;;  %v1832_v16 = vsel %vm1801_vm7, %v1799_v22, %v1284_v8  ;;  %v1800_v57 = vsel %vm1768_vm6, %v1767_v12, %v9423_v49  ;;  %v4500_v0 = vrot.slane %v10380_v36, 7 }
 0x29e   : > { %v4407_v29 = vsel %vm10376_vm12, %v4244_v60, %v4406_v26  ;;  %v1865_v59 = vsel %vm1834_vm8, %v1832_v16, %v1380_v34  ;;  %v1833_v32 = vsel %vm1801_vm7, %v1800_v57, %v1286_v27  ;;  %v4499_v49 = vrot.slane %v4453_v35, 7  ;;  %v10384_v26 = vld [vmem:[#allocation9_spill] sm:$0xff] }
 0x29f   : > { %4448 = vst.msk [vmem:[#allocation3 + $0x68] sm:$0xff] %vm1933_vm4, %v4407_v29  ;;  %vm10383_vm5 = vcmask 1046528   ;;  %vm4733_vm6 = vcmask 523264   ;;  %vm4742_vm7 = vcmask 785408  }
 0x2a0   : > { %v1666_v5 = vpop.permute.xlu0 %1665  ;;  %v4501_v53 = vsel %vm697_vm3, %v4499_v49, %v4500_v0 }
 0x2a1   : > { %v1963_v45 = vsel %vm1933_vm4, %v1930_v13, %v1666_v5  ;;  %v1382_v58 = vpop.permute.xlu1 %1381 }
 0x2a2   : > { %6729 = vmatmul.mubr.msk.f32.gmra.mxu0 %vm1978_vm11, %v1963_v45  ;;  %v1866_v6 = vsel %vm1834_vm8, %v1833_v32, %v1382_v58  ;;  %vm10388_vm8 = vcmask 1041409  }
 0x2a3   : > { %v6712_v27 = vpop.f32.mrf.mxu0  ;;  %vm10394_vm12 = vmmov %vm10388_vm8 }
 0x2a4   : > { %v1476_v20 = vpop.permute.xlu0 %1475 }
 0x2a5   : > { %v1478_v42 = vpop.permute.xlu1 %1477  ;;  %v1898_v8 = vsel %vm10379_vm13, %v1865_v59, %v1476_v20  ;;  %v2225_v5 = vpop.f32.mrf.mxu0  ;;  %v10385_v20 = vld [vmem:[#allocation10_spill] sm:$0xff] }
 0x2a6   : > { %v9473_v54 = vld [vmem:[#allocation3 + $0x68] sm:$0xff]  ;;  %v1899_v50 = vsel %vm10381_vm0, %v1866_v6, %v1478_v42  ;;  %v2231_v30 = vadd.f32 %v10385_v20, %v6712_v27  ;;  %v2226_v43 = vadd.f32 %v10385_v20, %v2225_v5  ;;  %v10386_v42 = vld [vmem:[#allocation17_spill] sm:$0xff] }
 0x2a7   : > { %v6938_v47 = vpack.i.bf16 %v9329_v48, %v9473_v54  ;;  %v4512_v7 = vrot.slane %v9473_v54, 7  ;;  %v4551_v31 = vrot.slane %v9473_v54, 1 }
 0x2a8   : > { %v1572_v44 = vpop.permute.xlu0 %1571  ;;  %v2321_v41 = vmax.f32 %v2231_v30, 0.0  ;;  %v2320_v18 = vmax.f32 %v2226_v43, 0.0 }
 0x2a9   : > { %v1574_v4 = vpop.permute.xlu1 %1573  ;;  %v1931_v21 = vsel %vm1900_vm10, %v1898_v8, %v1572_v44  ;;  %6939 = vrot.lane.b32.xlu0 %v6938_v47, %s10289_s15  ;;  %v9493_v17 = vsel %vm697_vm3, %v4511_v10, %v4512_v7  ;;  %v9503_v51 = vsel %vm10383_vm5, %v4551_v31, %v4552_v14 }
 0x2aa   : > { %v6933_v37 = vpack.i.bf16 %v10382_v11, %v9493_v17  ;;  %v1932_v46 = vsel %vm1900_vm10, %v1899_v50, %v1574_v4  ;;  %v6943_v39 = vpack.i.bf16 %v9319_v56, %v9503_v51  ;;  %v2728_v22 = vmul.f32 %v10386_v42, %v2321_v41 }
 0x2ab   : > { %v2727_v44 = vmul.f32 %v10386_v42, %v2320_v18  ;;  %vm10389_vm10 = vcmask 1042434  }
 0x2ac   : > { %v1668_v19 = vpop.permute.xlu0 %1667  ;;  %6934 = vrot.lane.b32.xlu1 %v6933_v37, %s7167_s21  ;;  %v3064_v16 = vcombine.high %v2728_v22, %v2728_v22  ;;  %v3071_v59 = vrot.slane %v2728_v22, %v10387_v33  ;;  %vm10395_vm13 = vmmov %vm10389_vm10 }
 0x2ad   : > { %v1964_v52 = vsel %vm1933_vm4, %v1931_v21, %v1668_v19  ;;  %v1670_v38 = vpop.permute.xlu1 %1669  ;;  %v3047_v28 = vcombine.high %v2727_v44, %v2727_v44  ;;  %v3054_v47 = vrot.slane %v2727_v44, %v10387_v33 }
 0x2ae   : > { %6731 = vmatprep.mubr.msk.f32.mxu0 %vm1978_vm11, %v1964_v52  ;;  %v1965_v15 = vsel %vm1933_vm4, %v1932_v46, %v1670_v38  ;;  %v3078_v4 = vrot.slane %v3064_v16, %v10387_v33  ;;  %v3079_v19 = vcombine.high %v3071_v59, %v3071_v59  ;;  %v6341_v0 = vrot.slane %v3071_v59, 9 }
 0x2af   : > { %6732 = vmatmul.mubr.msk.f32.gmra.mxu0 %vm1978_vm11, %v1965_v15  ;;  %v3061_v35 = vrot.slane %v3047_v28, %v10387_v33  ;;  %v3062_v31 = vcombine.high %v3054_v47, %v3054_v47  ;;  %v6337_v6 = vrot.slane %v3054_v47, 9  ;;  %vm10390_vm11 = vmmov %vm10375_vm9 }
 0x2b0   : > { %v6900_v3 = vpop.permute.xlu0 %6899  ;;  %6792 = vmatprep.mubr.msk.f32.mxu0 %vm1933_vm4, %v10382_v11  ;;  %6944 = vrot.lane.b32.xlu1 %v6943_v39, %s10338_s30  ;;  %v3080_v36 = vcombine.high %v3078_v4, %v3078_v4  ;;  %v6342_v38 = vrot.slane %v3079_v19, 9  ;;  %v6343_v46 = vrot.slane %v3078_v4, 9  ;;  %v3899_v22 = vmax.f32 %v3071_v59, %v6341_v0  ;;  %vm10393_vm9 = vmmov %vm10383_vm5 }
 0x2b1   : > { %v6902_v40 = vunpack.i.h.bf16 %v6900_v3  ;;  %v6905_v62 = vpop.permute.xlu1 %6904  ;;  %v6901_v1 = vunpack.i.l.bf16 %v6900_v3  ;;  %v3063_v49 = vcombine.high %v3061_v35, %v3061_v35  ;;  %v6338_v3 = vrot.slane %v3062_v31, 9  ;;  %vm10396_vm0 = vmmov %vm10390_vm11 }
 0x2b2   : > { %v6907_v63 = vunpack.i.h.bf16 %v6905_v62  ;;  %v6906_v60 = vunpack.i.l.bf16 %v6905_v62  ;;  %v6344_v62 = vrot.slane %v3080_v36, 9  ;;  %v3900_v44 = vmax.f32 %v3079_v19, %v6342_v38  ;;  %vm10397_vm5 = vmmov %vm10391_vm2 }
 0x2b3   : > { %v4725_v2 = vsel %vm1933_vm4, %v4501_v53, %v6902_v40  ;;  %6793 = vmatmul.mubr.msk.f32.vlgmr.msra.gmra.mxu0 %vm1933_vm4, %v9336_v25  ;;  %v4751_v13 = vsel %vm1933_vm4, %v10384_v26, %v6901_v1  ;;  %v6339_v53 = vrot.slane %v3061_v35, 9 }
 0x2b4   : > { %v6910_v23 = vpop.permute.xlu0 %6909  ;;  %v4734_v24 = vsel %vm4733_vm6, %v4725_v2, %v6907_v63  ;;  %6795 = vmatprep.mubr.msk.f32.mxu0 %vm1933_vm4, %v9503_v51  ;;  %v4759_v29 = vsel %vm4733_vm6, %v4751_v13, %v6906_v60  ;;  %v6340_v2 = vrot.slane %v3063_v49, 9  ;;  %v3895_v60 = vmax.f32 %v3054_v47, %v6337_v6 }
 0x2b5   : > { %v6912_v61 = vunpack.i.h.bf16 %v6910_v23  ;;  %v6911_v34 = vunpack.i.l.bf16 %v6910_v23 }
 0x2b6   : > { %v3898_v16 = vmax.f32 %v3063_v49, %v6340_v2  ;;  %v9557_v2 = vld [vmem:[#allocation3 + $0x38] sm:$0xff] }
 0x2b7   : > { %v4767_v45 = vsel %vm4742_vm7, %v4759_v29, %v6911_v34  ;;  %v4743_v58 = vsel %vm4742_vm7, %v4734_v24, %v6912_v61  ;;  %v3896_v29 = vmax.f32 %v3062_v31, %v6338_v3 }
 0x2b8   : > { %4898 = vmatprep.mubr.f32.mxu1 %v4767_v45  ;;  %v3897_v45 = vmax.f32 %v3061_v35, %v6339_v53 }
 0x2b9   : > { %4899 = vmatmul.mubr.f32.vlgmr.msra.gmra.mxu1 %v4743_v58 }
 0x2c3   : > { %v6715_v10 = vpop.f32.mrf.mxu0 }
 0x2c4   : > { %v2241_v9 = vadd.f32 %v10385_v20, %v6715_v10 }
 0x2c5   : > { %v2235_v7 = vpop.f32.mrf.mxu0 }
 0x2c6   : > { %v2323_v12 = vmax.f32 %v2241_v9, 0.0  ;;  %v2236_v8 = vadd.f32 %v10385_v20, %v2235_v7 }
 0x2c8   : > { %v2730_v57 = vmul.f32 %v10386_v42, %v2323_v12  ;;  %v2322_v21 = vmax.f32 %v2236_v8, 0.0  ;;  %v3901_v12 = vmax.f32 %v3078_v4, %v6343_v46  ;;  %v3902_v8 = vmax.f32 %v3080_v36, %v6344_v62 }
 0x2ca   : > { %v3098_v14 = vcombine.high %v2730_v57, %v2730_v57  ;;  %v3105_v32 = vrot.slane %v2730_v57, %v10387_v33  ;;  %v2729_v52 = vmul.f32 %v10386_v42, %v2322_v21 }
 0x2cc   : > { %v3112_v50 = vrot.slane %v3098_v14, %v10387_v33  ;;  %v3113_v11 = vcombine.high %v3105_v32, %v3105_v32  ;;  %v3081_v37 = vcombine.high %v2729_v52, %v2729_v52  ;;  %v3088_v15 = vrot.slane %v2729_v52, %v10387_v33 }
 0x2cd   : > { %v6349_v27 = vrot.slane %v3105_v32, 9 }
 0x2ce   : > { %v3114_v40 = vcombine.high %v3112_v50, %v3112_v50  ;;  %v6350_v39 = vrot.slane %v3113_v11, 9  ;;  %v3095_v1 = vrot.slane %v3081_v37, %v10387_v33  ;;  %v3096_v63 = vcombine.high %v3088_v15, %v3088_v15 }
 0x2cf   : > { %v6345_v23 = vrot.slane %v3088_v15, 9  ;;  %v6351_v24 = vrot.slane %v3112_v50, 9  ;;  %v3907_v58 = vmax.f32 %v3105_v32, %v6349_v27 }
 0x2d0   : > { %v6352_v61 = vrot.slane %v3114_v40, 9  ;;  %v3097_v34 = vcombine.high %v3095_v1, %v3095_v1  ;;  %v6346_v26 = vrot.slane %v3096_v63, 9  ;;  %v6347_v13 = vrot.slane %v3095_v1, 9 }
 0x2d1   : > { %v3903_v5 = vmax.f32 %v3088_v15, %v6345_v23  ;;  %v3908_v20 = vmax.f32 %v3113_v11, %v6350_v39  ;;  %v3909_v10 = vmax.f32 %v3112_v50, %v6351_v24  ;;  %v3995_v57 = vmax.f32 %v3899_v22, %v3907_v58  ;;  %v6915_v50 = vpop.permute.xlu1 %6914  ;;  %v10392_v24 = vld [vmem:[#allocation12_spill] sm:$0xff] }
 0x2d2   : > { %v6348_v30 = vrot.slane %v3097_v34, 9  ;;  %v3904_v43 = vmax.f32 %v3096_v63, %v6346_v26  ;;  %v3905_v41 = vmax.f32 %v3095_v1, %v6347_v13  ;;  %v3910_v28 = vmax.f32 %v3114_v40, %v6352_v61 }
 0x2d3   : > { %v3991_v18 = vmax.f32 %v3895_v60, %v3903_v5  ;;  %v3996_v21 = vmax.f32 %v3900_v44, %v3908_v20  ;;  %v3997_v52 = vmax.f32 %v3901_v12, %v3909_v10  ;;  %v4264_v6 = vrot.slane %v3995_v57, %v8528_v55  ;;  %v4468_v5 = vld [vmem:[#allocation3 + $0x78] sm:$0xff] }
 0x2d4   : > { %v3906_v9 = vmax.f32 %v3097_v34, %v6348_v30  ;;  %v3992_v47 = vmax.f32 %v3896_v29, %v3904_v43  ;;  %v3993_v7 = vmax.f32 %v3897_v45, %v3905_v41  ;;  %v3998_v59 = vmax.f32 %v3902_v8, %v3910_v28  ;;  %v4470_v34 = vld [vmem:[#allocation3 + $0x88] sm:$0xff] }
 0x2d5   : > { %v4248_v35 = vrot.slane %v3991_v18, %v8528_v55  ;;  %v4268_v36 = vrot.slane %v3996_v21, %v8528_v55  ;;  %v4272_v11 = vrot.slane %v3997_v52, %v8528_v55  ;;  %v6917_v15 = vunpack.i.h.bf16 %v6915_v50 }
 0x2d6   : > { %v3994_v31 = vmax.f32 %v3898_v16, %v3906_v9  ;;  %v4252_v14 = vrot.slane %v3992_v47, %v8528_v55  ;;  %v4256_v32 = vrot.slane %v3993_v7, %v8528_v55  ;;  %v4276_v38 = vrot.slane %v3998_v59, %v8528_v55  ;;  %v9591_v47 = vld [vmem:[%s10226_s2] ss:$0 sm:$0xff] }
 0x2d7   : > { %v6916_v53 = vunpack.i.l.bf16 %v6915_v50  ;;  %v4726_v61 = vsel %vm1933_vm4, %v10392_v24, %v6917_v15  ;;  %v4555_v58 = vrot.slane %v4470_v34, 1  ;;  %v4514_v30 = vrot.slane %v4468_v5, 7  ;;  %v5054_v34 = vld [vmem:[%s10231_s7 + $0x10] sm:$0xff] }
 0x2d8   : > { %v4260_v19 = vrot.slane %v3994_v31, %v8528_v55  ;;  %v4408_v0 = vsel %vm10388_vm8, %v4252_v14, %v4248_v35  ;;  %vm10399_vm8 = vmmov %vm10393_vm9 }
 0x2d9   : > { %v4409_v4 = vsel %vm10389_vm10, %v4256_v32, %v4408_v0  ;;  %v4752_v60 = vsel %vm1933_vm4, %v9557_v2, %v6916_v53  ;;  %vm10400_vm10 = vmmov %vm10394_vm12 }
 0x2da   : > { %v4410_v49 = vsel %vm4377_vm14, %v4260_v19, %v4409_v4 }
 0x2db   : > { %v4411_v37 = vsel %vm4379_vm15, %v4264_v6, %v4410_v49  ;;  %v6925_v27 = vpop.permute.xlu1 %6924 }
 0x2dc   : > { %v4412_v46 = vsel %vm4381_vm1, %v4268_v36, %v4411_v37  ;;  %v6927_v63 = vunpack.i.h.bf16 %v6925_v27  ;;  %v6926_v23 = vunpack.i.l.bf16 %v6925_v27 }
 0x2dd   : > { %v4413_v3 = vsel %vm10390_vm11, %v4272_v11, %v4412_v46  ;;  %vm10401_vm11 = vmmov %vm10395_vm13 }
 0x2de   : > { %v4414_v40 = vsel %vm10391_vm2, %v4276_v38, %v4413_v3  ;;  %v6920_v39 = vpop.permute.xlu0 %6919  ;;  %vm10402_vm2 = vmmov %vm10396_vm0 }
 0x2df   : > { %4449 = vst.msk [vmem:[#allocation3 + $0x80] sm:$0xff] %vm1933_vm4, %v4414_v40  ;;  %v6922_v62 = vunpack.i.h.bf16 %v6920_v39  ;;  %v6921_v1 = vunpack.i.l.bf16 %v6920_v39 }
 0x2e1   : > { %v4760_v26 = vsel %vm4733_vm6, %v4752_v60, %v6921_v1  ;;  %v4735_v13 = vsel %vm4733_vm6, %v4726_v61, %v6922_v62  ;;  %v5055_v61 = vld [vmem:[%s10231_s7 + $0x18] sm:$0xff] }
 0x2e2   : > { %v4768_v29 = vsel %vm4742_vm7, %v4760_v26, %v6926_v23  ;;  %v4744_v45 = vsel %vm4742_vm7, %v4735_v13, %v6927_v63  ;;  %6804 = vmatprep.subr.mxu0 %v5055_v61 }
 0x2e3   : > { %4903 = vmatprep.mubr.f32.mxu1 %v4768_v29  ;;  %v6718_v10 = vpop.f32.mrf.mxu0  ;;  %6805 = vmatpush3.msra.mxu0 %v5055_v61 }
 0x2e4   : > { %4904 = vmatmul.mubr.f32.gmra.mxu1 %v4744_v45  ;;  %v2251_v7 = vadd.f32 %v9591_v47, %v6718_v10  ;;  %6806 = vmatprep.subr.mxu0 %v5054_v34 }
 0x2e5   : > { %v2245_v9 = vpop.f32.mrf.mxu0  ;;  %6807 = vmatpush3.msra.mxu0 %v5054_v34  ;;  %v6930_v34 = vpop.permute.xlu0 %6929 }
 0x2e6   : > { %v9567_v20 = vld [vmem:[#allocation3 + $0x80] sm:$0xff]  ;;  %v2246_v12 = vadd.f32 %v9591_v47, %v2245_v9  ;;  %v2325_v8 = vmax.f32 %v2251_v7, 0.0 }
 0x2e7   : > { %v6953_v43 = vpack.i.bf16 %v9493_v17, %v9567_v20  ;;  %v4554_v41 = vrot.slane %v9567_v20, 1  ;;  %v4515_v18 = vrot.slane %v9567_v20, 7 }
 0x2e8   : > { %v2732_v57 = vmul.f32 %v10386_v42, %v2325_v8 }
 0x2e9   : > { %6954 = vrot.lane.b32.xlu1 %v6953_v43, %s10289_s15  ;;  %v9575_v22 = vsel %vm10393_vm9, %v4554_v41, %v4555_v58  ;;  %v9580_v44 = vsel %vm697_vm3, %v4514_v30, %v4515_v18  ;;  %vm10403_vm9 = vmmov %vm10397_vm5 }
 0x2ea   : > { %6796 = vmatmul.mubr.msk.f32.gmra.mxu0 %vm1933_vm4, %v9575_v22  ;;  %v6948_v16 = vpack.i.bf16 %v9336_v25, %v9580_v44  ;;  %v6958_v28 = vpack.i.bf16 %v9473_v54, %v9575_v22  ;;  %v2324_v25 = vmax.f32 %v2246_v12, 0.0  ;;  %v3132_v31 = vcombine.high %v2732_v57, %v2732_v57 }
 0x2eb   : > { %v3139_v52 = vrot.slane %v2732_v57, %v10387_v33 }
 0x2ec   : > { %6949 = vrot.lane.b32.xlu0 %v6948_v16, %s7167_s21  ;;  %v2731_v21 = vmul.f32 %v10386_v42, %v2324_v25  ;;  %v3146_v4 = vrot.slane %v3132_v31, %v10387_v33 }
 0x2ed   : > { %v3147_v11 = vcombine.high %v3139_v52, %v3139_v52  ;;  %v6357_v53 = vrot.slane %v3139_v52, 9 }
 0x2ee   : > { %v3115_v14 = vcombine.high %v2731_v21, %v2731_v21  ;;  %v3122_v59 = vrot.slane %v2731_v21, %v10387_v33  ;;  %v3148_v15 = vcombine.high %v3146_v4, %v3146_v4  ;;  %v6359_v23 = vrot.slane %v3146_v4, 9 }
 0x2ef   : > { %v6358_v63 = vrot.slane %v3147_v11, 9 }
 0x2f0   : > { %6959 = vrot.lane.b32.xlu0 %v6958_v28, %s10338_s30  ;;  %v3129_v36 = vrot.slane %v3115_v14, %v10387_v33  ;;  %v3130_v37 = vcombine.high %v3122_v59, %v3122_v59  ;;  %v6353_v40 = vrot.slane %v3122_v59, 9  ;;  %v6360_v45 = vrot.slane %v3148_v15, 9 }
 0x2f2   : > { %v3131_v27 = vcombine.high %v3129_v36, %v3129_v36  ;;  %v6354_v60 = vrot.slane %v3130_v37, 9  ;;  %v6355_v26 = vrot.slane %v3129_v36, 9  ;;  %v3911_v18 = vmax.f32 %v3122_v59, %v6353_v40 }
 0x2f3   : > { %v3917_v40 = vmax.f32 %v3146_v4, %v6359_v23  ;;  %v5053_v4 = vld [vmem:[%s10231_s7 + $0x8] sm:$0xff] }
 0x2f4   : > { %v6356_v41 = vrot.slane %v3131_v27, 9  ;;  %v3912_v8 = vmax.f32 %v3130_v37, %v6354_v60  ;;  %v3913_v25 = vmax.f32 %v3129_v36, %v6355_v26  ;;  %6808 = vmatprep.subr.mxu0 %v5053_v4 }
 0x2f5   : > { %6809 = vmatpush3.msra.mxu0 %v5053_v4 }
 0x303   : > { %v6721_v35 = vpop.f32.mrf.mxu0 }
 0x304   : > { %v2261_v32 = vadd.f32 %v9591_v47, %v6721_v35 }
 0x305   : > { %v2255_v19 = vpop.f32.mrf.mxu0 }
 0x306   : > { %v2327_v0 = vmax.f32 %v2261_v32, 0.0  ;;  %v2256_v6 = vadd.f32 %v9591_v47, %v2255_v19  ;;  %v3915_v19 = vmax.f32 %v3139_v52, %v6357_v53 }
 0x308   : > { %v2734_v49 = vmul.f32 %v10386_v42, %v2327_v0  ;;  %v2326_v50 = vmax.f32 %v2256_v6, 0.0  ;;  %v3916_v0 = vmax.f32 %v3147_v11, %v6358_v63  ;;  %v3914_v6 = vmax.f32 %v3131_v27, %v6356_v41 }
 0x30a   : > { %v3166_v38 = vcombine.high %v2734_v49, %v2734_v49  ;;  %v3173_v46 = vrot.slane %v2734_v49, %v10387_v33  ;;  %v2733_v3 = vmul.f32 %v10386_v42, %v2326_v50 }
 0x30c   : > { %v3180_v39 = vrot.slane %v3166_v38, %v10387_v33  ;;  %v3181_v62 = vcombine.high %v3173_v46, %v3173_v46  ;;  %v3149_v1 = vcombine.high %v2733_v3, %v2733_v3  ;;  %v3156_v24 = vrot.slane %v2733_v3, %v10387_v33 }
 0x30d   : > { %v6365_v5 = vrot.slane %v3173_v46, 9 }
 0x30e   : > { %v3182_v13 = vcombine.high %v3180_v39, %v3180_v39  ;;  %v6366_v29 = vrot.slane %v3181_v62, 9  ;;  %v3163_v58 = vrot.slane %v3149_v1, %v10387_v33  ;;  %v3164_v30 = vcombine.high %v3156_v24, %v3156_v24 }
 0x30f   : > { %v6361_v43 = vrot.slane %v3156_v24, 9  ;;  %v6367_v16 = vrot.slane %v3180_v39, 9  ;;  %v3923_v57 = vmax.f32 %v3173_v46, %v6365_v5  ;;  %v3918_v1 = vmax.f32 %v3148_v15, %v6360_v45 }
 0x310   : > { %v6368_v10 = vrot.slane %v3182_v13, 9  ;;  %v3165_v28 = vcombine.high %v3163_v58, %v3163_v58  ;;  %v6362_v9 = vrot.slane %v3164_v30, 9  ;;  %v6363_v7 = vrot.slane %v3163_v58, 9 }
 0x311   : > { %v3919_v12 = vmax.f32 %v3156_v24, %v6361_v43  ;;  %v3924_v21 = vmax.f32 %v3181_v62, %v6366_v29  ;;  %v3925_v59 = vmax.f32 %v3180_v39, %v6367_v16  ;;  %v4003_v24 = vmax.f32 %v3915_v19, %v3923_v57  ;;  %v5052_v39 = vld [vmem:[%s10231_s7] sm:$0xff] }
 0x312   : > { %v6364_v31 = vrot.slane %v3165_v28, 9  ;;  %v3920_v35 = vmax.f32 %v3164_v30, %v6362_v9  ;;  %v3921_v14 = vmax.f32 %v3163_v58, %v6363_v7  ;;  %v3926_v49 = vmax.f32 %v3182_v13, %v6368_v10  ;;  %6810 = vmatprep.subr.mxu0 %v5052_v39 }
 0x313   : > { %v3999_v32 = vmax.f32 %v3911_v18, %v3919_v12  ;;  %v4004_v61 = vmax.f32 %v3916_v0, %v3924_v21  ;;  %v4005_v60 = vmax.f32 %v3917_v40, %v3925_v59  ;;  %v4296_v15 = vrot.slane %v4003_v24, %v8528_v55  ;;  %6811 = vmatpush3.msra.mxu0 %v5052_v39  ;;  %v10398_v12 = vld [vmem:[#allocation11_spill] sm:$0xff] }
 0x314   : > { %v3922_v50 = vmax.f32 %v3165_v28, %v6364_v31  ;;  %v4000_v38 = vmax.f32 %v3912_v8, %v3920_v35  ;;  %v4001_v3 = vmax.f32 %v3913_v25, %v3921_v14  ;;  %v4006_v52 = vmax.f32 %v3918_v1, %v3926_v49  ;;  %v4473_v25 = vld [vmem:[#allocation3 + $0xa0] sm:$0xff]  ;;  %v4471_v31 = vld [vmem:[#allocation3 + $0x90] sm:$0xff] }
 0x315   : > { %v4280_v36 = vrot.slane %v3999_v32, %v8528_v55  ;;  %v4300_v63 = vrot.slane %v4004_v61, %v8528_v55  ;;  %v4304_v26 = vrot.slane %v4005_v60, %v8528_v55  ;;  %v6932_v58 = vunpack.i.h.bf16 %v6930_v34 }
 0x316   : > { %v4002_v37 = vmax.f32 %v3914_v6, %v3922_v50  ;;  %v4284_v46 = vrot.slane %v4000_v38, %v8528_v55  ;;  %v4288_v62 = vrot.slane %v4001_v3, %v8528_v55  ;;  %v4308_v5 = vrot.slane %v4006_v52, %v8528_v55 }
 0x317   : > { %v6931_v30 = vunpack.i.l.bf16 %v6930_v34  ;;  %v4727_v8 = vsel %vm1933_vm4, %v10398_v12, %v6932_v58  ;;  %v4558_v32 = vrot.slane %v4473_v25, 1  ;;  %v4517_v0 = vrot.slane %v4471_v31, 7 }
 0x318   : > { %v4292_v11 = vrot.slane %v4002_v37, %v8528_v55  ;;  %v4415_v53 = vsel %vm10394_vm12, %v4284_v46, %v4280_v36  ;;  %vm10404_vm12 = vmmov %vm10399_vm8 }
 0x319   : > { %v4416_v27 = vsel %vm10395_vm13, %v4288_v62, %v4415_v53  ;;  %v4753_v7 = vsel %vm1933_vm4, %v9319_v56, %v6931_v30  ;;  %vm10405_vm13 = vmmov %vm10400_vm10 }
 0x31a   : > { %v4417_v23 = vsel %vm4377_vm14, %v4292_v11, %v4416_v27 }
 0x31b   : > { %v4418_v13 = vsel %vm4379_vm15, %v4296_v15, %v4417_v23  ;;  %v6940_v41 = vpop.permute.xlu0 %6939 }
 0x31c   : > { %v4419_v29 = vsel %vm4381_vm1, %v4300_v63, %v4418_v13  ;;  %v6942_v28 = vunpack.i.h.bf16 %v6940_v41  ;;  %v6941_v9 = vunpack.i.l.bf16 %v6940_v41 }
 0x31d   : > { %v4420_v45 = vsel %vm10396_vm0, %v4304_v26, %v4419_v29  ;;  %vm10406_vm0 = vmmov %vm10401_vm11 }
 0x31e   : > { %v4421_v43 = vsel %vm10397_vm5, %v4308_v5, %v4420_v45  ;;  %v6935_v18 = vpop.permute.xlu1 %6934  ;;  %vm10407_vm5 = vmmov %vm10402_vm2 }
 0x31f   : > { %4450 = vst.msk [vmem:[#allocation3 + $0x98] sm:$0xff] %vm1933_vm4, %v4421_v43  ;;  %v6937_v16 = vunpack.i.h.bf16 %v6935_v18  ;;  %v6936_v10 = vunpack.i.l.bf16 %v6935_v18 }
 0x321   : > { %v4761_v57 = vsel %vm4733_vm6, %v4753_v7, %v6936_v10  ;;  %v4736_v21 = vsel %vm4733_vm6, %v4727_v8, %v6937_v16 }
 0x322   : > { %v4769_v35 = vsel %vm4742_vm7, %v4761_v57, %v6941_v9  ;;  %v4745_v14 = vsel %vm4742_vm7, %v4736_v21, %v6942_v28 }
 0x323   : > { %4908 = vmatprep.mubr.f32.mxu1 %v4769_v35  ;;  %v6724_v3 = vpop.f32.mrf.mxu0 }
 0x324   : > { %4909 = vmatmul.mubr.f32.gmra.mxu1 %v4745_v14  ;;  %v2271_v24 = vadd.f32 %v9591_v47, %v6724_v3 }
 0x325   : > { %v2265_v1 = vpop.f32.mrf.mxu0 }
 0x326   : > { %v9645_v19 = vld [vmem:[#allocation3 + $0x98] sm:$0xff]  ;;  %v2266_v61 = vadd.f32 %v9591_v47, %v2265_v1  ;;  %v2329_v37 = vmax.f32 %v2271_v24, 0.0 }
 0x327   : > { %v6968_v56 = vpack.i.bf16 %v9580_v44, %v9645_v19  ;;  %v4557_v6 = vrot.slane %v9645_v19, 1  ;;  %v4518_v59 = vrot.slane %v9645_v19, 7 }
 0x328   : > { %v2328_v36 = vmax.f32 %v2266_v61, 0.0  ;;  %v2736_v46 = vmul.f32 %v10386_v42, %v2329_v37 }
 0x329   : > { %6969 = vrot.lane.b32.xlu0 %v6968_v56, %s10289_s15  ;;  %v9653_v49 = vsel %vm10399_vm8, %v4557_v6, %v4558_v32  ;;  %v9658_v50 = vsel %vm697_vm3, %v4517_v0, %v4518_v59  ;;  %vm10408_vm8 = vmmov %vm10403_vm9 }
 0x32a   : > { %6798 = vmatprep.mubr.msk.f32.mxu0 %vm1933_vm4, %v9653_v49  ;;  %v6963_v38 = vpack.i.bf16 %v9503_v51, %v9658_v50  ;;  %v6973_v40 = vpack.i.bf16 %v9567_v20, %v9653_v49  ;;  %v2735_v62 = vmul.f32 %v10386_v42, %v2328_v36  ;;  %v3200_v51 = vcombine.high %v2736_v46, %v2736_v46 }
 0x32b   : > { %v3207_v53 = vrot.slane %v2736_v46, %v10387_v33 }
 0x32c   : > { %6964 = vrot.lane.b32.xlu1 %v6963_v38, %s7167_s21  ;;  %v3183_v52 = vcombine.high %v2735_v62, %v2735_v62  ;;  %v3190_v4 = vrot.slane %v2735_v62, %v10387_v33  ;;  %v3214_v63 = vrot.slane %v3200_v51, %v10387_v33 }
 0x32d   : > { %v3215_v13 = vcombine.high %v3207_v53, %v3207_v53  ;;  %v6373_v43 = vrot.slane %v3207_v53, 9 }
 0x32e   : > { %v3197_v23 = vrot.slane %v3183_v52, %v10387_v33  ;;  %v3198_v5 = vcombine.high %v3190_v4, %v3190_v4  ;;  %v3216_v30 = vcombine.high %v3214_v63, %v3214_v63  ;;  %v6369_v41 = vrot.slane %v3190_v4, 9 }
 0x32f   : > { %v6374_v9 = vrot.slane %v3215_v13, 9  ;;  %v6375_v7 = vrot.slane %v3214_v63, 9 }
 0x330   : > { %6974 = vrot.lane.b32.xlu1 %v6973_v40, %s10338_s30  ;;  %v3199_v18 = vcombine.high %v3197_v23, %v3197_v23  ;;  %v6370_v12 = vrot.slane %v3198_v5, 9  ;;  %v6371_v25 = vrot.slane %v3197_v23, 9  ;;  %v6376_v35 = vrot.slane %v3216_v30, 9 }
 0x331   : > { %v3927_v6 = vmax.f32 %v3190_v4, %v6369_v41 }
 0x332   : > { %v6372_v56 = vrot.slane %v3199_v18, 9  ;;  %v3928_v61 = vmax.f32 %v3198_v5, %v6370_v12  ;;  %v3929_v37 = vmax.f32 %v3197_v23, %v6371_v25  ;;  %v3934_v41 = vmax.f32 %v3216_v30, %v6376_v35 }
 0x343   : > { %v6727_v60 = vpop.f32.mrf.mxu0 }
 0x344   : > { %v2281_v11 = vadd.f32 %v9591_v47, %v6727_v60 }
 0x345   : > { %v2275_v15 = vpop.f32.mrf.mxu0 }
 0x346   : > { %v2331_v27 = vmax.f32 %v2281_v11, 0.0  ;;  %v2276_v39 = vadd.f32 %v9591_v47, %v2275_v15  ;;  %v3931_v11 = vmax.f32 %v3207_v53, %v6373_v43  ;;  %v3932_v15 = vmax.f32 %v3215_v13, %v6374_v9  ;;  %v6945_v9 = vpop.permute.xlu1 %6944 }
 0x347   : > { %v6947_v35 = vunpack.i.h.bf16 %v6945_v9 }
 0x348   : > { %v2738_v34 = vmul.f32 %v10386_v42, %v2331_v27  ;;  %v2330_v26 = vmax.f32 %v2276_v39, 0.0  ;;  %v3930_v27 = vmax.f32 %v3199_v18, %v6372_v56 }
 0x34a   : > { %v3234_v29 = vcombine.high %v2738_v34, %v2738_v34  ;;  %v3241_v45 = vrot.slane %v2738_v34, %v10387_v33  ;;  %v2737_v58 = vmul.f32 %v10386_v42, %v2330_v26 }
 0x34c   : > { %v3248_v16 = vrot.slane %v3234_v29, %v10387_v33  ;;  %v3249_v10 = vcombine.high %v3241_v45, %v3241_v45  ;;  %v3217_v28 = vcombine.high %v2737_v58, %v2737_v58  ;;  %v3224_v8 = vrot.slane %v2737_v58, %v10387_v33 }
 0x34d   : > { %v6381_v21 = vrot.slane %v3241_v45, 9  ;;  %v3933_v58 = vmax.f32 %v3214_v63, %v6375_v7 }
 0x34e   : > { %v3250_v57 = vcombine.high %v3248_v16, %v3248_v16  ;;  %v6382_v31 = vrot.slane %v3249_v10, 9  ;;  %v3231_v14 = vrot.slane %v3217_v28, %v10387_v33  ;;  %v3232_v32 = vcombine.high %v3224_v8, %v3224_v8 }
 0x34f   : > { %v6377_v0 = vrot.slane %v3224_v8, 9  ;;  %v6383_v59 = vrot.slane %v3248_v16, 9  ;;  %v3939_v36 = vmax.f32 %v3241_v45, %v6381_v21 }
 0x350   : > { %v6384_v38 = vrot.slane %v3250_v57, 9  ;;  %v3233_v3 = vcombine.high %v3231_v14, %v3231_v14  ;;  %v6378_v40 = vrot.slane %v3232_v32, 9  ;;  %v6379_v1 = vrot.slane %v3231_v14, 9 }
 0x351   : > { %v3935_v24 = vmax.f32 %v3224_v8, %v6377_v0  ;;  %v3940_v46 = vmax.f32 %v3249_v10, %v6382_v31  ;;  %v3941_v39 = vmax.f32 %v3248_v16, %v6383_v59  ;;  %v4011_v28 = vmax.f32 %v3931_v11, %v3939_v36 }
 0x352   : > { %v6380_v62 = vrot.slane %v3233_v3, 9  ;;  %v3936_v51 = vmax.f32 %v3232_v32, %v6378_v40  ;;  %v3937_v60 = vmax.f32 %v3231_v14, %v6379_v1  ;;  %v3942_v34 = vmax.f32 %v3250_v57, %v6384_v38 }
 0x353   : > { %v4007_v52 = vmax.f32 %v3927_v6, %v3935_v24  ;;  %v4012_v8 = vmax.f32 %v3932_v15, %v3940_v46  ;;  %v4013_v12 = vmax.f32 %v3933_v58, %v3941_v39  ;;  %v4328_v18 = vrot.slane %v4011_v28, %v8528_v55 }
 0x354   : > { %v3938_v4 = vmax.f32 %v3233_v3, %v6380_v62  ;;  %v4008_v26 = vmax.f32 %v3928_v61, %v3936_v51  ;;  %v4009_v29 = vmax.f32 %v3929_v37, %v3937_v60  ;;  %v4014_v53 = vmax.f32 %v3934_v41, %v3942_v34  ;;  %v4476_v37 = vld [vmem:[#allocation3 + $0xb8] sm:$0xff]  ;;  %v4474_v51 = vld [vmem:[#allocation3 + $0xa8] sm:$0xff] }
 0x355   : > { %v4312_v23 = vrot.slane %v4007_v52, %v8528_v55  ;;  %v4332_v30 = vrot.slane %v4012_v8, %v8528_v55  ;;  %v4336_v7 = vrot.slane %v4013_v12, %v8528_v55  ;;  %v6946_v14 = vunpack.i.l.bf16 %v6945_v9 }
 0x356   : > { %v4010_v5 = vmax.f32 %v3930_v27, %v3938_v4  ;;  %v4316_v45 = vrot.slane %v4008_v26, %v8528_v55  ;;  %v4320_v10 = vrot.slane %v4009_v29, %v8528_v55  ;;  %v4340_v57 = vrot.slane %v4014_v53, %v8528_v55 }
 0x357   : > { %v4754_v24 = vsel %vm1933_vm4, %v9473_v54, %v6946_v14  ;;  %v4728_v61 = vsel %vm1933_vm4, %v9329_v48, %v6947_v35  ;;  %v4561_v15 = vrot.slane %v4476_v37, 1  ;;  %v4520_v48 = vrot.slane %v4474_v51, 7 }
 0x358   : > { %v4324_v13 = vrot.slane %v4010_v5, %v8528_v55  ;;  %v4422_v43 = vsel %vm10400_vm10, %v4316_v45, %v4312_v23 }
 0x359   : > { %v4423_v63 = vsel %vm10401_vm11, %v4320_v10, %v4422_v43  ;;  %vm5541_vm11 = vcmask 257024  }
 0x35a   : > { %v4424_v16 = vsel %vm4377_vm14, %v4324_v13, %v4423_v63 }
 0x35b   : > { %v4425_v25 = vsel %vm4379_vm15, %v4328_v18, %v4424_v16  ;;  %v6955_v0 = vpop.permute.xlu1 %6954 }
 0x35c   : > { %v4426_v21 = vsel %vm4381_vm1, %v4332_v30, %v4425_v25  ;;  %v6957_v40 = vunpack.i.h.bf16 %v6955_v0  ;;  %v6956_v1 = vunpack.i.l.bf16 %v6955_v0 }
 0x35d   : > { %v4427_v31 = vsel %vm10402_vm2, %v4336_v7, %v4426_v21  ;;  %vm10411_vm2 = vmmov %vm10405_vm13 }
 0x35e   : > { %v4428_v32 = vsel %vm10403_vm9, %v4340_v57, %v4427_v31  ;;  %v6950_v6 = vpop.permute.xlu0 %6949  ;;  %vm10412_vm9 = vmmov %vm10406_vm0 }
 0x35f   : > { %4451 = vst.msk [vmem:[#allocation3 + $0xb0] sm:$0xff] %vm1933_vm4, %v4428_v32  ;;  %v6952_v59 = vunpack.i.h.bf16 %v6950_v6  ;;  %v6951_v38 = vunpack.i.l.bf16 %v6950_v6 }
 0x361   : > { %v4762_v46 = vsel %vm4733_vm6, %v4754_v24, %v6951_v38  ;;  %v4737_v62 = vsel %vm4733_vm6, %v4728_v61, %v6952_v59 }
 0x362   : > { %v6730_v56 = vpop.f32.mrf.mxu0  ;;  %v4770_v52 = vsel %vm4742_vm7, %v4762_v46, %v6956_v1  ;;  %v4746_v11 = vsel %vm4742_vm7, %v4737_v62, %v6957_v40 }
 0x363   : > { %v2291_v36 = vadd.f32 %v9591_v47, %v6730_v56  ;;  %4913 = vmatprep.mubr.f32.mxu1 %v4770_v52 }
 0x364   : > { %v2285_v3 = vpop.f32.mrf.mxu0  ;;  %4914 = vmatmul.mubr.f32.gmra.mxu1 %v4746_v11 }
 0x365   : > { %v2286_v60 = vadd.f32 %v9591_v47, %v2285_v3  ;;  %v2333_v27 = vmax.f32 %v2291_v36, 0.0 }
 0x366   : > { %v9708_v54 = vld [vmem:[#allocation3 + $0xb0] sm:$0xff] }
 0x367   : > { %v6983_v39 = vpack.i.bf16 %v9658_v50, %v9708_v54  ;;  %v4560_v34 = vrot.slane %v9708_v54, 1  ;;  %v4521_v4 = vrot.slane %v9708_v54, 7  ;;  %v2332_v26 = vmax.f32 %v2286_v60, 0.0 }
 0x368   : > { %v2740_v58 = vmul.f32 %v10386_v42, %v2333_v27 }
 0x369   : > { %6984 = vrot.lane.b32.xlu1 %v6983_v39, %s10289_s15  ;;  %v9716_v29 = vsel %vm10404_vm12, %v4560_v34, %v4561_v15  ;;  %v9722_v41 = vsel %vm697_vm3, %v4520_v48, %v4521_v4  ;;  %v2739_v28 = vmul.f32 %v10386_v42, %v2332_v26 }
 0x36a   : > { %6799 = vmatmul.mubr.msk.f32.gmra.mxu0 %vm1933_vm4, %v9716_v29  ;;  %v6978_v8 = vpack.i.bf16 %v9575_v22, %v9722_v41  ;;  %v3268_v5 = vcombine.high %v2740_v58, %v2740_v58  ;;  %v3275_v12 = vrot.slane %v2740_v58, %v10387_v33  ;;  %v6988_v43 = vpack.i.bf16 %v9645_v19, %v9716_v29 }
 0x36b   : > { %v3251_v45 = vcombine.high %v2739_v28, %v2739_v28  ;;  %v3258_v53 = vrot.slane %v2739_v28, %v10387_v33 }
 0x36c   : > { %6979 = vrot.lane.b32.xlu0 %v6978_v8, %s7167_s21  ;;  %v3282_v22 = vrot.slane %v3268_v5, %v10387_v33  ;;  %v3283_v7 = vcombine.high %v3275_v12, %v3275_v12  ;;  %v6389_v14 = vrot.slane %v3275_v12, 9 }
 0x36d   : > { %v3265_v30 = vrot.slane %v3251_v45, %v10387_v33  ;;  %v3266_v25 = vcombine.high %v3258_v53, %v3258_v53  ;;  %v6385_v32 = vrot.slane %v3258_v53, 9 }
 0x36e   : > { %v3284_v35 = vcombine.high %v3282_v22, %v3282_v22  ;;  %v6390_v59 = vrot.slane %v3283_v7, 9  ;;  %v6391_v38 = vrot.slane %v3282_v22, 9  ;;  %v3947_v45 = vmax.f32 %v3275_v12, %v6389_v14 }
 0x36f   : > { %v6733_v23 = vpop.f32.mrf.mxu0  ;;  %v6386_v3 = vrot.slane %v3266_v25, 9  ;;  %v6387_v1 = vrot.slane %v3265_v30, 9  ;;  %v3943_v60 = vmax.f32 %v3258_v53, %v6385_v32 }
 0x370   : > { %v2301_v10 = vadd.f32 %v9591_v47, %v6733_v23  ;;  %6989 = vrot.lane.b32.xlu0 %v6988_v43, %s10338_s30  ;;  %v6392_v36 = vrot.slane %v3284_v35, 9 }
 0x371   : > { %v2295_v13 = vpop.f32.mrf.mxu0  ;;  %v3944_v34 = vmax.f32 %v3266_v25, %v6386_v3  ;;  %v3945_v4 = vmax.f32 %v3265_v30, %v6387_v1 }
 0x372   : > { %v2335_v18 = vmax.f32 %v2301_v10, 0.0  ;;  %v2296_v63 = vadd.f32 %v9591_v47, %v2295_v13  ;;  %v3267_v47 = vcombine.high %v3265_v30, %v3265_v30  ;;  %v3948_v10 = vmax.f32 %v3283_v7, %v6390_v59 }
 0x374   : > { %v2742_v16 = vmul.f32 %v10386_v42, %v2335_v18  ;;  %v2334_v9 = vmax.f32 %v2296_v63, 0.0  ;;  %v6388_v51 = vrot.slane %v3267_v47, 9 }
 0x376   : > { %v3302_v57 = vcombine.high %v2742_v16, %v2742_v16  ;;  %v3309_v21 = vrot.slane %v2742_v16, %v10387_v33  ;;  %v2741_v31 = vmul.f32 %v10386_v42, %v2334_v9  ;;  %v3946_v13 = vmax.f32 %v3267_v47, %v6388_v51 }
 0x377   : > { %v3949_v9 = vmax.f32 %v3282_v22, %v6391_v38 }
 0x378   : > { %v3316_v0 = vrot.slane %v3302_v57, %v10387_v33  ;;  %v3317_v56 = vcombine.high %v3309_v21, %v3309_v21  ;;  %v3285_v6 = vcombine.high %v2741_v31, %v2741_v31  ;;  %v3292_v40 = vrot.slane %v2741_v31, %v10387_v33 }
 0x379   : > { %v6397_v61 = vrot.slane %v3309_v21, 9  ;;  %v3950_v57 = vmax.f32 %v3284_v35, %v6392_v36  ;;  %v4482_v36 = vld [vmem:[#allocation3 + $0xe8] sm:$0xff] }
 0x37a   : > { %v3318_v24 = vcombine.high %v3316_v0, %v3316_v0  ;;  %v6398_v37 = vrot.slane %v3317_v56, 9  ;;  %v3299_v42 = vrot.slane %v3285_v6, %v10387_v33  ;;  %v3300_v46 = vcombine.high %v3292_v40, %v3292_v40 }
 0x37b   : > { %v6393_v62 = vrot.slane %v3292_v40, 9  ;;  %v6399_v52 = vrot.slane %v3316_v0, 9  ;;  %v3955_v26 = vmax.f32 %v3309_v21, %v6397_v61  ;;  %v4480_v61 = vld [vmem:[#allocation3 + $0xd8] sm:$0xff] }
 0x37c   : > { %v6400_v11 = vrot.slane %v3318_v24, 9  ;;  %v3301_v15 = vcombine.high %v3299_v42, %v3299_v42  ;;  %v6394_v48 = vrot.slane %v3300_v46, 9  ;;  %v6395_v27 = vrot.slane %v3299_v42, 9 }
 0x37d   : > { %v3951_v39 = vmax.f32 %v3292_v40, %v6393_v62  ;;  %v3956_v58 = vmax.f32 %v3317_v56, %v6398_v37  ;;  %v3957_v43 = vmax.f32 %v3316_v0, %v6399_v52  ;;  %v4019_v31 = vmax.f32 %v3947_v45, %v3955_v26  ;;  %v4481_v37 = vld [vmem:[#allocation3 + $0xe0] sm:$0xff]  ;;  %v6960_v45 = vpop.permute.xlu0 %6959 }
 0x37e   : > { %v6396_v28 = vrot.slane %v3301_v15, 9  ;;  %v3952_v8 = vmax.f32 %v3300_v46, %v6394_v48  ;;  %v3953_v5 = vmax.f32 %v3299_v42, %v6395_v27  ;;  %v3958_v18 = vmax.f32 %v3318_v24, %v6400_v11  ;;  %v4479_v42 = vld [vmem:[#allocation3 + $0xd0] sm:$0xff]  ;;  %v4477_v46 = vld [vmem:[#allocation3 + $0xc0] sm:$0xff] }
 0x37f   : > { %v4015_v23 = vmax.f32 %v3943_v60, %v3951_v39  ;;  %v4020_v32 = vmax.f32 %v3948_v10, %v3956_v58  ;;  %v4021_v6 = vmax.f32 %v3949_v9, %v3957_v43  ;;  %v4360_v47 = vrot.slane %v4019_v31, %v8528_v55 }
 0x380   : > { %v3954_v53 = vmax.f32 %v3301_v15, %v6396_v28  ;;  %v4016_v63 = vmax.f32 %v3944_v34, %v3952_v8  ;;  %v4017_v16 = vmax.f32 %v3945_v4, %v3953_v5  ;;  %v4022_v12 = vmax.f32 %v3950_v57, %v3958_v18 }
 0x381   : > { %v4344_v30 = vrot.slane %v4015_v23, %v8528_v55  ;;  %v4364_v35 = vrot.slane %v4020_v32, %v8528_v55  ;;  %v4368_v59 = vrot.slane %v4021_v6, %v8528_v55  ;;  %v4574_v62 = vrot.slane %v4480_v61, 7  ;;  %v7092_v23 = vld [vmem:[#allocation3 + $0x20] sm:$0xff] }
 0x382   : > { %v4018_v25 = vmax.f32 %v3946_v13, %v3954_v53  ;;  %v4348_v21 = vrot.slane %v4016_v63, %v8528_v55  ;;  %v4352_v56 = vrot.slane %v4017_v16, %v8528_v55  ;;  %v4372_v3 = vrot.slane %v4022_v12, %v8528_v55  ;;  %v7094_v63 = vld [vmem:[#allocation3 + $0x68] sm:$0xff] }
 0x383   : > { %v4575_v51 = vrot.slane %v4481_v37, 7  ;;  %v4578_v60 = vrot.slane %v4481_v37, 1  ;;  %v4579_v52 = vrot.slane %v4482_v36, 1  ;;  %v4570_v11 = vrot.slane %v4479_v42, 1 }
 0x384   : > { %v4356_v7 = vrot.slane %v4018_v25, %v8528_v55  ;;  %v4429_v14 = vsel %vm10405_vm13, %v4348_v21, %v4344_v30  ;;  %v4565_v15 = vrot.slane %v4477_v46, 7  ;;  %v6961_v13 = vunpack.i.l.bf16 %v6960_v45  ;;  %vm10414_vm13 = vmmov %vm10406_vm0 }
 0x385   : > { %v4430_v22 = vsel %vm10406_vm0, %v4352_v56, %v4429_v14  ;;  %v4576_v4 = vsel %vm697_vm3, %v4574_v62, %v4575_v51  ;;  %vm10415_vm0 = vmmov %vm10411_vm2 }
 0x386   : > { %v4431_v0 = vsel %vm4377_vm14, %v4356_v7, %v4430_v22  ;;  %v7008_v5 = vpack.i.bf16 %v9716_v29, %v4576_v4  ;;  %v6962_v29 = vunpack.i.h.bf16 %v6960_v45  ;;  %v4755_v31 = vsel %vm1933_vm4, %v9567_v20, %v6961_v13 }
 0x387   : > { %v4432_v38 = vsel %vm4379_vm15, %v4360_v47, %v4431_v0 }
 0x388   : > { %v4433_v40 = vsel %vm4381_vm1, %v4364_v35, %v4432_v38  ;;  %vm10409_vm1 = vmmov %vm10404_vm12  ;;  %v4729_v32 = vsel %vm1933_vm4, %v9493_v17, %v6962_v29 }
 0x389   : > { %v4434_v1 = vsel %vm10407_vm5, %v4368_v59, %v4433_v40  ;;  %v4580_v26 = vsel %vm10409_vm1, %v4578_v60, %v4579_v52  ;;  %vm10410_vm10 = vmmov %vm10409_vm1  ;;  %vm5705_vm1 = vcmask 1046532  }
 0x38a   : > { %v4435_v24 = vsel %vm10408_vm8, %v4372_v3, %v4434_v1  ;;  %vm10413_vm12 = vmmov %vm10411_vm2  ;;  %vm5704_vm8 = vcmask 1042432  }
 0x38b   : > { %4452 = vst.msk [vmem:[#allocation3 + $0xc8] sm:$0xff] %vm1933_vm4, %v4435_v24  ;;  %vm10416_vm5 = vmmov %vm10412_vm9 }
 0x392   : > { %v9759_v48 = vld [vmem:[#allocation3 + $0xc8] sm:$0xff] }
 0x393   : > { %v6998_v27 = vpack.i.bf16 %v9722_v41, %v9759_v48  ;;  %v4569_v39 = vrot.slane %v9759_v48, 1  ;;  %v4566_v34 = vrot.slane %v9759_v48, 7 }
 0x395   : > { %6999 = vrot.lane.b32.xlu0 %v6998_v27, %s10289_s15  ;;  %v4571_v58 = vsel %vm10410_vm10, %v4569_v39, %v4570_v11  ;;  %v4567_v28 = vsel %vm697_vm3, %v4565_v15, %v4566_v34  ;;  %vm9998_vm10 = vmor %vm5704_vm8, %vm5705_vm1 }
 0x396   : > { %6801 = vmatprep.mubr.msk.f32.mxu0 %vm1933_vm4, %v4571_v58  ;;  %v6993_v8 = vpack.i.bf16 %v9653_v49, %v4567_v28  ;;  %v7003_v10 = vpack.i.bf16 %v9708_v54, %v4571_v58  ;;  %v7093_v49 = vld [vmem:[#allocation3 + $0x50] sm:$0xff]  ;;  %v7013_v18 = vpack.i.bf16 %v4567_v28, %v4481_v37 }
 0x397   : > { %6802 = vmatmul.mubr.msk.f32.gmra.mxu0 %vm1933_vm4, %v4580_v26 }
 0x398   : > { %6994 = vrot.lane.b32.xlu1 %v6993_v8, %s7167_s21  ;;  %6812 = vmatprep.mubr.msk.f32.mxu0 %vm1933_vm4, %v7092_v23 }
 0x399   : > { %7009 = vrot.lane.b32.xlu0 %v7008_v5, %s7167_s21 }
 0x39b   : > { %6813 = vmatmul.mubr.msk.f32.vlgmr.msra.gmra.mxu0 %vm1933_vm4, %v9557_v2  ;;  %v6970_v43 = vpop.permute.xlu0 %6969 }
 0x39c   : > { %7004 = vrot.lane.b32.xlu1 %v7003_v10, %s10338_s30  ;;  %6815 = vmatprep.mubr.msk.f32.mxu0 %vm1933_vm4, %v7093_v49  ;;  %v6972_v2 = vunpack.i.h.bf16 %v6970_v43  ;;  %v6971_v57 = vunpack.i.l.bf16 %v6970_v43 }
 0x39e   : > { %v6965_v53 = vpop.permute.xlu1 %6964 }
 0x39f   : > { %6816 = vmatmul.mubr.msk.f32.gmra.mxu0 %vm1933_vm4, %v7094_v63  ;;  %v6967_v16 = vunpack.i.h.bf16 %v6965_v53  ;;  %v6966_v9 = vunpack.i.l.bf16 %v6965_v53 }
 0x3a0   : > { %7014 = vrot.lane.b32.xlu1 %v7013_v18, %s10289_s15  ;;  %6818 = vmatprep.mubr.msk.f32.mxu0 %vm1933_vm4, %v9567_v20  ;;  %s10421_s15 = smov 96  }
 0x3a1   : > { %v4763_v25 = vsel %vm4733_vm6, %v4755_v31, %v6966_v9  ;;  %v4738_v30 = vsel %vm4733_vm6, %v4729_v32, %v6967_v16 }
 0x3a2   : > { %v4771_v21 = vsel %vm4742_vm7, %v4763_v25, %v6971_v57  ;;  %v4747_v56 = vsel %vm4742_vm7, %v4738_v30, %v6972_v2  ;;  %v6975_v17 = vpop.permute.xlu1 %6974 }
 0x3a3   : > { %6819 = vmatmul.mubr.msk.f32.gmra.mxu0 %vm1933_vm4, %v9645_v19  ;;  %4918 = vmatprep.mubr.f32.mxu1 %v4771_v21  ;;  %v6977_v20 = vunpack.i.h.bf16 %v6975_v17  ;;  %v6976_v6 = vunpack.i.l.bf16 %v6975_v17 }
 0x3a4   : > { %6821 = vmatprep.mubr.msk.f32.mxu0 %vm1933_vm4, %v9708_v54  ;;  %4919 = vmatmul.mubr.f32.gmra.mxu1 %v4747_v56 }
 0x3a5   : > { %v4756_v0 = vsel %vm1933_vm4, %v9645_v19, %v6976_v6  ;;  %v4730_v59 = vsel %vm1933_vm4, %v9580_v44, %v6977_v20 }
 0x3a7   : > { %6822 = vmatmul.mubr.msk.f32.gmra.mxu0 %vm1933_vm4, %v9759_v48 }
 0x3db   : > { %v6985_v12 = vpop.permute.xlu1 %6984 }
 0x3dc   : > { %v6987_v22 = vunpack.i.h.bf16 %v6985_v12  ;;  %v6986_v35 = vunpack.i.l.bf16 %v6985_v12 }
 0x3de   : > { %v6980_v7 = vpop.permute.xlu0 %6979 }
 0x3df   : > { %v6982_v14 = vunpack.i.h.bf16 %v6980_v7  ;;  %v6981_v47 = vunpack.i.l.bf16 %v6980_v7 }
 0x3e1   : > { %v4764_v38 = vsel %vm4733_vm6, %v4756_v0, %v6981_v47  ;;  %v4739_v3 = vsel %vm4733_vm6, %v4730_v59, %v6982_v14 }
 0x3e2   : > { %v4772_v40 = vsel %vm4742_vm7, %v4764_v38, %v6986_v35  ;;  %v4748_v1 = vsel %vm4742_vm7, %v4739_v3, %v6987_v22  ;;  %v6990_v24 = vpop.permute.xlu0 %6989 }
 0x3e3   : > { %4923 = vmatprep.mubr.f32.mxu1 %v4772_v40  ;;  %v6992_v61 = vunpack.i.h.bf16 %v6990_v24  ;;  %v6991_v37 = vunpack.i.l.bf16 %v6990_v24 }
 0x3e4   : > { %4924 = vmatmul.mubr.f32.gmra.mxu1 %v4748_v1 }
 0x3e5   : > { %v4757_v44 = vsel %vm1933_vm4, %v9708_v54, %v6991_v37  ;;  %v4731_v60 = vsel %vm1933_vm4, %v9658_v50, %v6992_v61  ;;  %v5849_v37 = vld [vmem:[%s10233_s9 + $0x118] sm:$0xff] }
 0x3e6   : > { %6824 = vmatprep.subr.mxu0 %v5849_v37 }
 0x3e7   : > { %6825 = vmatpush3.msra.mxu0 %v5849_v37 }
 0x407   : > { %v7000_v36 = vpop.permute.xlu0 %6999 }
 0x408   : > { %v7002_v62 = vunpack.i.h.bf16 %v7000_v36  ;;  %v7001_v51 = vunpack.i.l.bf16 %v7000_v36  ;;  %v5848_v36 = vld [vmem:[%s10233_s9 + $0x110] sm:$0xff] }
 0x409   : > { %6826 = vmatprep.subr.mxu0 %v5848_v36 }
 0x40a   : > { %v6995_v42 = vpop.permute.xlu1 %6994  ;;  %6827 = vmatpush3.msra.mxu0 %v5848_v36 }
 0x40b   : > { %v6997_v46 = vunpack.i.h.bf16 %v6995_v42  ;;  %v6996_v19 = vunpack.i.l.bf16 %v6995_v42  ;;  %v7010_v34 = vpop.permute.xlu0 %7009  ;;  %v6578_v42 = vpop.f32.mrf.mxu1 }
 0x40c   : > { %v7012_v58 = vunpack.i.h.bf16 %v7010_v34  ;;  %v7011_v28 = vunpack.i.l.bf16 %v7010_v34 }
 0x40d   : > { %v4765_v52 = vsel %vm4733_vm6, %v4757_v44, %v6996_v19  ;;  %v4740_v11 = vsel %vm4733_vm6, %v4731_v60, %v6997_v46  ;;  %v5847_v19 = vld [vmem:[%s10233_s9 + $0x108] sm:$0xff]  ;;  %v6579_v44 = vpop.f32.mrf.mxu1 }
 0x40e   : > { %v7005_v15 = vpop.permute.xlu1 %7004  ;;  %v4773_v27 = vsel %vm4742_vm7, %v4765_v52, %v7001_v51  ;;  %v4749_v39 = vsel %vm4742_vm7, %v4740_v11, %v7002_v62  ;;  %v5846_v51 = vld [vmem:[%s10233_s9 + $0x100] sm:$0xff]  ;;  %6828 = vmatprep.subr.mxu0 %v5847_v19 }
 0x40f   : > { %v7007_v4 = vunpack.i.h.bf16 %v7005_v15  ;;  %v7006_v26 = vunpack.i.l.bf16 %v7005_v15  ;;  %4928 = vmatprep.mubr.f32.mxu1 %v4773_v27  ;;  %6829 = vmatpush3.msra.mxu0 %v5847_v19  ;;  %v5199_v52 = vld [vmem:[%s10232_s8] sm:$0x1]  ;;  %v6581_v11 = vpop.f32.mrf.mxu1 }
 0x410   : > { %4929 = vmatmul.mubr.f32.gmra.mxu1 %v4749_v39  ;;  %6830 = vmatprep.subr.mxu0 %v5846_v51 }
 0x411   : > { %v4758_v54 = vsel %vm1933_vm4, %v9759_v48, %v7006_v26  ;;  %v4732_v50 = vsel %vm1933_vm4, %v9722_v41, %v7007_v4  ;;  %v9824_v48 = vpop.f32.mrf.mxu0  ;;  %6831 = vmatpush3.msra.mxu0 %v5846_v51  ;;  %v6582_v39 = vpop.f32.mrf.mxu1 }
 0x412   : > { %v7015_v8 = vpop.permute.xlu1 %7014  ;;  %v4766_v45 = vsel %vm4733_vm6, %v4758_v54, %v7011_v28  ;;  %v4741_v10 = vsel %vm4733_vm6, %v4732_v50, %v7012_v58  ;;  %v5845_v50 = vld [vmem:[%s10233_s9 + $0xf8] sm:$0xff]  ;;  %v5844_v28 = vld [vmem:[%s10233_s9 + $0xf0] sm:$0xff] }
 0x413   : > { %v7017_v5 = vunpack.i.h.bf16 %v7015_v8  ;;  %v7016_v23 = vunpack.i.l.bf16 %v7015_v8  ;;  %v9826_v13 = vpop.f32.mrf.mxu0  ;;  %v6584_v4 = vpop.f32.mrf.mxu1  ;;  %v5829_v58 = vld [vmem:[%s10233_s9 + $0x78] sm:$0xff]  ;;  %6626 = vmatprep.subr.mxu1 %v5845_v50  ;;  %v5828_v8 = vld [vmem:[%s10233_s9 + $0x70] sm:$0xff] }
 0x414   : > { %6627 = vmatpush3.msra.mxu1 %v5829_v58 }
 0x415   : > { %v4774_v49 = vsel %vm4742_vm7, %v4766_v45, %v7016_v23  ;;  %v4750_v29 = vsel %vm4742_vm7, %v4741_v10, %v7017_v5  ;;  %v9828_v41 = vpop.f32.mrf.mxu0  ;;  %v6585_v26 = vpop.f32.mrf.mxu1  ;;  %v5843_v5 = vld [vmem:[%s10233_s9 + $0xe8] sm:$0xff]  ;;  %6628 = vmatprep.subr.mxu1 %v5844_v28  ;;  %v5842_v10 = vld [vmem:[%s10233_s9 + $0xe0] sm:$0xff] }
 0x416   : > { %4933 = vmatprep.mubr.f32.mxu1 %v4774_v49  ;;  %v5827_v45 = vld [vmem:[%s10233_s9 + $0x68] sm:$0xff]  ;;  %6629 = vmatpush3.msra.mxu1 %v5828_v8 }
 0x417   : > { %4934 = vmatmul.mubr.f32.gmra.mxu1 %v4750_v29  ;;  %v9830_v43 = vpop.f32.mrf.mxu0  ;;  %6630 = vmatprep.subr.mxu1 %v5843_v5  ;;  %v5826_v29 = vld [vmem:[%s10233_s9 + $0x60] sm:$0xff] }
 0x418   : > { %6631 = vmatpush3.msra.mxu1 %v5827_v45 }
 0x419   : > { %6632 = vmatprep.subr.mxu1 %v5842_v10 }
 0x41a   : > { %6633 = vmatpush3.msra.mxu1 %v5826_v29 }
 0x424   : > { %v6587_v54 = vpop.f32.mrf.mxu1 }
 0x426   : > { %v6588_v23 = vpop.f32.mrf.mxu1 }
 0x42a   : > { %v9832_v18 = vpop.f32.mrf.mxu0 }
 0x42c   : > { %v9834_v53 = vpop.f32.mrf.mxu0 }
 0x457   : > { %v9836_v63 = vpop.f32.mrf.mxu0 }
 0x459   : > { %v9838_v16 = vpop.f32.mrf.mxu0 }
 0x45b   : > { %v6814_v9 = vpop.f32.mrf.mxu0 }
 0x45c   : > { %v5178_v32 = vsel %vm1933_vm4, %v6814_v9, 0.0 }
 0x45d   : > { %v5138_v2 = vpop.f32.mrf.mxu0 }
 0x45e   : > { %v5177_v57 = vsel %vm1933_vm4, %v5138_v2, 0.0  ;;  %v5841_v2 = vld [vmem:[%s10233_s9 + $0xd8] sm:$0xff] }
 0x45f   : > { %v6817_v31 = vpop.f32.mrf.mxu0  ;;  %v5179_v25 = vadd.f32 %v5178_v32, %v5177_v57  ;;  %v5840_v32 = vld [vmem:[%s10233_s9 + $0xd0] sm:$0xff]  ;;  %6634 = vmatprep.subr.mxu1 %v5841_v2 }
 0x460   : > { %v5182_v20 = vsel %vm1933_vm4, %v6817_v31, 0.0  ;;  %v5825_v31 = vld [vmem:[%s10233_s9 + $0x58] sm:$0xff] }
 0x461   : > { %v5148_v30 = vpop.f32.mrf.mxu0  ;;  %6635 = vmatpush3.msra.mxu1 %v5825_v31 }
 0x462   : > { %v5180_v21 = vsel %vm1933_vm4, %v5148_v30, 0.0  ;;  %v5824_v30 = vld [vmem:[%s10233_s9 + $0x50] sm:$0xff]  ;;  %6636 = vmatprep.subr.mxu1 %v5840_v32 }
 0x463   : > { %v5181_v56 = vadd.f32 %v5180_v21, %v5179_v25  ;;  %v6820_v17 = vpop.f32.mrf.mxu0  ;;  %v6580_v21 = vadd.f32 %v6579_v44, %v6578_v42  ;;  %6637 = vmatpush3.msra.mxu1 %v5824_v30 }
 0x464   : > { %v5186_v22 = vsel %vm1933_vm4, %v6820_v17, 0.0  ;;  %v6590_v49 = vpop.f32.mrf.mxu1  ;;  %v9905_v17 = vld [vmem:[%s10230_s6] ss:$0 sm:$0xff] }
 0x465   : > { %v5158_v6 = vpop.f32.mrf.mxu0  ;;  %v5183_v12 = vadd.f32 %v5182_v20, %v5181_v56  ;;  %v5839_v56 = vld [vmem:[%s10233_s9 + $0xc8] sm:$0xff]  ;;  %v6583_v20 = vadd.f32 %v6582_v39, %v6581_v11 }
 0x466   : > { %v5184_v7 = vsel %vm1933_vm4, %v5158_v6, 0.0  ;;  %v6591_v25 = vpop.f32.mrf.mxu1  ;;  %v6586_v6 = vadd.f32 %v6585_v26, %v6584_v4  ;;  %6638 = vmatprep.subr.mxu1 %v5839_v56 }
 0x467   : > { %v5185_v14 = vadd.f32 %v5184_v7, %v5183_v12  ;;  %v6823_v47 = vpop.f32.mrf.mxu0  ;;  %v6589_v12 = vadd.f32 %v6588_v23, %v6587_v54  ;;  %v5823_v7 = vld [vmem:[%s10233_s9 + $0x48] sm:$0xff] }
 0x468   : > { %v5190_v3 = vsel %vm1933_vm4, %v6823_v47, 0.0  ;;  %v5838_v47 = vld [vmem:[%s10233_s9 + $0xc0] sm:$0xff]  ;;  %6639 = vmatpush3.msra.mxu1 %v5823_v7 }
 0x469   : > { %v5168_v35 = vpop.f32.mrf.mxu0  ;;  %v5187_v0 = vadd.f32 %v5186_v22, %v5185_v14  ;;  %v6592_v14 = vadd.f32 %v6591_v25, %v6590_v49  ;;  %v4901_v22 = vadd.f32 %v6580_v21, %v9905_v17  ;;  %6640 = vmatprep.subr.mxu1 %v5838_v47 }
 0x46a   : > { %v5188_v59 = vsel %vm1933_vm4, %v5168_v35, 0.0  ;;  %v4906_v35 = vadd.f32 %v6583_v20, %v9905_v17 }
 0x46b   : > { %v5189_v38 = vadd.f32 %v5188_v59, %v5187_v0  ;;  %v4911_v0 = vadd.f32 %v6586_v6, %v9905_v17  ;;  %v4916_v59 = vadd.f32 %v6589_v12, %v9905_v17 }
 0x46d   : > { %v5191_v40 = vadd.f32 %v5190_v3, %v5189_v38  ;;  %v4921_v38 = vadd.f32 %v6592_v14, %v9905_v17  ;;  %v5006_v3 = vadd.f32 %v9826_v13, %v4901_v22 }
 0x46f   : > { %v5192_v1 = vrot.slane %v5191_v40, 4  ;;  %v5044_v36 = vmax.f32 %v5006_v3, 0.0 }
 0x471   : > { %v5193_v24 = vadd.f32 %v5192_v1, %v5191_v40  ;;  %v5011_v40 = vadd.f32 %v9824_v48, %v4906_v35  ;;  %v5016_v1 = vadd.f32 %v9830_v43, %v4911_v0 }
 0x473   : > { %v5194_v61 = vrot.slane %v5193_v24, 2  ;;  %v5045_v42 = vmax.f32 %v5011_v40, 0.0 }
 0x475   : > { %v5195_v46 = vadd.f32 %v5194_v61, %v5193_v24  ;;  %v5021_v24 = vadd.f32 %v9828_v41, %v4916_v59  ;;  %v5026_v61 = vadd.f32 %v9834_v53, %v4921_v38 }
 0x477   : > { %v5196_v62 = vrot.slane %v5195_v46, 1  ;;  %v5047_v19 = vmax.f32 %v5021_v24, 0.0  ;;  %v5048_v51 = vmax.f32 %v5026_v61, 0.0 }
 0x479   : > { %v5197_v60 = vadd.f32 %v5196_v62, %v5195_v46  ;;  %v5046_v46 = vmax.f32 %v5016_v1, 0.0 }
 0x47b   : > { %v5198_v15 = vmul.f32 0.015625, %v5197_v60 }
 0x47d   : > { %v5200_v27 = vadd.f32 %v5199_v52, %v5198_v15 }
 0x47f   : > { %v6418_v34 = vmul.f32 -1.442695, %v5200_v27 }
 0x481   : > { %7067 = vpow2.f32 %v6418_v34 }
 0x48e   : > { %v7068_v9 = vpop.eup %7067 }
 0x48f   : > { %v5204_v57 = vadd.f32 1.0, %v7068_v9 }
 0x491   : > { %7069 = vrcp.f32 %v5204_v57 }
 0x49e   : > { %v7070_v37 = vpop.eup %7069 }
 0x49f   : > { %v9924_v62 = vrot.slane %v7070_v37, %v8528_v55 }
 0x4a1   : > { %v5211_v44 = vmul.f32 %v9924_v62, %v5044_v36  ;;  %v5212_v13 = vmul.f32 %v9924_v62, %v5045_v42  ;;  %v5213_v48 = vmul.f32 %v9924_v62, %v5046_v46  ;;  %v5214_v43 = vmul.f32 %v9924_v62, %v5047_v19 }
 0x4a2   : > { %v5215_v41 = vmul.f32 %v9924_v62, %v5048_v51 }
 0x4a3   : > { %v5227_v53 = vcombine.high %v5211_v44, %v5211_v44  ;;  %v5234_v60 = vrot.slane %v5211_v44, %v10387_v33  ;;  %v5244_v52 = vcombine.high %v5212_v13, %v5212_v13  ;;  %v5261_v11 = vcombine.high %v5213_v48, %v5213_v48 }
 0x4a4   : > { %v5268_v15 = vrot.slane %v5213_v48, %v10387_v33  ;;  %v5278_v27 = vcombine.high %v5214_v43, %v5214_v43  ;;  %v5285_v39 = vrot.slane %v5214_v43, %v10387_v33  ;;  %v5251_v34 = vrot.slane %v5212_v13, %v10387_v33  ;;  %v6593_v45 = vpop.f32.mrf.mxu1 }
 0x4a5   : > { %v5295_v4 = vcombine.high %v5215_v41, %v5215_v41  ;;  %v5302_v26 = vrot.slane %v5215_v41, %v10387_v33  ;;  %v5241_v54 = vrot.slane %v5227_v53, %v10387_v33  ;;  %v5275_v50 = vrot.slane %v5261_v11, %v10387_v33 }
 0x4a6   : > { %v5276_v58 = vcombine.high %v5268_v15, %v5268_v15  ;;  %v5292_v28 = vrot.slane %v5278_v27, %v10387_v33  ;;  %v5242_v8 = vcombine.high %v5234_v60, %v5234_v60  ;;  %v5293_v5 = vcombine.high %v5285_v39, %v5285_v39  ;;  %v6594_v31 = vpop.f32.mrf.mxu1 }
 0x4a7   : > { %v6427_v23 = vrot.slane %v5268_v15, 9  ;;  %v5309_v10 = vrot.slane %v5295_v4, %v10387_v33  ;;  %v5310_v49 = vcombine.high %v5302_v26, %v5302_v26  ;;  %v6431_v29 = vrot.slane %v5285_v39, 9 }
 0x4a8   : > { %v6435_v9 = vrot.slane %v5302_v26, 9  ;;  %v5243_v2 = vcombine.high %v5241_v54, %v5241_v54  ;;  %v5258_v57 = vrot.slane %v5244_v52, %v10387_v33  ;;  %v5259_v21 = vcombine.high %v5251_v34, %v5251_v34 }
 0x4a9   : > { %v5311_v32 = vcombine.high %v5309_v10, %v5309_v10  ;;  %v6436_v25 = vrot.slane %v5310_v49, 9  ;;  %v6437_v30 = vrot.slane %v5309_v10, 9  ;;  %v6595_v56 = vadd.f32 %v6594_v31, %v6593_v45 }
 0x4aa   : > { %v9941_v20 = vmax.f32 %v5302_v26, %v6435_v9  ;;  %v5260_v6 = vcombine.high %v5258_v57, %v5258_v57  ;;  %v5277_v12 = vcombine.high %v5275_v50, %v5275_v50  ;;  %v5294_v22 = vcombine.high %v5292_v28, %v5292_v28 }
 0x4ab   : > { %v6438_v7 = vrot.slane %v5311_v32, 9  ;;  %v9943_v14 = vmax.f32 %v5310_v49, %v6436_v25  ;;  %v9945_v47 = vmax.f32 %v5309_v10, %v6437_v30  ;;  %v4926_v35 = vadd.f32 %v6595_v56, %v9905_v17 }
 0x4ac   : > { %v6419_v0 = vrot.slane %v5234_v60, 9  ;;  %v6420_v59 = vrot.slane %v5242_v8, 9  ;;  %v6421_v38 = vrot.slane %v5241_v54, 9  ;;  %v6422_v3 = vrot.slane %v5243_v2, 9 }
 0x4ad   : > { %v6423_v40 = vrot.slane %v5251_v34, 9  ;;  %v6424_v1 = vrot.slane %v5259_v21, 9  ;;  %v6425_v24 = vrot.slane %v5258_v57, 9  ;;  %v5031_v61 = vadd.f32 %v9832_v18, %v4926_v35 }
 0x4ae   : > { %v6426_v37 = vrot.slane %v5260_v6, 9  ;;  %v6428_v36 = vrot.slane %v5276_v58, 9  ;;  %v6429_v42 = vrot.slane %v5275_v50, 9  ;;  %v6430_v46 = vrot.slane %v5277_v12, 9 }
 0x4af   : > { %v6432_v19 = vrot.slane %v5293_v5, 9  ;;  %v6433_v51 = vrot.slane %v5292_v28, 9  ;;  %v6434_v44 = vrot.slane %v5294_v22, 9  ;;  %v5049_v13 = vmax.f32 %v5031_v61, 0.0 }
 0x4b0   : > { %v5491_v48 = vmax.f32 %v5234_v60, %v6419_v0  ;;  %v5492_v43 = vmax.f32 %v5242_v8, %v6420_v59  ;;  %v5493_v41 = vmax.f32 %v5241_v54, %v6421_v38  ;;  %v5494_v53 = vmax.f32 %v5243_v2, %v6422_v3 }
 0x4b1   : > { %v5495_v52 = vmax.f32 %v5251_v34, %v6423_v40  ;;  %v5496_v11 = vmax.f32 %v5259_v21, %v6424_v1  ;;  %v5497_v27 = vmax.f32 %v5258_v57, %v6425_v24  ;;  %v5216_v4 = vmul.f32 %v9924_v62, %v5049_v13 }
 0x4b2   : > { %v5498_v26 = vmax.f32 %v5260_v6, %v6426_v37  ;;  %v5499_v45 = vmax.f32 %v5268_v15, %v6427_v23  ;;  %v5500_v18 = vmax.f32 %v5276_v58, %v6428_v36  ;;  %v5501_v10 = vmax.f32 %v5275_v50, %v6429_v42 }
 0x4b3   : > { %v5502_v49 = vmax.f32 %v5277_v12, %v6430_v46  ;;  %v5503_v9 = vmax.f32 %v5285_v39, %v6431_v29  ;;  %v5504_v31 = vmax.f32 %v5293_v5, %v6432_v19  ;;  %v5312_v25 = vcombine.high %v5216_v4, %v5216_v4 }
 0x4b4   : > { %v5319_v30 = vrot.slane %v5216_v4, %v10387_v33  ;;  %v5505_v56 = vmax.f32 %v5292_v28, %v6433_v51  ;;  %v5506_v60 = vmax.f32 %v5294_v22, %v6434_v44  ;;  %v5523_v8 = vmax.f32 %v5491_v48, %v5495_v52  ;;  %v7051_v4 = vld [vmem:[#allocation4 + $0x1c] ss:$0 sps:$4 sm:$0xff]  }
 0x4b5   : > { %v5524_v54 = vmax.f32 %v5492_v43, %v5496_v11  ;;  %v5525_v2 = vmax.f32 %v5493_v41, %v5497_v27  ;;  %v5526_v34 = vmax.f32 %v5494_v53, %v5498_v26  ;;  %v5326_v57 = vrot.slane %v5312_v25, %v10387_v33  ;;  %v9977_v11 = vld [vmem:[#allocation4 + $0x8] sm:$0xff] }
 0x4b6   : > { %v5327_v21 = vcombine.high %v5319_v30, %v5319_v30  ;;  %v6439_v35 = vrot.slane %v5319_v30, 9  ;;  %v5510_v6 = vmax.f32 %v5311_v32, %v6438_v7  ;;  %v5527_v15 = vmax.f32 %v5499_v45, %v5503_v9  ;;  %v7052_v45 = vld [vmem:[#allocation4 + $0x34] ss:$0 sps:$4 sm:$0xff]   ;;  %v5837_v9 = vld [vmem:[%s10233_s9 + $0xb8] sm:$0xff] }
 0x4b7   : > { %v5528_v58 = vmax.f32 %v5500_v18, %v5504_v31  ;;  %v5529_v50 = vmax.f32 %v5501_v10, %v5505_v56  ;;  %v5530_v23 = vmax.f32 %v5502_v49, %v5506_v60  ;;  %v5328_v39 = vcombine.high %v5326_v57, %v5326_v57  ;;  %v5822_v18 = vld [vmem:[%s10233_s9 + $0x40] sm:$0xff]  ;;  %v7055_v49 = vld [vmem:[#allocation4 + $0x4c] ss:$0 sps:$4 sm:$0xff]   ;;  %v5820_v56 = vld [vmem:[%s10233_s9 + $0x30] sm:$0xff] }
 0x4b8   : > { %v6440_v5 = vrot.slane %v5327_v21, 9  ;;  %v6441_v29 = vrot.slane %v5326_v57, 9  ;;  %v5511_v12 = vmax.f32 %v5319_v30, %v6439_v35  ;;  %v5577_v28 = vrot.slane %v5523_v8, %v8528_v55  ;;  %6641 = vmatpush3.msra.mxu1 %v5822_v18  ;;  %v5821_v25 = vld [vmem:[%s10233_s9 + $0x38] sm:$0xff]  ;;  %v5836_v30 = vld [vmem:[%s10233_s9 + $0xb0] sm:$0xff]  ;;  %v5815_v18 = vld [vmem:[%s10233_s9 + $0x8] sm:$0xff] }
 0x4b9   : > { %v5581_v22 = vrot.slane %v5524_v54, %v8528_v55  ;;  %v5585_v0 = vrot.slane %v5525_v2, %v8528_v55  ;;  %v5589_v59 = vrot.slane %v5526_v34, %v8528_v55  ;;  %v6442_v38 = vrot.slane %v5328_v39, 9  ;;  %6642 = vmatprep.subr.mxu1 %v5837_v9  ;;  %v5814_v9 = vld [vmem:[%s10233_s9] sm:$0xff]  ;;  %v7062_v8 = vld [vmem:[#allocation4 + $0x4] ss:$0 sps:$4 sm:$0xff]  }
 0x4ba   : > { %v5512_v3 = vmax.f32 %v5327_v21, %v6440_v5  ;;  %v5513_v40 = vmax.f32 %v5326_v57, %v6441_v29  ;;  %v5531_v32 = vmax.f32 %v9941_v20, %v5511_v12  ;;  %v5593_v7 = vrot.slane %v5527_v15, %v8528_v55  ;;  %6643 = vmatpush3.msra.mxu1 %v5821_v25  ;;  %v5835_v21 = vld [vmem:[%s10233_s9 + $0xa8] sm:$0xff]  ;;  %v5834_v12 = vld [vmem:[%s10233_s9 + $0xa0] sm:$0xff] }
 0x4bb   : > { %v5597_v1 = vrot.slane %v5528_v58, %v8528_v55  ;;  %v5601_v24 = vrot.slane %v5529_v50, %v8528_v55  ;;  %v5638_v61 = vsel %vm10411_vm2, %v5581_v22, %v5577_v28  ;;  %v5514_v37 = vmax.f32 %v5328_v39, %v6442_v38  ;;  %vm10008_vm2 = vmor %vm697_vm3, %vm4379_vm15  ;;  %6644 = vmatprep.subr.mxu1 %v5836_v30 }
 0x4bc   : > { %v5532_v36 = vmax.f32 %v9943_v14, %v5512_v3  ;;  %v5533_v42 = vmax.f32 %v9945_v47, %v5513_v40  ;;  %v5605_v46 = vrot.slane %v5530_v23, %v8528_v55  ;;  %v5609_v19 = vrot.slane %v5531_v32, %v8528_v55  ;;  %v5819_v23 = vld [vmem:[%s10233_s9 + $0x28] sm:$0xff]  ;;  %6645 = vmatpush3.msra.mxu1 %v5820_v56  ;;  %v5818_v3 = vld [vmem:[%s10233_s9 + $0x20] sm:$0xff]  ;;  %vm10422_vm3 = vmmov %vm10415_vm0 }
 0x4bd   : > { %v5639_v51 = vsel %vm10412_vm9, %v5585_v0, %v5638_v61  ;;  %v5641_v20 = vsel %vm10413_vm12, %v5597_v1, %v5593_v7  ;;  %v5534_v44 = vmax.f32 %v5510_v6, %v5514_v37  ;;  %v5700_v26 = vcombine.high %v9977_v11, %v9977_v11  ;;  %6646 = vmatprep.subr.mxu1 %v5835_v21  ;;  %v5833_v1 = vld [vmem:[%s10233_s9 + $0x98] sm:$0xff]  ;;  %vm10423_vm15 = vmmov %vm10416_vm5 }
 0x4be   : > { %v5613_v13 = vrot.slane %v5532_v36, %v8528_v55  ;;  %v5617_v48 = vrot.slane %v5533_v42, %v8528_v55  ;;  %v5640_v43 = vsel %vm4377_vm14, %v5589_v59, %v5639_v51  ;;  %v5642_v41 = vsel %vm10414_vm13, %v5601_v24, %v5641_v20  ;;  %6647 = vmatpush3.msra.mxu1 %v5819_v23  ;;  %v5817_v42 = vld [vmem:[%s10233_s9 + $0x18] sm:$0xff] }
 0x4bf   : > { %5655 = vst.msk [vmem:[#allocation4 + $0x20] sm:$0xf] %vm5541_vm11, %v5640_v43  ;;  %v5621_v14 = vrot.slane %v5534_v44, %v8528_v55  ;;  %v5643_v53 = vsel %vm4377_vm14, %v5605_v46, %v5642_v41  ;;  %v6452_v54 = vrot.slane %v7051_v4, 11  ;;  %v6455_v34 = vrot.slane %v9977_v11, 9  ;;  %6648 = vmatprep.subr.mxu1 %v5834_v12  ;;  %v5832_v44 = vld [vmem:[%s10233_s9 + $0x90] sm:$0xff]  ;;  %v5831_v4 = vld [vmem:[%s10233_s9 + $0x88] sm:$0xff] }
 0x4c0   : > { %v5644_v47 = vsel %vm10415_vm0, %v5613_v13, %v5609_v19  ;;  %5656 = vst.msk [vmem:[#allocation4 + $0x38] sm:$0xf] %vm5541_vm11, %v5643_v53  ;;  %v5709_v57 = vrot.slane %v5700_v26, 5  ;;  %v6453_v50 = vrot.slane %v7052_v45, 11  ;;  %v6454_v29 = vrot.slane %v7055_v49, 11  ;;  %6649 = vmatpush3.msra.mxu1 %v5818_v3  ;;  %v5830_v49 = vld [vmem:[%s10233_s9 + $0x80] sm:$0xff] }
 0x4c1   : > { %v5645_v52 = vsel %vm10416_vm5, %v5617_v48, %v5644_v47  ;;  %6650 = vmatprep.subr.mxu1 %v5833_v1 }
 0x4c2   : > { %v5646_v27 = vsel %vm4377_vm14, %v5621_v14, %v5645_v52  ;;  %v5710_v7 = vsel %vm9998_vm10, %v6455_v34, %v5709_v57  ;;  %6651 = vmatpush3.msra.mxu1 %v5817_v42  ;;  %v5816_v52 = vld [vmem:[%s10233_s9 + $0x10] sm:$0xff] }
 0x4c3   : > { %5657 = vst.msk [vmem:[#allocation4 + $0x50] sm:$0xf] %vm5541_vm11, %v5646_v27  ;;  %6652 = vmatprep.subr.mxu1 %v5832_v44 }
 0x4c4   : > { %6653 = vmatpush3.msra.mxu1 %v5816_v52 }
 0x4c5   : > { %6654 = vmatprep.subr.mxu1 %v5831_v4 }
 0x4c6   : > { %v5662_v10 = vld [vmem:[#allocation4 + $0x20] sm:$0xff]  ;;  %6655 = vmatpush3.msra.mxu1 %v5815_v18 }
 0x4c7   : > { %v5701_v31 = vcombine.high %v5662_v10, %v5662_v10  ;;  %v5664_v60 = vld [vmem:[#allocation4 + $0x38] sm:$0xff]  ;;  %v5690_v2 = vrot.slane %v5662_v10, 7  ;;  %v6456_v6 = vrot.slane %v5662_v10, 9  ;;  %v5751_v46 = vcombine.low %v9977_v11, %v5662_v10  ;;  %6656 = vmatprep.subr.mxu1 %v5830_v49  ;;  %v5670_v18 = vld [vmem:[#allocation4 + $0x80] sm:$0xff] }
 0x4c8   : > { %v5702_v35 = vcombine.high %v5664_v60, %v5664_v60  ;;  %v5694_v5 = vrot.slane %v5664_v60, 7  ;;  %v10020_v28 = vcombine.low %v5662_v10, %v5664_v60  ;;  %v6457_v0 = vrot.slane %v5664_v60, 9  ;;  %6657 = vmatpush3.msra.mxu1 %v5814_v9  ;;  %v7059_v9 = vld [vmem:[#allocation4 + $0x64] ss:$0 sps:$4 sm:$0xff]  }
 0x4c9   : > { %v5713_v15 = vrot.slane %v5701_v31, 5  ;;  %v10031_v40 = vsel %vm10008_vm2, %v6452_v54, %v5690_v2  ;;  %v5742_v49 = vcombine.high %v5670_v18, %v5670_v18 }
 0x4ca   : > { %v10015_v39 = vld [vmem:[#allocation4 + $0x50] sm:$0xff]  ;;  %v5717_v59 = vrot.slane %v5702_v35, 5  ;;  %v5695_v61 = vsel %vm10008_vm2, %v6453_v50, %v5694_v5 }
 0x4cb   : > { %v5714_v22 = vsel %vm9998_vm10, %v6456_v6, %v5713_v15  ;;  %v5703_v38 = vcombine.high %v10015_v39, %v10015_v39  ;;  %v5698_v32 = vrot.slane %v10015_v39, 7  ;;  %v6458_v37 = vrot.slane %v10015_v39, 9 }
 0x4cc   : > { %v5718_v24 = vsel %vm9998_vm10, %v6457_v0, %v5717_v59  ;;  %v10049_v51 = vcombine.low %v5664_v60, %v10015_v39  ;;  %v5759_v43 = vcombine.low %v5710_v7, %v5714_v22  ;;  %v5767_v14 = vcombine.low %v10031_v40, %v5695_v61 }
 0x4cd   : > { %v5721_v36 = vrot.slane %v5703_v38, 5  ;;  %v5779_v19 = vcombine.low %v5714_v22, %v5718_v24  ;;  %v10053_v20 = vsel %vm10008_vm2, %v6454_v29, %v5698_v32 }
 0x4ce   : > { %v10063_v48 = vcombine.low %v5695_v61, %v10053_v20  ;;  %v7023_v26 = vpack.i.bf16 %v5767_v14, %v10049_v51 }
 0x4cf   : > { %v10060_v13 = vsel %vm9998_vm10, %v6458_v37, %v5721_v36  ;;  %v7018_v41 = vpack.i.bf16 %v5751_v46, %v5779_v19 }
 0x4d0   : > { %v10067_v47 = vcombine.low %v5718_v24, %v10060_v13  ;;  %v6596_v53 = vpop.f32.mrf.mxu1  ;;  %v7028_v27 = vpack.i.bf16 %v5759_v43, %v10063_v48 }
 0x4d1   : > { %7019 = vrot.lane.b32.xlu0 %v7018_v41, %s10338_s30 }
 0x4d2   : > { %6832 = vmatprep.mubr.msk.f32.mxu0 %vm1933_vm4, %v10067_v47  ;;  %v6597_v45 = vpop.f32.mrf.mxu1  ;;  %7029 = vrot.lane.b32.xlu1 %v7028_v27, %s7167_s21 }
 0x4d3   : > { %v6598_v10 = vadd.f32 %v6597_v45, %v6596_v53 }
 0x4d5   : > { %v4931_v31 = vadd.f32 %v6598_v10, %v9905_v17  ;;  %7024 = vrot.lane.b32.xlu0 %v7023_v26, %s10421_s15  ;;  %v7060_v10 = vld [vmem:[#allocation4 + $0x7c] ss:$0 sps:$4 sm:$0xff]  }
 0x4d7   : > { %v5036_v25 = vadd.f32 %v9838_v16, %v4931_v31  ;;  %v6599_v30 = vpop.f32.mrf.mxu1  ;;  %v6461_v31 = vrot.slane %v7060_v10, 11 }
 0x4d9   : > { %v5050_v56 = vmax.f32 %v5036_v25, 0.0  ;;  %v6600_v60 = vpop.f32.mrf.mxu1  ;;  %v5740_v25 = vrot.slane %v5670_v18, 7 }
 0x4da   : > { %v6601_v54 = vadd.f32 %v6600_v60, %v6599_v30  ;;  %v6016_v30 = vld [vmem:[%s10235_s11 + $0x18] sm:$0xff]  ;;  %v5745_v60 = vrot.slane %v5742_v49, 5 }
 0x4db   : > { %v5217_v2 = vmul.f32 %v9924_v62, %v5050_v56  ;;  %6835 = vmatprep.subr.mxu1 %v6016_v30  ;;  %v6462_v56 = vrot.slane %v5670_v18, 9 }
 0x4dc   : > { %v4936_v34 = vadd.f32 %v6601_v54, %v9905_v17  ;;  %v6459_v54 = vrot.slane %v7059_v9, 11 }
 0x4dd   : > { %v5329_v57 = vcombine.high %v5217_v2, %v5217_v2  ;;  %v5336_v21 = vrot.slane %v5217_v2, %v10387_v33 }
 0x4de   : > { %v5041_v35 = vadd.f32 %v9836_v63, %v4936_v34 }
 0x4df   : > { %v5343_v6 = vrot.slane %v5329_v57, %v10387_v33  ;;  %v5344_v50 = vcombine.high %v5336_v21, %v5336_v21  ;;  %v6443_v5 = vrot.slane %v5336_v21, 9 }
 0x4e0   : > { %v5051_v15 = vmax.f32 %v5041_v35, 0.0 }
 0x4e1   : > { %v5345_v23 = vcombine.high %v5343_v6, %v5343_v6  ;;  %v6444_v22 = vrot.slane %v5344_v50, 9  ;;  %v6445_v0 = vrot.slane %v5343_v6, 9  ;;  %v5515_v32 = vmax.f32 %v5336_v21, %v6443_v5 }
 0x4e2   : > { %v5218_v16 = vmul.f32 %v9924_v62, %v5051_v15  ;;  %v5741_v21 = vsel %vm10008_vm2, %v6461_v31, %v5740_v25 }
 0x4e3   : > { %v6446_v3 = vrot.slane %v5345_v23, 9  ;;  %v5516_v61 = vmax.f32 %v5344_v50, %v6444_v22  ;;  %v5517_v37 = vmax.f32 %v5343_v6, %v6445_v0  ;;  %v5746_v50 = vsel %vm9998_vm10, %v6462_v56, %v5745_v60 }
 0x4e4   : > { %v5346_v29 = vcombine.high %v5218_v16, %v5218_v16  ;;  %v5353_v12 = vrot.slane %v5218_v16, %v10387_v33 }
 0x4e5   : > { %v5518_v19 = vmax.f32 %v5345_v23, %v6446_v3 }
 0x4e6   : > { %v5360_v17 = vrot.slane %v5346_v29, %v10387_v33  ;;  %v5361_v59 = vcombine.high %v5353_v12, %v5353_v12  ;;  %v6447_v38 = vrot.slane %v5353_v12, 9 }
 0x4e8   : > { %v5362_v63 = vcombine.high %v5360_v17, %v5360_v17  ;;  %v6448_v7 = vrot.slane %v5361_v59, 9  ;;  %v6449_v1 = vrot.slane %v5360_v17, 9  ;;  %v5519_v24 = vmax.f32 %v5353_v12, %v6447_v38 }
 0x4e9   : > { %v6451_v38 = vrot.slane %v7062_v8, 11 }
 0x4ea   : > { %v6450_v62 = vrot.slane %v5362_v63, 9  ;;  %v5520_v36 = vmax.f32 %v5361_v59, %v6448_v7  ;;  %v5521_v42 = vmax.f32 %v5360_v17, %v6449_v1  ;;  %v5535_v46 = vmax.f32 %v5515_v32, %v5519_v24 }
 0x4ec   : > { %v5522_v44 = vmax.f32 %v5362_v63, %v6450_v62  ;;  %v5536_v43 = vmax.f32 %v5516_v61, %v5520_v36  ;;  %v5537_v41 = vmax.f32 %v5517_v37, %v5521_v42  ;;  %v5625_v33 = vrot.slane %v5535_v46, %v8528_v55 }
 0x4ee   : > { %v5538_v14 = vmax.f32 %v5518_v19, %v5522_v44  ;;  %v5629_v53 = vrot.slane %v5536_v43, %v8528_v55  ;;  %v5633_v52 = vrot.slane %v5537_v41, %v8528_v55  ;;  %v6014_v19 = vld [vmem:[%s10235_s11 + $0x8] sm:$0xff]  ;;  %v6013_v44 = vld [vmem:[%s10235_s11] sm:$0xff] }
 0x4f0   : > { %v5637_v27 = vrot.slane %v5538_v14, %v8528_v55  ;;  %v5647_v4 = vsel %vm10422_vm3, %v5629_v53, %v5625_v33 }
 0x4f1   : > { %v5648_v26 = vsel %vm10423_vm15, %v5633_v52, %v5647_v4 }
 0x4f2   : > { %v5649_v45 = vsel %vm4377_vm14, %v5637_v27, %v5648_v26 }
 0x4f3   : > { %5658 = vst.msk [vmem:[#allocation4 + $0x68] sm:$0xf] %vm5541_vm11, %v5649_v45 }
 0x4fa   : > { %v5668_v2 = vld [vmem:[#allocation4 + $0x68] sm:$0xff] }
 0x4fb   : > { %v5730_v34 = vcombine.high %v5668_v2, %v5668_v2  ;;  %v5728_v57 = vrot.slane %v5668_v2, 7  ;;  %v10115_v35 = vcombine.low %v10015_v39, %v5668_v2  ;;  %v6460_v6 = vrot.slane %v5668_v2, 9 }
 0x4fc   : > { %v5794_v17 = vcombine.low %v5668_v2, %v5670_v18 }
 0x4fd   : > { %v5733_v15 = vrot.slane %v5730_v34, 5  ;;  %v5729_v16 = vsel %vm10008_vm2, %v6459_v54, %v5728_v57 }
 0x4fe   : > { %v5787_v23 = vcombine.low %v5729_v16, %v5741_v21  ;;  %v5768_v0 = vcombine.low %v10053_v20, %v5729_v16 }
 0x4ff   : > { %v5734_v5 = vsel %vm9998_vm10, %v6460_v6, %v5733_v15 }
 0x500   : > { %v5801_v29 = vcombine.low %v5734_v5, %v5746_v50  ;;  %v7038_v12 = vpack.i.bf16 %v10067_v47, %v5787_v23  ;;  %v5780_v22 = vcombine.low %v10060_v13, %v5734_v5  ;;  %v7043_v59 = vpack.i.bf16 %v5768_v0, %v5794_v17  ;;  %v6463_v17 = vld [vmem:[%s10234_s10] ss:$0 sm:$0xff] }
 0x501   : > { %v5686_v47 = vrot.slane %v9977_v11, 7 }
 0x502   : > { %6833 = vmatmul.mubr.msk.f32.vlgmr.msra.gmra.mxu0 %vm1933_vm4, %v5801_v29  ;;  %7039 = vrot.lane.b32.xlu0 %v7038_v12, %s7167_s21  ;;  %v7033_v39 = vpack.i.bf16 %v10049_v51, %v5780_v22  ;;  %s433_s21 = scalar_lea.vmem [#allocation5], %s6202_s17 }
 0x503   : > { %v5687_v13 = vsel %vm10008_vm2, %v6451_v38, %v5686_v47  ;;  %s6136_s22 = sshll.u32 %s433_s21, 4  ;;  %s10179_s22 = int_to_ptr.vmem [resolvable:$true] %s6136_s22 }
 0x504   : > { %7034 = vrot.lane.b32.xlu1 %v7033_v39, %s10338_s30  ;;  %v5747_v51 = vcombine.low %v5687_v13, %v10031_v40  ;;  %v6015_v40 = vld [vmem:[%s10235_s11 + $0x10] sm:$0xff]  ;;  %s6475_s30 = sshll.u32 %s7262_s29, 8  ;;  %s10183_s29 = scalar_lea.sflag [#allocation6], %s431_s1 }
 0x505   : > { %s10177_s3 = scalar_lea.hbm %s10237_s13, %s6475_s30  ;;  %s7095_s4 = scalar_lea.vmem %s10179_s22, 256 }
 0x506   : > { %p7096_p11 = scmp.ne.s32.totalorder %s10179_s22, %s7095_s4  ;;  %p7102_p0 = scmp.lt.s32.totalorder %s10179_s22, %s7100_s0 }
 0x508   : > { %7044 = vrot.lane.b32.xlu1 %v7043_v59, %s10421_s15  ;;  %p7097_p12 = pnand %p7096_p11, %p7279_p5  ;;  %s7101_s15 = scalar_lea.vmem %s7100_s0, 512 }
 0x509   : > { %p7103_p1 = scmp.lt.s32.totalorder %s7101_s15, %s7095_s4 }
 0x50a   : > { %p7098_p13 = pneg %p7097_p12 }
 0x50b   : > { %p7104_p2 = por %p7103_p1, %p7102_p0 }
 0x50d   : > { %p7105_p3 = pnand %p7104_p2, %p7098_p13 }
 0x543   : > { %v7020_v3 = vpop.permute.xlu0 %7019 }
 0x544   : > { %v7022_v32 = vunpack.i.h.bf16 %v7020_v3  ;;  %v7021_v63 = vunpack.i.l.bf16 %v7020_v3  ;;  %v7030_v7 = vpop.permute.xlu1 %7029 }
 0x545   : > { %v7032_v20 = vunpack.i.h.bf16 %v7030_v7  ;;  %v7031_v1 = vunpack.i.l.bf16 %v7030_v7 }
 0x546   : > { %v5802_v24 = vsel %vm1933_vm4, %v5747_v51, %v7022_v32  ;;  %v5808_v61 = vsel %vm1933_vm4, %v10020_v28, %v7021_v63 }
 0x547   : > { %v7025_v37 = vpop.permute.xlu0 %7024  ;;  %v5804_v62 = vsel %vm4733_vm6, %v5802_v24, %v7032_v20  ;;  %v5810_v11 = vsel %vm4733_vm6, %v5808_v61, %v7031_v1 }
 0x548   : > { %v7027_v58 = vunpack.i.h.bf16 %v7025_v37  ;;  %v7026_v36 = vunpack.i.l.bf16 %v7025_v37 }
 0x54a   : > { %v5812_v42 = vsel %vm4742_vm7, %v5810_v11, %v7026_v36  ;;  %v5806_v46 = vsel %vm4742_vm7, %v5804_v62, %v7027_v58 }
 0x54b   : > { %5925 = vmatprep.mubr.f32.mxu1 %v5812_v42 }
 0x54c   : > { %5926 = vmatmul.mubr.f32.vlgmr.msra.gmra.mxu1 %v5806_v46 }
 0x54d   : > { %6836 = vmatpush3.msra.mxu1 %v6016_v30 }
 0x54e   : > { %6837 = vmatprep.subr.mxu1 %v6015_v40 }
 0x54f   : > { %6838 = vmatpush3.msra.mxu1 %v6015_v40 }
 0x550   : > { %6839 = vmatprep.subr.mxu1 %v6014_v19 }
 0x551   : > { %6840 = vmatpush3.msra.mxu1 %v6014_v19 }
 0x552   : > { %6841 = vmatprep.subr.mxu1 %v6013_v44 }
 0x553   : > { %6842 = vmatpush3.msra.mxu1 %v6013_v44 }
 0x574   : > { %v7040_v41 = vpop.permute.xlu0 %7039 }
 0x575   : > { %v7042_v27 = vunpack.i.h.bf16 %v7040_v41  ;;  %v7041_v4 = vunpack.i.l.bf16 %v7040_v41 }
 0x576   : > { %v7035_v43 = vpop.permute.xlu1 %7034 }
 0x577   : > { %v7037_v14 = vunpack.i.h.bf16 %v7035_v43  ;;  %v7036_v33 = vunpack.i.l.bf16 %v7035_v43 }
 0x579   : > { %v5809_v53 = vsel %vm1933_vm4, %v10115_v35, %v7036_v33  ;;  %v5803_v52 = vsel %vm1933_vm4, %v10063_v48, %v7037_v14 }
 0x57a   : > { %v7045_v26 = vpop.permute.xlu1 %7044  ;;  %v5811_v10 = vsel %vm4733_vm6, %v5809_v53, %v7041_v4  ;;  %v5805_v49 = vsel %vm4733_vm6, %v5803_v52, %v7042_v27 }
 0x57b   : > { %v7047_v45 = vunpack.i.h.bf16 %v7045_v26  ;;  %v7046_v18 = vunpack.i.l.bf16 %v7045_v26 }
 0x57d   : > { %v5813_v9 = vsel %vm4742_vm7, %v5811_v10, %v7046_v18  ;;  %v5807_v31 = vsel %vm4742_vm7, %v5805_v49, %v7047_v45 }
 0x57e   : > { %5930 = vmatprep.mubr.f32.mxu1 %v5813_v9 }
 0x57f   : > { %5931 = vmatmul.mubr.f32.gmra.mxu1 %v5807_v31 }
 0x580   : > { %6843 = vmatprep.mubr.msk.f32.mxu1 %vm1933_vm4, %v10020_v28 }
 0x583   : > { %6844 = vmatmul.mubr.msk.f32.vlgmr.msra.gmra.mxu1 %vm1933_vm4, %v10115_v35  ;;  %v6106_v35 = vld [vmem:[%s10236_s12] sm:$0x1] }
 0x5c2   : > { %v6834_v59 = vpop.f32.mrf.mxu0 }
 0x5c4   : > { %v6002_v47 = vpop.f32.mrf.mxu0 }
 0x60c   : > { %v6658_v48 = vpop.f32.mrf.mxu1 }
 0x60e   : > { %v6659_v25 = vpop.f32.mrf.mxu1 }
 0x60f   : > { %v6660_v39 = vadd.f32 %v6659_v25, %v6658_v48 }
 0x611   : > { %v5928_v8 = vadd.f32 %v6660_v39, %v6463_v17 }
 0x613   : > { %v6003_v13 = vadd.f32 %v6002_v47, %v5928_v8 }
 0x615   : > { %v6011_v63 = vmax.f32 %v6003_v13, 0.0 }
 0x63f   : > { %v6661_v30 = vpop.f32.mrf.mxu1 }
 0x641   : > { %v6662_v56 = vpop.f32.mrf.mxu1 }
 0x642   : > { %v6663_v0 = vadd.f32 %v6662_v56, %v6661_v30 }
 0x643   : > { %v6845_v60 = vpop.f32.mrf.mxu1 }
 0x644   : > { %v6097_v2 = vsel %vm1933_vm4, %v6845_v60, 0.0  ;;  %v5933_v38 = vadd.f32 %v6663_v0, %v6463_v17 }
 0x645   : > { %v6087_v54 = vpop.f32.mrf.mxu1 }
 0x646   : > { %v6096_v34 = vsel %vm1933_vm4, %v6087_v54, 0.0  ;;  %v6008_v3 = vadd.f32 %v6834_v59, %v5933_v38 }
 0x647   : > { %v6098_v57 = vadd.f32 %v6097_v2, %v6096_v34 }
 0x648   : > { %v6012_v51 = vmax.f32 %v6008_v3, 0.0 }
 0x649   : > { %v6099_v21 = vrot.slane %v6098_v57, 4 }
 0x64b   : > { %v6100_v6 = vadd.f32 %v6099_v21, %v6098_v57 }
 0x64d   : > { %v6101_v15 = vrot.slane %v6100_v6, 2 }
 0x64f   : > { %v6102_v50 = vadd.f32 %v6101_v15, %v6100_v6 }
 0x651   : > { %v6103_v28 = vrot.slane %v6102_v50, 1 }
 0x653   : > { %v6104_v16 = vadd.f32 %v6103_v28, %v6102_v50 }
 0x655   : > { %v6105_v23 = vmul.f32 0.0625, %v6104_v16 }
 0x657   : > { %v6107_v5 = vadd.f32 %v6106_v35, %v6105_v23 }
 0x659   : > { %v6468_v29 = vmul.f32 -1.442695, %v6107_v5 }
 0x65b   : > { %7071 = vpow2.f32 %v6468_v29 }
 0x668   : > { %v7072_v12 = vpop.eup %7071 }
 0x669   : > { %v6111_v22 = vadd.f32 1.0, %v7072_v12 }
 0x66b   : > { %7073 = vrcp.f32 %v6111_v22 }
 0x678   : > { %v7074_v32 = vpop.eup %7073 }
 0x679   : > { %v6117_v7 = vrot.slane %v7074_v32, %v8528_v55 }
 0x67b   : > { %v6118_v20 = vmul.f32 %v6117_v7, %v6011_v63  ;;  %v6119_v1 = vmul.f32 %v6117_v7, %v6012_v51 }
 0x67d   : > { %6120 = vst.msk [vmem:[%s433_s21] sm:$0xff] %vm1933_vm4, %v6118_v20  ;;  %6121 = vst.msk [vmem:[%s433_s21 + $0x8] sm:$0xff] %vm1933_vm4, %v6119_v1 }
 0x67e   : > { %7108 = shalt.err (!%p7105_p3)
}
 0x67f   : > { %s7109_s1 = scalar_lea.hbm %s10177_s3, 256  ;;  %s7113_s21 = scalar_lea.hbm %s10237_s13, 512 }
 0x680   : > { %p7110_p4 = scmp.ne.s32.totalorder %s10177_s3, %s7109_s1  ;;  %p7114_p9 = scmp.lt.s32.totalorder %s10177_s3, %s10237_s13 }
 0x681   : > { %p7115_p10 = scmp.lt.s32.totalorder %s7113_s21, %s7109_s1 }
 0x682   : > { %p7111_p7 = pnand %p7110_p4, %p7279_p5 }
 0x683   : > { %p7116_p11 = por %p7115_p10, %p7114_p9 }
 0x684   : > { %p7112_p8 = pneg %p7111_p7 }
 0x686   : > { %p7117_p12 = pnand %p7116_p11, %p7112_p8 }
 0x688   : > { %7120 = shalt.err (!%p7117_p12)
}
 0x689   : > { %s7170_s4 = smov 128  }
 0x68a   : > { %6846 = dma.vmem_to_hbm [thread:$0]  (%p7279_p5), %s10179_s22, 256, %s10177_s3, %s10183_s29, %s7170_s4, %s7170_s4, %s10302_s20  }
 0x68b PF: > { %p6852_p13 = scmp.ge.s32.totalorder %s7155_s28, 2  ;;  %s6151_s16 = sand.u32 1, %s7143_s25  }
 0x68c   : > { %s6152_s0 = scalar_lea.sflag [#allocation6], %s6151_s16 }
 0x68d   : > { %p6849_p0 = pnand %p6852_p13, %p7283_p6 }
 0x68f   : > { %p6850_p1 = pneg %p6849_p0 }
 0x691   : > { %7138 = dma.done.wait (%p6850_p1), %s6152_s0, 256  }
 0x692   : > { %7140 = vsyncadd (%p6850_p1), %s6152_s0, 4294967040  ;;  %s10424_s18 = sld [smem:[#allocation8_spill]]  ;;  %p23_p2 = scmp.ge.s32.totalorder %s7266_s14, 4  }
 0x693   : > { %s10425_s25 = smov %s7147_s26  ;;  %s10426_s26 = smov %s7151_s27 }
 0x694   : > { %s10428_s28 = smov %s7266_s14  ;;  %25 = sbr.rel (!%p23_p2) target bundleno = 8 (0x8), region = 110 }
 0x698   : > { %s10427_s27 = smov %s10424_s18 }
 0x699   :  { %6157 = vsyncpa [#allocation6], 1 }
 0x69a   :  { %6159 = vsyncpa [#allocation6 + $0x1], 1 }

</bundles_post_ra>
